<compile_context>
chip_gen: v7x
topology: tpu7x:2x2x1
jax: 0.10.0
libtpu: 0.0.40
codegen_flags: <defaults>
</compile_context>

<pallas_src>
import jax
import jax.numpy as jnp
from jax.experimental import pallas as pl
from jax.experimental.pallas import tpu as pltpu

_LANE = 128                      # vreg lane width (last dim)
_MIN_PALLAS_BYTES = 512 * 1024   # below ~0.5 MiB a fused XLA add is as fast


def _add_one_kernel(x_ref, o_ref):
    # Elementwise on the VPU: output = input + 1.
    o_ref[...] = x_ref[...] + jnp.asarray(1, dtype=o_ref.dtype)


def _sublane_req(dtype) -> int:
    """Native packed sublane tile: 8 rows (f32), 16 (bf16/f16), 32 (int8/fp8)."""
    itemsize = jnp.dtype(dtype).itemsize
    return 8 * max(1, 4 // max(1, itemsize))


def _divisors(x):
    out = set()
    i = 1
    while i * i <= x:
        if x % i == 0:
            out.add(i)
            out.add(x // i)
        i += 1
    return sorted(out)


def _largest_divisor_leq(x, cap):
    best = 1
    for d in _divisors(x):
        if d <= cap:
            best = d
    return best


def _sublane_dense_2d(shape, sub):
    """Pick an (M, N) factoring with M % sub == 0 and N % 128 == 0, else None."""
    total = 1
    for d in shape:
        total *= int(d)
    if total == 0:
        return None
    # Prefer keeping the natural last dim if it is already lane-dense.
    if len(shape) >= 2:
        n = int(shape[-1])
        if n % _LANE == 0:
            m = total // n
            if m % sub == 0:
                return m, n
    # Otherwise try common lane-dense widths, widest first.
    for n in (4096, 2048, 1024, 512, 256, _LANE):
        if total % n == 0:
            m = total // n
            if m % sub == 0:
                return m, n
    return None


def _vmem_plan():
    """Per-generation scoped VMEM limit and per-buffer block budget (bytes)."""
    default_cap = 64 * 1024 * 1024
    try:
        info = pltpu.get_tpu_info()
        cap = int(getattr(info, "vmem_capacity_bytes", default_cap))
    except Exception:  # pragma: no cover - conservative fallback off-TPU
        cap = default_cap
    # ~75% of physical VMEM: 48 MiB on v7x (64 MiB), 96 MiB on v5e/v6e (128 MiB).
    vmem_limit = min(cap * 3 // 4, 100 * 1024 * 1024)
    # 1 input + 1 output, each double-buffered (4 live buffers) + headroom.
    per_buffer = max(1, vmem_limit // 6)
    return vmem_limit, per_buffer


def _pick_tiles(m, n, itemsize, sub, per_buffer):
    """(tm, tn) with tm | m, tn | n, sublane/lane aligned, <= per_buffer bytes."""
    row_bytes = n * itemsize
    if sub * row_bytes <= per_buffer:
        # Full-lane-width row blocks: contiguous HBM DMA, unmasked stores.
        tn = n
    else:
        # Extremely wide rows: column tile that divides n exactly (128-dense).
        units_n = n // _LANE
        cap_units = max(1, per_buffer // (sub * _LANE * itemsize))
        tn = _largest_divisor_leq(units_n, cap_units) * _LANE
    units_m = m // sub
    cap = max(1, (per_buffer // (tn * itemsize)) // sub)
    cap = min(cap, units_m)
    if units_m >= 2:
        # Leave >= 2 row blocks so the pipeline overlaps and v7x's 2nd TC works.
        cap = min(cap, max(1, units_m // 2))
    tm = _largest_divisor_leq(units_m, cap) * sub
    return tm, tn


def my_model_forward(x: jax.Array) -> jax.Array:
    """JAX/Pallas equivalent of myModel.forward: returns x + 1."""
    dtype = x.dtype
    itemsize = jnp.dtype(dtype).itemsize
    total = int(x.size)
    sub = _sublane_req(dtype)
    slab = _sublane_dense_2d(x.shape, sub)

    # Scalar / tiny / awkward shapes: fused XLA add beats a kernel launch.
    if slab is None or total * itemsize < _MIN_PALLAS_BYTES:
        return x + jnp.asarray(1, dtype=dtype)

    m, n = slab
    x2d = x.reshape(m, n)

    vmem_limit, per_buffer = _vmem_plan()
    tm, tn = _pick_tiles(m, n, itemsize, sub, per_buffer)
    grid = (m // tm, n // tn)   # exact: tm | m and tn | n, no masked blocks

    out2d = pl.pallas_call(
        _add_one_kernel,
        out_shape=jax.ShapeDtypeStruct((m, n), dtype),
        grid=grid,
        in_specs=[pl.BlockSpec((tm, tn), lambda i, j: (i, j))],
        out_specs=pl.BlockSpec((tm, tn), lambda i, j: (i, j)),
        # Reuse the input HBM buffer for the output when it is donatable.
        input_output_aliases={0: 0},
        # Pure HBM streaming hint for XLA's scheduler.
        cost_estimate=pl.CostEstimate(
            flops=total, transcendentals=0,
            bytes_accessed=2 * total * itemsize),
        compiler_params=pltpu.CompilerParams(
            dimension_semantics=("parallel", "parallel"),
            vmem_limit_bytes=vmem_limit),
    )(x2d)

    return out2d.reshape(x.shape)


if __name__ == "__main__":
    key = jax.random.PRNGKey(0)
    k1, k2, k3 = jax.random.split(key, 3)

    # Tutorial path: x = torch.tensor(1.0) -> 0-d scalar (fused-add fallback).
    x_scalar = jnp.asarray(1.0, dtype=jnp.float32)
    y_scalar = jax.block_until_ready(my_model_forward(x_scalar))
    assert y_scalar.shape == ()
    assert jnp.allclose(y_scalar, 2.0)

    # Small tensor (8 KiB): below the Pallas crossover -> fused XLA add.
    x_small = jax.random.normal(k1, (2, 4, 16, 16), dtype=jnp.float32)
    y_small = jax.block_until_ready(my_model_forward(x_small))
    assert y_small.shape == (2, 4, 16, 16)
    assert jnp.allclose(y_small, x_small + 1.0)

    # f32 slab through the Pallas kernel: full-width (tm, 1536) row blocks.
    x_big = jax.random.normal(k2, (1024, 1536), dtype=jnp.float32)
    y_big = jax.block_until_ready(my_model_forward(x_big))
    assert y_big.shape == (1024, 1536)
    assert jnp.allclose(y_big, x_big + 1.0)

    # bf16 slab: dtype-aware sublane alignment (16-row packing), full-width rows.
    x_bf16 = jax.random.normal(k3, (512, 1024), dtype=jnp.bfloat16)
    y_bf16 = jax.block_until_ready(my_model_forward(x_bf16))
    assert y_bf16.shape == (512, 1024)
    assert jnp.allclose(y_bf16.astype(jnp.float32),
                        (x_bf16 + jnp.asarray(1, jnp.bfloat16)).astype(jnp.float32))

    print("KERNEL_OK")
</pallas_src>

<mosaic_0001>
module attributes {stable_mosaic.version = 11 : i64} {
  func.func @_add_one_kernel(%arg0: i32, %arg1: i32, %arg2: memref<512x1536xf32, #tpu.memory_space<vmem>>, %arg3: memref<512x1536xf32, #tpu.memory_space<vmem>>) attributes {dimension_semantics = [#tpu.dimension_semantics<parallel>, #tpu.dimension_semantics<parallel>], iteration_bounds = array<i64: 2, 1>, scalar_prefetch = 0 : i64, scratch_operands = 0 : i64, tpu.core_type = #tpu.core_type<tc>, window_params = [{transform_indices = @transform_0, window_bounds = array<i64: 512, 1536>}, {transform_indices = @transform_1, window_bounds = array<i64: 512, 1536>}]} {
    %c0 = arith.constant 0 : index
    %c0_0 = arith.constant 0 : index
    %0 = vector.load %arg2[%c0, %c0_0] : memref<512x1536xf32, #tpu.memory_space<vmem>>, vector<512x1536xf32>
    %cst = arith.constant 1.000000e+00 : f32
    %1 = vector.broadcast %cst : f32 to vector<512x1536xf32>
    %2 = arith.addf %0, %1 : vector<512x1536xf32>
    %c0_1 = arith.constant 0 : index
    %c0_2 = arith.constant 0 : index
    %3 = vector.load %arg3[%c0_1, %c0_2] : memref<512x1536xf32, #tpu.memory_space<vmem>>, vector<512x1536xf32>
    tpu.vector_store %arg3[%c0_1, %c0_2], %2 {strides = array<i32>} : memref<512x1536xf32, #tpu.memory_space<vmem>>, vector<512x1536xf32>,
    return
  }
  func.func @transform_0(%arg0: i32, %arg1: i32) -> (i32, i32) {
    %c0_i32 = arith.constant 0 : i32
    return %arg0, %arg1 : i32, i32
  }
  func.func @transform_1(%arg0: i32, %arg1: i32) -> (i32, i32) {
    %c0_i32 = arith.constant 0 : i32
    return %arg0, %arg1 : i32, i32
  }
}

</mosaic_0001>

<bundles_post_ra>
// kernel: tpu_custom_call.1
= control target key start
LH: loop header
LB: loop body
LE: loop exit
PB: predicated region body
PF: predicated region fallthrough
CT: control target
= control target key end

     0   :  { %6 = vsyncpa [#allocation3], 0  ;;  %s4495_s0 = inlined_call_operand.hbm [shape: f32[1024,1536], index: 0, kind: input, shape index: {}, may-alias: {0,1}]   ;;  %s4496_s1 = inlined_call_operand.hbm [shape: f32[1024,1536], index: 1, kind: output, shape index: {}, may-alias: {0,1}]  }
   0x1   :  { %8 = vsyncpa [#allocation3 + $0x1], 0 }
   0x2   :  { %9 = vsyncpa [#allocation4], 0 }
   0x3   :  { %11 = vsyncpa [#allocation4 + $0x1], 0  ;;  %s2779_s6 = smov 0   ;;  %s2781_s7 = smov 0  }
   0x4   :  { %s2783_s8 = smov 0   ;;  %s2785_s9 = smov 0  }
   0x5   :  { %s2787_s10 = smov 0   ;;  %s2789_s11 = smov 0  }
   0x6 LB: > { %s2566_s12 = sadd.s32 4294967295, %s2761_s11   ;;  %s2567_s13 = sadd.s32 4294967294, %s2761_s11   ;;  %s2761_s11 = sphi %s2789_s11, %s17_s11   ;;  %s2757_s10 = sphi %s2787_s10, %s4511_s10   ;;  %s2753_s9 = sphi %s2785_s9, %s4510_s9   ;;  %s2749_s8 = sphi %s2783_s8, %s4509_s8   ;;  %s2745_s7 = sphi %s2781_s7, %s4508_s7   ;;  %s2741_s6 = sphi %s2779_s6, %s4507_s6  }
   0x7   : > { %s29_s14 = sadd.s32 1, %s2757_s10  ;;  %s38_s15 = sadd.s32 1, %s2749_s8 }
   0x8   : > { %p31_p0 = scmp.ge.s32.totalorder %s29_s14, 2  ;;  %p45_p1 = scmp.ne.s32.totalorder %s2749_s8, %s2745_s7 }
   0x9   : > { %p46_p2 = scmp.eq.s32.totalorder %s2761_s11, 0  ;;  %p51_p3 = scmp.ne.s32.totalorder %s2745_s7, %s2741_s6 }
   0xa   : > { %s4513_s14 = smov (%p31_p0, %s29_s14), 0  ;;  %p52_p5 = scmp.eq.s32.totalorder %s2566_s12, 0 }
   0xb   : > { %p2820_p4 = por %p46_p2, %p45_p1  ;;  %s33_s17 = ssub.s32 %s2757_s10, %s4513_s14 }
   0xc   : > { %p77_p6 = scmp.eq.s32.totalorder %s2566_s12, 1  ;;  %p36_p7 = scmp.eq.s32.totalorder %s33_s17, 0 }
   0xd   : > { %p2826_p8 = por %p52_p5, %p51_p3  ;;  %p83_p10 = scmp.eq.s32.totalorder %s2567_s13, 1 }
   0xe   : > { %p2830_p9 = por %p77_p6, %p45_p1  ;;  %p2595_p13 = scmp.lt.s32.totalorder %s2761_s11, 2 }
   0xf   : > { %s2835_s20 = scalar_select %p36_p7, %s2749_s8, %s38_s15  }
  0x10   : > { %s4500_s19 = scalar_select %p2830_p9, 1, 0 }
  0x11   : > { %p2837_p11 = por %p83_p10, %p51_p3  ;;  %s103_s22 = sand.u32 1, %s2749_s8  }
  0x12   : > { %s2579_s23 = smul.u32 6144, %s103_s22  ;;  %p2847_p0 = pnand %p2595_p13, %p2820_p4 }
  0x13   : > { %s4501_s21 = scalar_select %p2837_p11, 1, 0 }
  0x14   : > { %s2580_s24 = smul.u32 98304, %s2757_s10  ;;  %s107_s29 = scalar_lea.vmem [#allocation2], %s2579_s23 }
  0x15   : > { %s117_s30 = sshll.u32 %s107_s29, 4  ;;  %s2859_s2 = scalar_lea.sflag [#allocation3], %s103_s22  ;;  %s2856_s30 = int_to_ptr.vmem [resolvable:$true] %s117_s30 }
  0x16   : > { %s2854_s28 = scalar_lea.hbm %s4495_s0, %s2580_s24  ;;  %p2651_p3 = pneg %p2847_p0 }
  0x17   : > { %s2649_s3 = scalar_lea.hbm %s2854_s28, 98304  ;;  %s2654_s12 = scalar_lea.hbm %s4495_s0, 196608 }
  0x18   : > { %p2650_p2 = scmp.ne.s32.totalorder %s2854_s28, %s2649_s3  ;;  %p2655_p6 = scmp.lt.u32.totalorder %s2854_s28, %s4495_s0 }
  0x19   : > { %p2656_p7 = scmp.lt.u32.totalorder %s2654_s12, %s2649_s3  ;;  %p2658_p13 = scmp.lt.u32.totalorder %s2649_s3, %s2854_s28 }
  0x1a   : > { %p2652_p4 = pnand %p2651_p3, %p2650_p2 }
  0x1b   : > { %p2657_p10 = por %p2656_p7, %p2655_p6 }
  0x1c   : > { %p2653_p5 = pneg %p2652_p4 }
  0x1d   : > { %p2659_p12 = por %p2658_p13, %p2657_p10 }
  0x1f   : > { %p2660_p1 = pnand %p2659_p12, %p2653_p5 }
  0x21   : > { %2663 = shalt.err (!%p2660_p1)
}
  0x22   : > { %s2664_s16 = scalar_lea.vmem %s2856_s30, 98304  ;;  %s2763_s17 = smov [#allocation2]  }
  0x23   : > { %p2665_p2 = scmp.ne.s32.totalorder %s2856_s30, %s2664_s16  ;;  %s2669_s22 = sshll.u32 %s2763_s17, 4  ;;  %s2670_s22 = int_to_ptr.vmem [resolvable:$false] %s2669_s22 }
  0x24   : > { %s2671_s23 = scalar_lea.vmem %s2670_s22, 196608  ;;  %p2672_p9 = scmp.lt.s32.totalorder %s2856_s30, %s2670_s22 }
  0x25   : > { %p2667_p4 = pnand %p2665_p2, %p2651_p3  ;;  %p2673_p6 = scmp.lt.s32.totalorder %s2671_s23, %s2664_s16 }
  0x27   : > { %p2668_p11 = pneg %p2667_p4  ;;  %p2674_p7 = por %p2673_p6, %p2672_p9 }
  0x29   : > { %p2675_p10 = pnand %p2674_p7, %p2668_p11 }
  0x2b   : > { %2678 = shalt.err (!%p2675_p10)
}
  0x2c   : > { %s2764_s24 = smov 1536   ;;  %s2765_s26 = smov 96  }
  0x2d   : > { %2590 = dma.hbm_to_vmem [thread:$0]  (!%p2847_p0), %s2854_s28, 98304, %s2856_s30, %s2859_s2, %s2764_s24, %s2764_s24, %s2765_s26  }
  0x2e   : > { %p125_p12 = scmp.lt.s32.totalorder %s2761_s11, 3  ;;  %p4503_p1 = scmp.ge.s32.totalorder %s2761_s11, 1 }
  0x30   : > { %p126_p3 = pnand %p4503_p1, %p125_p12 }
  0x31   : > { %s2891_s27 = sand.u32 (!%p126_p3), 1, %s2745_s7  }
  0x32   : > { %129 = sbr.rel (%p126_p3) target bundleno = 466 (0x1d2), region = 24  ;;  %s132_s3 = scalar_lea.sflag (!%p126_p3), [#allocation3], %s2891_s27 }
  0x33   : > { %s2581_s29 = smul.u32 (!%p126_p3), 6144, %s2891_s27 }
  0x35   : > { %s2895_s4 = scalar_lea.vmem (!%p126_p3), [#allocation2], %s2581_s29 }
  0x39   : > { %2732 = dma.done.wait (%p2826_p8), %s132_s3, 98304  }
  0x3a   : > { %2734 = vsyncadd (%p2826_p8), %s132_s3, 4294868992  ;;  %v158_v0 = vld [vmem:[%s2895_s4] sm:$0xff]  ;;  %v159_v1 = vld [vmem:[%s2895_s4 + $0x8] sm:$0xff]  ;;  %s2910_s18 = scalar_lea.vmem [#allocation5], %s2581_s29  ;;  %s2582_s25 = smul.u32 98304, %s2753_s9 }
  0x3b   : > { %v160_v2 = vld [vmem:[%s2895_s4 + $0x10] sm:$0xff]  ;;  %v926_v3 = vadd.f32 1.0, %v158_v0  ;;  %v927_v4 = vadd.f32 1.0, %v159_v1  ;;  %v161_v6 = vld [vmem:[%s2895_s4 + $0x18] sm:$0xff]  ;;  %v162_v7 = vld [vmem:[%s2895_s4 + $0x20] sm:$0xff]  ;;  %s2479_s28 = sshll.u32 %s2910_s18, 4  ;;  %s4446_s28 = int_to_ptr.vmem [resolvable:$true] %s2479_s28 }
  0x3c   : > { %v928_v5 = vadd.f32 1.0, %v160_v2  ;;  %v163_v8 = vld [vmem:[%s2895_s4 + $0x28] sm:$0xff]  ;;  %v929_v9 = vadd.f32 1.0, %v161_v6  ;;  %v930_v10 = vadd.f32 1.0, %v162_v7  ;;  %v164_v12 = vld [vmem:[%s2895_s4 + $0x30] sm:$0xff]  ;;  %v165_v13 = vld [vmem:[%s2895_s4 + $0x38] sm:$0xff]  ;;  %s4444_s5 = scalar_lea.hbm %s4496_s1, %s2582_s25 }
  0x3d   : > { %v931_v11 = vadd.f32 1.0, %v163_v8  ;;  %v166_v14 = vld [vmem:[%s2895_s4 + $0x40] sm:$0xff]  ;;  %1694 = vst [vmem:[%s2910_s18] sm:$0xff] %v926_v3  ;;  %1695 = vst [vmem:[%s2910_s18 + $0x8] sm:$0xff] %v927_v4  ;;  %v932_v15 = vadd.f32 1.0, %v164_v12  ;;  %v933_v16 = vadd.f32 1.0, %v165_v13  ;;  %v167_v18 = vld [vmem:[%s2895_s4 + $0x48] sm:$0xff] }
  0x3e   : > { %1696 = vst [vmem:[%s2910_s18 + $0x10] sm:$0xff] %v928_v5  ;;  %v934_v17 = vadd.f32 1.0, %v166_v14  ;;  %v168_v19 = vld [vmem:[%s2895_s4 + $0x50] sm:$0xff]  ;;  %v169_v20 = vld [vmem:[%s2895_s4 + $0x58] sm:$0xff]  ;;  %1697 = vst [vmem:[%s2910_s18 + $0x18] sm:$0xff] %v929_v9  ;;  %v935_v21 = vadd.f32 1.0, %v167_v18 }
  0x3f   : > { %1698 = vst [vmem:[%s2910_s18 + $0x20] sm:$0xff] %v930_v10  ;;  %1699 = vst [vmem:[%s2910_s18 + $0x28] sm:$0xff] %v931_v11  ;;  %v936_v22 = vadd.f32 1.0, %v168_v19  ;;  %v937_v23 = vadd.f32 1.0, %v169_v20  ;;  %v170_v24 = vld [vmem:[%s2895_s4 + $0x60] sm:$0xff]  ;;  %v171_v25 = vld [vmem:[%s2895_s4 + $0x68] sm:$0xff] }
  0x40   : > { %v172_v26 = vld [vmem:[%s2895_s4 + $0x70] sm:$0xff]  ;;  %1700 = vst [vmem:[%s2910_s18 + $0x30] sm:$0xff] %v932_v15  ;;  %1701 = vst [vmem:[%s2910_s18 + $0x38] sm:$0xff] %v933_v16  ;;  %v938_v27 = vadd.f32 1.0, %v170_v24  ;;  %v939_v28 = vadd.f32 1.0, %v171_v25  ;;  %v173_v30 = vld [vmem:[%s2895_s4 + $0x78] sm:$0xff] }
  0x41   : > { %1702 = vst [vmem:[%s2910_s18 + $0x40] sm:$0xff] %v934_v17  ;;  %v940_v29 = vadd.f32 1.0, %v172_v26  ;;  %v174_v31 = vld [vmem:[%s2895_s4 + $0x80] sm:$0xff]  ;;  %v175_v32 = vld [vmem:[%s2895_s4 + $0x88] sm:$0xff]  ;;  %1703 = vst [vmem:[%s2910_s18 + $0x48] sm:$0xff] %v935_v21  ;;  %v941_v33 = vadd.f32 1.0, %v173_v30 }
  0x42   : > { %1704 = vst [vmem:[%s2910_s18 + $0x50] sm:$0xff] %v936_v22  ;;  %1705 = vst [vmem:[%s2910_s18 + $0x58] sm:$0xff] %v937_v23  ;;  %v942_v34 = vadd.f32 1.0, %v174_v31  ;;  %v943_v35 = vadd.f32 1.0, %v175_v32  ;;  %v176_v36 = vld [vmem:[%s2895_s4 + $0x90] sm:$0xff]  ;;  %v177_v37 = vld [vmem:[%s2895_s4 + $0x98] sm:$0xff] }
  0x43   : > { %v178_v38 = vld [vmem:[%s2895_s4 + $0xa0] sm:$0xff]  ;;  %1706 = vst [vmem:[%s2910_s18 + $0x60] sm:$0xff] %v938_v27  ;;  %1707 = vst [vmem:[%s2910_s18 + $0x68] sm:$0xff] %v939_v28  ;;  %v944_v39 = vadd.f32 1.0, %v176_v36  ;;  %v945_v40 = vadd.f32 1.0, %v177_v37  ;;  %v179_v42 = vld [vmem:[%s2895_s4 + $0xa8] sm:$0xff] }
  0x44   : > { %1708 = vst [vmem:[%s2910_s18 + $0x70] sm:$0xff] %v940_v29  ;;  %v946_v41 = vadd.f32 1.0, %v178_v38  ;;  %v180_v43 = vld [vmem:[%s2895_s4 + $0xb0] sm:$0xff]  ;;  %v181_v44 = vld [vmem:[%s2895_s4 + $0xb8] sm:$0xff]  ;;  %1709 = vst [vmem:[%s2910_s18 + $0x78] sm:$0xff] %v941_v33  ;;  %v947_v45 = vadd.f32 1.0, %v179_v42 }
  0x45   : > { %1710 = vst [vmem:[%s2910_s18 + $0x80] sm:$0xff] %v942_v34  ;;  %1711 = vst [vmem:[%s2910_s18 + $0x88] sm:$0xff] %v943_v35  ;;  %v948_v46 = vadd.f32 1.0, %v180_v43  ;;  %v949_v47 = vadd.f32 1.0, %v181_v44  ;;  %v182_v48 = vld [vmem:[%s2895_s4 + $0xc0] sm:$0xff]  ;;  %v183_v49 = vld [vmem:[%s2895_s4 + $0xc8] sm:$0xff] }
  0x46   : > { %v184_v50 = vld [vmem:[%s2895_s4 + $0xd0] sm:$0xff]  ;;  %1712 = vst [vmem:[%s2910_s18 + $0x90] sm:$0xff] %v944_v39  ;;  %1713 = vst [vmem:[%s2910_s18 + $0x98] sm:$0xff] %v945_v40  ;;  %v950_v51 = vadd.f32 1.0, %v182_v48  ;;  %v951_v52 = vadd.f32 1.0, %v183_v49  ;;  %v185_v54 = vld [vmem:[%s2895_s4 + $0xd8] sm:$0xff] }
  0x47   : > { %1714 = vst [vmem:[%s2910_s18 + $0xa0] sm:$0xff] %v946_v41  ;;  %v952_v53 = vadd.f32 1.0, %v184_v50  ;;  %v186_v55 = vld [vmem:[%s2895_s4 + $0xe0] sm:$0xff]  ;;  %v187_v56 = vld [vmem:[%s2895_s4 + $0xe8] sm:$0xff]  ;;  %1715 = vst [vmem:[%s2910_s18 + $0xa8] sm:$0xff] %v947_v45  ;;  %v953_v57 = vadd.f32 1.0, %v185_v54 }
  0x48   : > { %1716 = vst [vmem:[%s2910_s18 + $0xb0] sm:$0xff] %v948_v46  ;;  %1717 = vst [vmem:[%s2910_s18 + $0xb8] sm:$0xff] %v949_v47  ;;  %v954_v58 = vadd.f32 1.0, %v186_v55  ;;  %v955_v59 = vadd.f32 1.0, %v187_v56  ;;  %v188_v60 = vld [vmem:[%s2895_s4 + $0xf0] sm:$0xff]  ;;  %v189_v61 = vld [vmem:[%s2895_s4 + $0xf8] sm:$0xff] }
  0x49   : > { %v190_v62 = vld [vmem:[%s2895_s4 + $0x100] sm:$0xff]  ;;  %1718 = vst [vmem:[%s2910_s18 + $0xc0] sm:$0xff] %v950_v51  ;;  %1719 = vst [vmem:[%s2910_s18 + $0xc8] sm:$0xff] %v951_v52  ;;  %v956_v63 = vadd.f32 1.0, %v188_v60  ;;  %v957_v0 = vadd.f32 1.0, %v189_v61  ;;  %v191_v2 = vld [vmem:[%s2895_s4 + $0x108] sm:$0xff] }
  0x4a   : > { %1720 = vst [vmem:[%s2910_s18 + $0xd0] sm:$0xff] %v952_v53  ;;  %v958_v1 = vadd.f32 1.0, %v190_v62  ;;  %v192_v3 = vld [vmem:[%s2895_s4 + $0x110] sm:$0xff]  ;;  %v193_v4 = vld [vmem:[%s2895_s4 + $0x118] sm:$0xff]  ;;  %1721 = vst [vmem:[%s2910_s18 + $0xd8] sm:$0xff] %v953_v57  ;;  %v959_v5 = vadd.f32 1.0, %v191_v2 }
  0x4b   : > { %1722 = vst [vmem:[%s2910_s18 + $0xe0] sm:$0xff] %v954_v58  ;;  %1723 = vst [vmem:[%s2910_s18 + $0xe8] sm:$0xff] %v955_v59  ;;  %v960_v6 = vadd.f32 1.0, %v192_v3  ;;  %v961_v7 = vadd.f32 1.0, %v193_v4  ;;  %v194_v8 = vld [vmem:[%s2895_s4 + $0x120] sm:$0xff]  ;;  %v195_v9 = vld [vmem:[%s2895_s4 + $0x128] sm:$0xff] }
  0x4c   : > { %v196_v10 = vld [vmem:[%s2895_s4 + $0x130] sm:$0xff]  ;;  %1724 = vst [vmem:[%s2910_s18 + $0xf0] sm:$0xff] %v956_v63  ;;  %1725 = vst [vmem:[%s2910_s18 + $0xf8] sm:$0xff] %v957_v0  ;;  %v962_v11 = vadd.f32 1.0, %v194_v8  ;;  %v963_v12 = vadd.f32 1.0, %v195_v9  ;;  %v197_v14 = vld [vmem:[%s2895_s4 + $0x138] sm:$0xff] }
  0x4d   : > { %1726 = vst [vmem:[%s2910_s18 + $0x100] sm:$0xff] %v958_v1  ;;  %v964_v13 = vadd.f32 1.0, %v196_v10  ;;  %v198_v15 = vld [vmem:[%s2895_s4 + $0x140] sm:$0xff]  ;;  %v199_v16 = vld [vmem:[%s2895_s4 + $0x148] sm:$0xff]  ;;  %1727 = vst [vmem:[%s2910_s18 + $0x108] sm:$0xff] %v959_v5  ;;  %v965_v17 = vadd.f32 1.0, %v197_v14 }
  0x4e   : > { %1728 = vst [vmem:[%s2910_s18 + $0x110] sm:$0xff] %v960_v6  ;;  %1729 = vst [vmem:[%s2910_s18 + $0x118] sm:$0xff] %v961_v7  ;;  %v966_v18 = vadd.f32 1.0, %v198_v15  ;;  %v967_v19 = vadd.f32 1.0, %v199_v16  ;;  %v200_v20 = vld [vmem:[%s2895_s4 + $0x150] sm:$0xff]  ;;  %v201_v21 = vld [vmem:[%s2895_s4 + $0x158] sm:$0xff] }
  0x4f   : > { %v202_v22 = vld [vmem:[%s2895_s4 + $0x160] sm:$0xff]  ;;  %1730 = vst [vmem:[%s2910_s18 + $0x120] sm:$0xff] %v962_v11  ;;  %1731 = vst [vmem:[%s2910_s18 + $0x128] sm:$0xff] %v963_v12  ;;  %v968_v23 = vadd.f32 1.0, %v200_v20  ;;  %v969_v24 = vadd.f32 1.0, %v201_v21  ;;  %v203_v26 = vld [vmem:[%s2895_s4 + $0x168] sm:$0xff] }
  0x50   : > { %1732 = vst [vmem:[%s2910_s18 + $0x130] sm:$0xff] %v964_v13  ;;  %v970_v25 = vadd.f32 1.0, %v202_v22  ;;  %v204_v27 = vld [vmem:[%s2895_s4 + $0x170] sm:$0xff]  ;;  %v205_v28 = vld [vmem:[%s2895_s4 + $0x178] sm:$0xff]  ;;  %1733 = vst [vmem:[%s2910_s18 + $0x138] sm:$0xff] %v965_v17  ;;  %v971_v29 = vadd.f32 1.0, %v203_v26 }
  0x51   : > { %1734 = vst [vmem:[%s2910_s18 + $0x140] sm:$0xff] %v966_v18  ;;  %1735 = vst [vmem:[%s2910_s18 + $0x148] sm:$0xff] %v967_v19  ;;  %v972_v30 = vadd.f32 1.0, %v204_v27  ;;  %v973_v31 = vadd.f32 1.0, %v205_v28  ;;  %v206_v32 = vld [vmem:[%s2895_s4 + $0x180] sm:$0xff]  ;;  %v207_v33 = vld [vmem:[%s2895_s4 + $0x188] sm:$0xff] }
  0x52   : > { %v208_v34 = vld [vmem:[%s2895_s4 + $0x190] sm:$0xff]  ;;  %1736 = vst [vmem:[%s2910_s18 + $0x150] sm:$0xff] %v968_v23  ;;  %1737 = vst [vmem:[%s2910_s18 + $0x158] sm:$0xff] %v969_v24  ;;  %v974_v35 = vadd.f32 1.0, %v206_v32  ;;  %v975_v36 = vadd.f32 1.0, %v207_v33  ;;  %v209_v38 = vld [vmem:[%s2895_s4 + $0x198] sm:$0xff] }
  0x53   : > { %1738 = vst [vmem:[%s2910_s18 + $0x160] sm:$0xff] %v970_v25  ;;  %v976_v37 = vadd.f32 1.0, %v208_v34  ;;  %v210_v39 = vld [vmem:[%s2895_s4 + $0x1a0] sm:$0xff]  ;;  %v211_v40 = vld [vmem:[%s2895_s4 + $0x1a8] sm:$0xff]  ;;  %1739 = vst [vmem:[%s2910_s18 + $0x168] sm:$0xff] %v971_v29  ;;  %v977_v41 = vadd.f32 1.0, %v209_v38 }
  0x54   : > { %1740 = vst [vmem:[%s2910_s18 + $0x170] sm:$0xff] %v972_v30  ;;  %1741 = vst [vmem:[%s2910_s18 + $0x178] sm:$0xff] %v973_v31  ;;  %v978_v42 = vadd.f32 1.0, %v210_v39  ;;  %v979_v43 = vadd.f32 1.0, %v211_v40  ;;  %v212_v44 = vld [vmem:[%s2895_s4 + $0x1b0] sm:$0xff]  ;;  %v213_v45 = vld [vmem:[%s2895_s4 + $0x1b8] sm:$0xff] }
  0x55   : > { %v214_v46 = vld [vmem:[%s2895_s4 + $0x1c0] sm:$0xff]  ;;  %1742 = vst [vmem:[%s2910_s18 + $0x180] sm:$0xff] %v974_v35  ;;  %1743 = vst [vmem:[%s2910_s18 + $0x188] sm:$0xff] %v975_v36  ;;  %v980_v47 = vadd.f32 1.0, %v212_v44  ;;  %v981_v48 = vadd.f32 1.0, %v213_v45  ;;  %v215_v50 = vld [vmem:[%s2895_s4 + $0x1c8] sm:$0xff] }
  0x56   : > { %1744 = vst [vmem:[%s2910_s18 + $0x190] sm:$0xff] %v976_v37  ;;  %v982_v49 = vadd.f32 1.0, %v214_v46  ;;  %v216_v51 = vld [vmem:[%s2895_s4 + $0x1d0] sm:$0xff]  ;;  %v217_v52 = vld [vmem:[%s2895_s4 + $0x1d8] sm:$0xff]  ;;  %1745 = vst [vmem:[%s2910_s18 + $0x198] sm:$0xff] %v977_v41  ;;  %v983_v53 = vadd.f32 1.0, %v215_v50 }
  0x57   : > { %1746 = vst [vmem:[%s2910_s18 + $0x1a0] sm:$0xff] %v978_v42  ;;  %1747 = vst [vmem:[%s2910_s18 + $0x1a8] sm:$0xff] %v979_v43  ;;  %v984_v54 = vadd.f32 1.0, %v216_v51  ;;  %v985_v55 = vadd.f32 1.0, %v217_v52  ;;  %v218_v56 = vld [vmem:[%s2895_s4 + $0x1e0] sm:$0xff]  ;;  %v219_v57 = vld [vmem:[%s2895_s4 + $0x1e8] sm:$0xff] }
  0x58   : > { %v220_v58 = vld [vmem:[%s2895_s4 + $0x1f0] sm:$0xff]  ;;  %1748 = vst [vmem:[%s2910_s18 + $0x1b0] sm:$0xff] %v980_v47  ;;  %1749 = vst [vmem:[%s2910_s18 + $0x1b8] sm:$0xff] %v981_v48  ;;  %v986_v59 = vadd.f32 1.0, %v218_v56  ;;  %v987_v60 = vadd.f32 1.0, %v219_v57  ;;  %v221_v62 = vld [vmem:[%s2895_s4 + $0x1f8] sm:$0xff] }
  0x59   : > { %1750 = vst [vmem:[%s2910_s18 + $0x1c0] sm:$0xff] %v982_v49  ;;  %v988_v61 = vadd.f32 1.0, %v220_v58  ;;  %v222_v63 = vld [vmem:[%s2895_s4 + $0x200] sm:$0xff]  ;;  %v223_v0 = vld [vmem:[%s2895_s4 + $0x208] sm:$0xff]  ;;  %1751 = vst [vmem:[%s2910_s18 + $0x1c8] sm:$0xff] %v983_v53  ;;  %v989_v1 = vadd.f32 1.0, %v221_v62 }
  0x5a   : > { %1752 = vst [vmem:[%s2910_s18 + $0x1d0] sm:$0xff] %v984_v54  ;;  %1753 = vst [vmem:[%s2910_s18 + $0x1d8] sm:$0xff] %v985_v55  ;;  %v990_v2 = vadd.f32 1.0, %v222_v63  ;;  %v991_v3 = vadd.f32 1.0, %v223_v0  ;;  %v224_v4 = vld [vmem:[%s2895_s4 + $0x210] sm:$0xff]  ;;  %v225_v5 = vld [vmem:[%s2895_s4 + $0x218] sm:$0xff] }
  0x5b   : > { %v226_v6 = vld [vmem:[%s2895_s4 + $0x220] sm:$0xff]  ;;  %1754 = vst [vmem:[%s2910_s18 + $0x1e0] sm:$0xff] %v986_v59  ;;  %1755 = vst [vmem:[%s2910_s18 + $0x1e8] sm:$0xff] %v987_v60  ;;  %v992_v7 = vadd.f32 1.0, %v224_v4  ;;  %v993_v8 = vadd.f32 1.0, %v225_v5  ;;  %v227_v10 = vld [vmem:[%s2895_s4 + $0x228] sm:$0xff] }
  0x5c   : > { %1756 = vst [vmem:[%s2910_s18 + $0x1f0] sm:$0xff] %v988_v61  ;;  %v994_v9 = vadd.f32 1.0, %v226_v6  ;;  %v228_v11 = vld [vmem:[%s2895_s4 + $0x230] sm:$0xff]  ;;  %v229_v12 = vld [vmem:[%s2895_s4 + $0x238] sm:$0xff]  ;;  %1757 = vst [vmem:[%s2910_s18 + $0x1f8] sm:$0xff] %v989_v1  ;;  %v995_v13 = vadd.f32 1.0, %v227_v10 }
  0x5d   : > { %1758 = vst [vmem:[%s2910_s18 + $0x200] sm:$0xff] %v990_v2  ;;  %1759 = vst [vmem:[%s2910_s18 + $0x208] sm:$0xff] %v991_v3  ;;  %v996_v14 = vadd.f32 1.0, %v228_v11  ;;  %v997_v15 = vadd.f32 1.0, %v229_v12  ;;  %v230_v16 = vld [vmem:[%s2895_s4 + $0x240] sm:$0xff]  ;;  %v231_v17 = vld [vmem:[%s2895_s4 + $0x248] sm:$0xff] }
  0x5e   : > { %v232_v18 = vld [vmem:[%s2895_s4 + $0x250] sm:$0xff]  ;;  %1760 = vst [vmem:[%s2910_s18 + $0x210] sm:$0xff] %v992_v7  ;;  %1761 = vst [vmem:[%s2910_s18 + $0x218] sm:$0xff] %v993_v8  ;;  %v998_v19 = vadd.f32 1.0, %v230_v16  ;;  %v999_v20 = vadd.f32 1.0, %v231_v17  ;;  %v233_v22 = vld [vmem:[%s2895_s4 + $0x258] sm:$0xff] }
  0x5f   : > { %1762 = vst [vmem:[%s2910_s18 + $0x220] sm:$0xff] %v994_v9  ;;  %v1000_v21 = vadd.f32 1.0, %v232_v18  ;;  %v234_v23 = vld [vmem:[%s2895_s4 + $0x260] sm:$0xff]  ;;  %v235_v24 = vld [vmem:[%s2895_s4 + $0x268] sm:$0xff]  ;;  %1763 = vst [vmem:[%s2910_s18 + $0x228] sm:$0xff] %v995_v13  ;;  %v1001_v25 = vadd.f32 1.0, %v233_v22 }
  0x60   : > { %1764 = vst [vmem:[%s2910_s18 + $0x230] sm:$0xff] %v996_v14  ;;  %1765 = vst [vmem:[%s2910_s18 + $0x238] sm:$0xff] %v997_v15  ;;  %v1002_v26 = vadd.f32 1.0, %v234_v23  ;;  %v1003_v27 = vadd.f32 1.0, %v235_v24  ;;  %v236_v28 = vld [vmem:[%s2895_s4 + $0x270] sm:$0xff]  ;;  %v237_v29 = vld [vmem:[%s2895_s4 + $0x278] sm:$0xff] }
  0x61   : > { %v238_v30 = vld [vmem:[%s2895_s4 + $0x280] sm:$0xff]  ;;  %1766 = vst [vmem:[%s2910_s18 + $0x240] sm:$0xff] %v998_v19  ;;  %1767 = vst [vmem:[%s2910_s18 + $0x248] sm:$0xff] %v999_v20  ;;  %v1004_v31 = vadd.f32 1.0, %v236_v28  ;;  %v1005_v32 = vadd.f32 1.0, %v237_v29  ;;  %v239_v34 = vld [vmem:[%s2895_s4 + $0x288] sm:$0xff] }
  0x62   : > { %1768 = vst [vmem:[%s2910_s18 + $0x250] sm:$0xff] %v1000_v21  ;;  %v1006_v33 = vadd.f32 1.0, %v238_v30  ;;  %v240_v35 = vld [vmem:[%s2895_s4 + $0x290] sm:$0xff]  ;;  %v241_v36 = vld [vmem:[%s2895_s4 + $0x298] sm:$0xff]  ;;  %1769 = vst [vmem:[%s2910_s18 + $0x258] sm:$0xff] %v1001_v25  ;;  %v1007_v37 = vadd.f32 1.0, %v239_v34 }
  0x63   : > { %1770 = vst [vmem:[%s2910_s18 + $0x260] sm:$0xff] %v1002_v26  ;;  %1771 = vst [vmem:[%s2910_s18 + $0x268] sm:$0xff] %v1003_v27  ;;  %v1008_v38 = vadd.f32 1.0, %v240_v35  ;;  %v1009_v39 = vadd.f32 1.0, %v241_v36  ;;  %v242_v40 = vld [vmem:[%s2895_s4 + $0x2a0] sm:$0xff]  ;;  %v243_v41 = vld [vmem:[%s2895_s4 + $0x2a8] sm:$0xff] }
  0x64   : > { %v244_v42 = vld [vmem:[%s2895_s4 + $0x2b0] sm:$0xff]  ;;  %1772 = vst [vmem:[%s2910_s18 + $0x270] sm:$0xff] %v1004_v31  ;;  %1773 = vst [vmem:[%s2910_s18 + $0x278] sm:$0xff] %v1005_v32  ;;  %v1010_v43 = vadd.f32 1.0, %v242_v40  ;;  %v1011_v44 = vadd.f32 1.0, %v243_v41  ;;  %v245_v46 = vld [vmem:[%s2895_s4 + $0x2b8] sm:$0xff] }
  0x65   : > { %1774 = vst [vmem:[%s2910_s18 + $0x280] sm:$0xff] %v1006_v33  ;;  %v1012_v45 = vadd.f32 1.0, %v244_v42  ;;  %v246_v47 = vld [vmem:[%s2895_s4 + $0x2c0] sm:$0xff]  ;;  %v247_v48 = vld [vmem:[%s2895_s4 + $0x2c8] sm:$0xff]  ;;  %1775 = vst [vmem:[%s2910_s18 + $0x288] sm:$0xff] %v1007_v37  ;;  %v1013_v49 = vadd.f32 1.0, %v245_v46 }
  0x66   : > { %1776 = vst [vmem:[%s2910_s18 + $0x290] sm:$0xff] %v1008_v38  ;;  %1777 = vst [vmem:[%s2910_s18 + $0x298] sm:$0xff] %v1009_v39  ;;  %v1014_v50 = vadd.f32 1.0, %v246_v47  ;;  %v1015_v51 = vadd.f32 1.0, %v247_v48  ;;  %v248_v52 = vld [vmem:[%s2895_s4 + $0x2d0] sm:$0xff]  ;;  %v249_v53 = vld [vmem:[%s2895_s4 + $0x2d8] sm:$0xff] }
  0x67   : > { %v250_v54 = vld [vmem:[%s2895_s4 + $0x2e0] sm:$0xff]  ;;  %1778 = vst [vmem:[%s2910_s18 + $0x2a0] sm:$0xff] %v1010_v43  ;;  %1779 = vst [vmem:[%s2910_s18 + $0x2a8] sm:$0xff] %v1011_v44  ;;  %v1016_v55 = vadd.f32 1.0, %v248_v52  ;;  %v1017_v56 = vadd.f32 1.0, %v249_v53  ;;  %v251_v58 = vld [vmem:[%s2895_s4 + $0x2e8] sm:$0xff] }
  0x68   : > { %1780 = vst [vmem:[%s2910_s18 + $0x2b0] sm:$0xff] %v1012_v45  ;;  %v1018_v57 = vadd.f32 1.0, %v250_v54  ;;  %v252_v59 = vld [vmem:[%s2895_s4 + $0x2f0] sm:$0xff]  ;;  %v253_v60 = vld [vmem:[%s2895_s4 + $0x2f8] sm:$0xff]  ;;  %1781 = vst [vmem:[%s2910_s18 + $0x2b8] sm:$0xff] %v1013_v49  ;;  %v1019_v61 = vadd.f32 1.0, %v251_v58 }
  0x69   : > { %1782 = vst [vmem:[%s2910_s18 + $0x2c0] sm:$0xff] %v1014_v50  ;;  %1783 = vst [vmem:[%s2910_s18 + $0x2c8] sm:$0xff] %v1015_v51  ;;  %v1020_v62 = vadd.f32 1.0, %v252_v59  ;;  %v1021_v63 = vadd.f32 1.0, %v253_v60  ;;  %v254_v0 = vld [vmem:[%s2895_s4 + $0x300] sm:$0xff]  ;;  %v255_v1 = vld [vmem:[%s2895_s4 + $0x308] sm:$0xff] }
  0x6a   : > { %v256_v2 = vld [vmem:[%s2895_s4 + $0x310] sm:$0xff]  ;;  %1784 = vst [vmem:[%s2910_s18 + $0x2d0] sm:$0xff] %v1016_v55  ;;  %1785 = vst [vmem:[%s2910_s18 + $0x2d8] sm:$0xff] %v1017_v56  ;;  %v1022_v3 = vadd.f32 1.0, %v254_v0  ;;  %v1023_v4 = vadd.f32 1.0, %v255_v1  ;;  %v257_v6 = vld [vmem:[%s2895_s4 + $0x318] sm:$0xff] }
  0x6b   : > { %1786 = vst [vmem:[%s2910_s18 + $0x2e0] sm:$0xff] %v1018_v57  ;;  %v1024_v5 = vadd.f32 1.0, %v256_v2  ;;  %v258_v7 = vld [vmem:[%s2895_s4 + $0x320] sm:$0xff]  ;;  %v259_v8 = vld [vmem:[%s2895_s4 + $0x328] sm:$0xff]  ;;  %1787 = vst [vmem:[%s2910_s18 + $0x2e8] sm:$0xff] %v1019_v61  ;;  %v1025_v9 = vadd.f32 1.0, %v257_v6 }
  0x6c   : > { %1788 = vst [vmem:[%s2910_s18 + $0x2f0] sm:$0xff] %v1020_v62  ;;  %1789 = vst [vmem:[%s2910_s18 + $0x2f8] sm:$0xff] %v1021_v63  ;;  %v1026_v10 = vadd.f32 1.0, %v258_v7  ;;  %v1027_v11 = vadd.f32 1.0, %v259_v8  ;;  %v260_v12 = vld [vmem:[%s2895_s4 + $0x330] sm:$0xff]  ;;  %v261_v13 = vld [vmem:[%s2895_s4 + $0x338] sm:$0xff] }
  0x6d   : > { %v262_v14 = vld [vmem:[%s2895_s4 + $0x340] sm:$0xff]  ;;  %1790 = vst [vmem:[%s2910_s18 + $0x300] sm:$0xff] %v1022_v3  ;;  %1791 = vst [vmem:[%s2910_s18 + $0x308] sm:$0xff] %v1023_v4  ;;  %v1028_v15 = vadd.f32 1.0, %v260_v12  ;;  %v1029_v16 = vadd.f32 1.0, %v261_v13  ;;  %v263_v18 = vld [vmem:[%s2895_s4 + $0x348] sm:$0xff] }
  0x6e   : > { %1792 = vst [vmem:[%s2910_s18 + $0x310] sm:$0xff] %v1024_v5  ;;  %v1030_v17 = vadd.f32 1.0, %v262_v14  ;;  %v264_v19 = vld [vmem:[%s2895_s4 + $0x350] sm:$0xff]  ;;  %v265_v20 = vld [vmem:[%s2895_s4 + $0x358] sm:$0xff]  ;;  %1793 = vst [vmem:[%s2910_s18 + $0x318] sm:$0xff] %v1025_v9  ;;  %v1031_v21 = vadd.f32 1.0, %v263_v18 }
  0x6f   : > { %1794 = vst [vmem:[%s2910_s18 + $0x320] sm:$0xff] %v1026_v10  ;;  %1795 = vst [vmem:[%s2910_s18 + $0x328] sm:$0xff] %v1027_v11  ;;  %v1032_v22 = vadd.f32 1.0, %v264_v19  ;;  %v1033_v23 = vadd.f32 1.0, %v265_v20  ;;  %v266_v24 = vld [vmem:[%s2895_s4 + $0x360] sm:$0xff]  ;;  %v267_v25 = vld [vmem:[%s2895_s4 + $0x368] sm:$0xff] }
  0x70   : > { %v268_v26 = vld [vmem:[%s2895_s4 + $0x370] sm:$0xff]  ;;  %1796 = vst [vmem:[%s2910_s18 + $0x330] sm:$0xff] %v1028_v15  ;;  %1797 = vst [vmem:[%s2910_s18 + $0x338] sm:$0xff] %v1029_v16  ;;  %v1034_v27 = vadd.f32 1.0, %v266_v24  ;;  %v1035_v28 = vadd.f32 1.0, %v267_v25  ;;  %v269_v30 = vld [vmem:[%s2895_s4 + $0x378] sm:$0xff] }
  0x71   : > { %1798 = vst [vmem:[%s2910_s18 + $0x340] sm:$0xff] %v1030_v17  ;;  %v1036_v29 = vadd.f32 1.0, %v268_v26  ;;  %v270_v31 = vld [vmem:[%s2895_s4 + $0x380] sm:$0xff]  ;;  %v271_v32 = vld [vmem:[%s2895_s4 + $0x388] sm:$0xff]  ;;  %1799 = vst [vmem:[%s2910_s18 + $0x348] sm:$0xff] %v1031_v21  ;;  %v1037_v33 = vadd.f32 1.0, %v269_v30 }
  0x72   : > { %1800 = vst [vmem:[%s2910_s18 + $0x350] sm:$0xff] %v1032_v22  ;;  %1801 = vst [vmem:[%s2910_s18 + $0x358] sm:$0xff] %v1033_v23  ;;  %v1038_v34 = vadd.f32 1.0, %v270_v31  ;;  %v1039_v35 = vadd.f32 1.0, %v271_v32  ;;  %v272_v36 = vld [vmem:[%s2895_s4 + $0x390] sm:$0xff]  ;;  %v273_v37 = vld [vmem:[%s2895_s4 + $0x398] sm:$0xff] }
  0x73   : > { %v274_v38 = vld [vmem:[%s2895_s4 + $0x3a0] sm:$0xff]  ;;  %1802 = vst [vmem:[%s2910_s18 + $0x360] sm:$0xff] %v1034_v27  ;;  %1803 = vst [vmem:[%s2910_s18 + $0x368] sm:$0xff] %v1035_v28  ;;  %v1040_v39 = vadd.f32 1.0, %v272_v36  ;;  %v1041_v40 = vadd.f32 1.0, %v273_v37  ;;  %v275_v42 = vld [vmem:[%s2895_s4 + $0x3a8] sm:$0xff] }
  0x74   : > { %1804 = vst [vmem:[%s2910_s18 + $0x370] sm:$0xff] %v1036_v29  ;;  %v1042_v41 = vadd.f32 1.0, %v274_v38  ;;  %v276_v43 = vld [vmem:[%s2895_s4 + $0x3b0] sm:$0xff]  ;;  %v277_v44 = vld [vmem:[%s2895_s4 + $0x3b8] sm:$0xff]  ;;  %1805 = vst [vmem:[%s2910_s18 + $0x378] sm:$0xff] %v1037_v33  ;;  %v1043_v45 = vadd.f32 1.0, %v275_v42 }
  0x75   : > { %1806 = vst [vmem:[%s2910_s18 + $0x380] sm:$0xff] %v1038_v34  ;;  %1807 = vst [vmem:[%s2910_s18 + $0x388] sm:$0xff] %v1039_v35  ;;  %v1044_v46 = vadd.f32 1.0, %v276_v43  ;;  %v1045_v47 = vadd.f32 1.0, %v277_v44  ;;  %v278_v48 = vld [vmem:[%s2895_s4 + $0x3c0] sm:$0xff]  ;;  %v279_v49 = vld [vmem:[%s2895_s4 + $0x3c8] sm:$0xff] }
  0x76   : > { %v280_v50 = vld [vmem:[%s2895_s4 + $0x3d0] sm:$0xff]  ;;  %1808 = vst [vmem:[%s2910_s18 + $0x390] sm:$0xff] %v1040_v39  ;;  %1809 = vst [vmem:[%s2910_s18 + $0x398] sm:$0xff] %v1041_v40  ;;  %v1046_v51 = vadd.f32 1.0, %v278_v48  ;;  %v1047_v52 = vadd.f32 1.0, %v279_v49  ;;  %v281_v54 = vld [vmem:[%s2895_s4 + $0x3d8] sm:$0xff] }
  0x77   : > { %1810 = vst [vmem:[%s2910_s18 + $0x3a0] sm:$0xff] %v1042_v41  ;;  %v1048_v53 = vadd.f32 1.0, %v280_v50  ;;  %v282_v55 = vld [vmem:[%s2895_s4 + $0x3e0] sm:$0xff]  ;;  %v283_v56 = vld [vmem:[%s2895_s4 + $0x3e8] sm:$0xff]  ;;  %1811 = vst [vmem:[%s2910_s18 + $0x3a8] sm:$0xff] %v1043_v45  ;;  %v1049_v57 = vadd.f32 1.0, %v281_v54 }
  0x78   : > { %1812 = vst [vmem:[%s2910_s18 + $0x3b0] sm:$0xff] %v1044_v46  ;;  %1813 = vst [vmem:[%s2910_s18 + $0x3b8] sm:$0xff] %v1045_v47  ;;  %v1050_v58 = vadd.f32 1.0, %v282_v55  ;;  %v1051_v59 = vadd.f32 1.0, %v283_v56  ;;  %v284_v60 = vld [vmem:[%s2895_s4 + $0x3f0] sm:$0xff]  ;;  %v285_v61 = vld [vmem:[%s2895_s4 + $0x3f8] sm:$0xff] }
  0x79   : > { %v286_v62 = vld [vmem:[%s2895_s4 + $0x400] sm:$0xff]  ;;  %1814 = vst [vmem:[%s2910_s18 + $0x3c0] sm:$0xff] %v1046_v51  ;;  %1815 = vst [vmem:[%s2910_s18 + $0x3c8] sm:$0xff] %v1047_v52  ;;  %v1052_v63 = vadd.f32 1.0, %v284_v60  ;;  %v1053_v0 = vadd.f32 1.0, %v285_v61  ;;  %v287_v2 = vld [vmem:[%s2895_s4 + $0x408] sm:$0xff] }
  0x7a   : > { %1816 = vst [vmem:[%s2910_s18 + $0x3d0] sm:$0xff] %v1048_v53  ;;  %v1054_v1 = vadd.f32 1.0, %v286_v62  ;;  %v288_v3 = vld [vmem:[%s2895_s4 + $0x410] sm:$0xff]  ;;  %v289_v4 = vld [vmem:[%s2895_s4 + $0x418] sm:$0xff]  ;;  %1817 = vst [vmem:[%s2910_s18 + $0x3d8] sm:$0xff] %v1049_v57  ;;  %v1055_v5 = vadd.f32 1.0, %v287_v2 }
  0x7b   : > { %1818 = vst [vmem:[%s2910_s18 + $0x3e0] sm:$0xff] %v1050_v58  ;;  %1819 = vst [vmem:[%s2910_s18 + $0x3e8] sm:$0xff] %v1051_v59  ;;  %v1056_v6 = vadd.f32 1.0, %v288_v3  ;;  %v1057_v7 = vadd.f32 1.0, %v289_v4  ;;  %v290_v8 = vld [vmem:[%s2895_s4 + $0x420] sm:$0xff]  ;;  %v291_v9 = vld [vmem:[%s2895_s4 + $0x428] sm:$0xff] }
  0x7c   : > { %v292_v10 = vld [vmem:[%s2895_s4 + $0x430] sm:$0xff]  ;;  %1820 = vst [vmem:[%s2910_s18 + $0x3f0] sm:$0xff] %v1052_v63  ;;  %1821 = vst [vmem:[%s2910_s18 + $0x3f8] sm:$0xff] %v1053_v0  ;;  %v1058_v11 = vadd.f32 1.0, %v290_v8  ;;  %v1059_v12 = vadd.f32 1.0, %v291_v9  ;;  %v293_v14 = vld [vmem:[%s2895_s4 + $0x438] sm:$0xff] }
  0x7d   : > { %1822 = vst [vmem:[%s2910_s18 + $0x400] sm:$0xff] %v1054_v1  ;;  %v1060_v13 = vadd.f32 1.0, %v292_v10  ;;  %v294_v15 = vld [vmem:[%s2895_s4 + $0x440] sm:$0xff]  ;;  %v295_v16 = vld [vmem:[%s2895_s4 + $0x448] sm:$0xff]  ;;  %1823 = vst [vmem:[%s2910_s18 + $0x408] sm:$0xff] %v1055_v5  ;;  %v1061_v17 = vadd.f32 1.0, %v293_v14 }
  0x7e   : > { %1824 = vst [vmem:[%s2910_s18 + $0x410] sm:$0xff] %v1056_v6  ;;  %1825 = vst [vmem:[%s2910_s18 + $0x418] sm:$0xff] %v1057_v7  ;;  %v1062_v18 = vadd.f32 1.0, %v294_v15  ;;  %v1063_v19 = vadd.f32 1.0, %v295_v16  ;;  %v296_v20 = vld [vmem:[%s2895_s4 + $0x450] sm:$0xff]  ;;  %v297_v21 = vld [vmem:[%s2895_s4 + $0x458] sm:$0xff] }
  0x7f   : > { %v298_v22 = vld [vmem:[%s2895_s4 + $0x460] sm:$0xff]  ;;  %1826 = vst [vmem:[%s2910_s18 + $0x420] sm:$0xff] %v1058_v11  ;;  %1827 = vst [vmem:[%s2910_s18 + $0x428] sm:$0xff] %v1059_v12  ;;  %v1064_v23 = vadd.f32 1.0, %v296_v20  ;;  %v1065_v24 = vadd.f32 1.0, %v297_v21  ;;  %v299_v26 = vld [vmem:[%s2895_s4 + $0x468] sm:$0xff] }
  0x80   : > { %1828 = vst [vmem:[%s2910_s18 + $0x430] sm:$0xff] %v1060_v13  ;;  %v1066_v25 = vadd.f32 1.0, %v298_v22  ;;  %v300_v27 = vld [vmem:[%s2895_s4 + $0x470] sm:$0xff]  ;;  %v301_v28 = vld [vmem:[%s2895_s4 + $0x478] sm:$0xff]  ;;  %1829 = vst [vmem:[%s2910_s18 + $0x438] sm:$0xff] %v1061_v17  ;;  %v1067_v29 = vadd.f32 1.0, %v299_v26 }
  0x81   : > { %1830 = vst [vmem:[%s2910_s18 + $0x440] sm:$0xff] %v1062_v18  ;;  %1831 = vst [vmem:[%s2910_s18 + $0x448] sm:$0xff] %v1063_v19  ;;  %v1068_v30 = vadd.f32 1.0, %v300_v27  ;;  %v1069_v31 = vadd.f32 1.0, %v301_v28  ;;  %v302_v32 = vld [vmem:[%s2895_s4 + $0x480] sm:$0xff]  ;;  %v303_v33 = vld [vmem:[%s2895_s4 + $0x488] sm:$0xff] }
  0x82   : > { %v304_v34 = vld [vmem:[%s2895_s4 + $0x490] sm:$0xff]  ;;  %1832 = vst [vmem:[%s2910_s18 + $0x450] sm:$0xff] %v1064_v23  ;;  %1833 = vst [vmem:[%s2910_s18 + $0x458] sm:$0xff] %v1065_v24  ;;  %v1070_v35 = vadd.f32 1.0, %v302_v32  ;;  %v1071_v36 = vadd.f32 1.0, %v303_v33  ;;  %v305_v38 = vld [vmem:[%s2895_s4 + $0x498] sm:$0xff] }
  0x83   : > { %1834 = vst [vmem:[%s2910_s18 + $0x460] sm:$0xff] %v1066_v25  ;;  %v1072_v37 = vadd.f32 1.0, %v304_v34  ;;  %v306_v39 = vld [vmem:[%s2895_s4 + $0x4a0] sm:$0xff]  ;;  %v307_v40 = vld [vmem:[%s2895_s4 + $0x4a8] sm:$0xff]  ;;  %1835 = vst [vmem:[%s2910_s18 + $0x468] sm:$0xff] %v1067_v29  ;;  %v1073_v41 = vadd.f32 1.0, %v305_v38 }
  0x84   : > { %1836 = vst [vmem:[%s2910_s18 + $0x470] sm:$0xff] %v1068_v30  ;;  %1837 = vst [vmem:[%s2910_s18 + $0x478] sm:$0xff] %v1069_v31  ;;  %v1074_v42 = vadd.f32 1.0, %v306_v39  ;;  %v1075_v43 = vadd.f32 1.0, %v307_v40  ;;  %v308_v44 = vld [vmem:[%s2895_s4 + $0x4b0] sm:$0xff]  ;;  %v309_v45 = vld [vmem:[%s2895_s4 + $0x4b8] sm:$0xff] }
  0x85   : > { %v310_v46 = vld [vmem:[%s2895_s4 + $0x4c0] sm:$0xff]  ;;  %1838 = vst [vmem:[%s2910_s18 + $0x480] sm:$0xff] %v1070_v35  ;;  %1839 = vst [vmem:[%s2910_s18 + $0x488] sm:$0xff] %v1071_v36  ;;  %v1076_v47 = vadd.f32 1.0, %v308_v44  ;;  %v1077_v48 = vadd.f32 1.0, %v309_v45  ;;  %v311_v50 = vld [vmem:[%s2895_s4 + $0x4c8] sm:$0xff] }
  0x86   : > { %1840 = vst [vmem:[%s2910_s18 + $0x490] sm:$0xff] %v1072_v37  ;;  %v1078_v49 = vadd.f32 1.0, %v310_v46  ;;  %v312_v51 = vld [vmem:[%s2895_s4 + $0x4d0] sm:$0xff]  ;;  %v313_v52 = vld [vmem:[%s2895_s4 + $0x4d8] sm:$0xff]  ;;  %1841 = vst [vmem:[%s2910_s18 + $0x498] sm:$0xff] %v1073_v41  ;;  %v1079_v53 = vadd.f32 1.0, %v311_v50 }
  0x87   : > { %1842 = vst [vmem:[%s2910_s18 + $0x4a0] sm:$0xff] %v1074_v42  ;;  %1843 = vst [vmem:[%s2910_s18 + $0x4a8] sm:$0xff] %v1075_v43  ;;  %v1080_v54 = vadd.f32 1.0, %v312_v51  ;;  %v1081_v55 = vadd.f32 1.0, %v313_v52  ;;  %v314_v56 = vld [vmem:[%s2895_s4 + $0x4e0] sm:$0xff]  ;;  %v315_v57 = vld [vmem:[%s2895_s4 + $0x4e8] sm:$0xff] }
  0x88   : > { %v316_v58 = vld [vmem:[%s2895_s4 + $0x4f0] sm:$0xff]  ;;  %1844 = vst [vmem:[%s2910_s18 + $0x4b0] sm:$0xff] %v1076_v47  ;;  %1845 = vst [vmem:[%s2910_s18 + $0x4b8] sm:$0xff] %v1077_v48  ;;  %v1082_v59 = vadd.f32 1.0, %v314_v56  ;;  %v1083_v60 = vadd.f32 1.0, %v315_v57  ;;  %v317_v62 = vld [vmem:[%s2895_s4 + $0x4f8] sm:$0xff] }
  0x89   : > { %1846 = vst [vmem:[%s2910_s18 + $0x4c0] sm:$0xff] %v1078_v49  ;;  %v1084_v61 = vadd.f32 1.0, %v316_v58  ;;  %v318_v63 = vld [vmem:[%s2895_s4 + $0x500] sm:$0xff]  ;;  %v319_v0 = vld [vmem:[%s2895_s4 + $0x508] sm:$0xff]  ;;  %1847 = vst [vmem:[%s2910_s18 + $0x4c8] sm:$0xff] %v1079_v53  ;;  %v1085_v1 = vadd.f32 1.0, %v317_v62 }
  0x8a   : > { %1848 = vst [vmem:[%s2910_s18 + $0x4d0] sm:$0xff] %v1080_v54  ;;  %1849 = vst [vmem:[%s2910_s18 + $0x4d8] sm:$0xff] %v1081_v55  ;;  %v1086_v2 = vadd.f32 1.0, %v318_v63  ;;  %v1087_v3 = vadd.f32 1.0, %v319_v0  ;;  %v320_v4 = vld [vmem:[%s2895_s4 + $0x510] sm:$0xff]  ;;  %v321_v5 = vld [vmem:[%s2895_s4 + $0x518] sm:$0xff] }
  0x8b   : > { %v322_v6 = vld [vmem:[%s2895_s4 + $0x520] sm:$0xff]  ;;  %1850 = vst [vmem:[%s2910_s18 + $0x4e0] sm:$0xff] %v1082_v59  ;;  %1851 = vst [vmem:[%s2910_s18 + $0x4e8] sm:$0xff] %v1083_v60  ;;  %v1088_v7 = vadd.f32 1.0, %v320_v4  ;;  %v1089_v8 = vadd.f32 1.0, %v321_v5  ;;  %v323_v10 = vld [vmem:[%s2895_s4 + $0x528] sm:$0xff] }
  0x8c   : > { %1852 = vst [vmem:[%s2910_s18 + $0x4f0] sm:$0xff] %v1084_v61  ;;  %v1090_v9 = vadd.f32 1.0, %v322_v6  ;;  %v324_v11 = vld [vmem:[%s2895_s4 + $0x530] sm:$0xff]  ;;  %v325_v12 = vld [vmem:[%s2895_s4 + $0x538] sm:$0xff]  ;;  %1853 = vst [vmem:[%s2910_s18 + $0x4f8] sm:$0xff] %v1085_v1  ;;  %v1091_v13 = vadd.f32 1.0, %v323_v10 }
  0x8d   : > { %1854 = vst [vmem:[%s2910_s18 + $0x500] sm:$0xff] %v1086_v2  ;;  %1855 = vst [vmem:[%s2910_s18 + $0x508] sm:$0xff] %v1087_v3  ;;  %v1092_v14 = vadd.f32 1.0, %v324_v11  ;;  %v1093_v15 = vadd.f32 1.0, %v325_v12  ;;  %v326_v16 = vld [vmem:[%s2895_s4 + $0x540] sm:$0xff]  ;;  %v327_v17 = vld [vmem:[%s2895_s4 + $0x548] sm:$0xff] }
  0x8e   : > { %v328_v18 = vld [vmem:[%s2895_s4 + $0x550] sm:$0xff]  ;;  %1856 = vst [vmem:[%s2910_s18 + $0x510] sm:$0xff] %v1088_v7  ;;  %1857 = vst [vmem:[%s2910_s18 + $0x518] sm:$0xff] %v1089_v8  ;;  %v1094_v19 = vadd.f32 1.0, %v326_v16  ;;  %v1095_v20 = vadd.f32 1.0, %v327_v17  ;;  %v329_v22 = vld [vmem:[%s2895_s4 + $0x558] sm:$0xff] }
  0x8f   : > { %1858 = vst [vmem:[%s2910_s18 + $0x520] sm:$0xff] %v1090_v9  ;;  %v1096_v21 = vadd.f32 1.0, %v328_v18  ;;  %v330_v23 = vld [vmem:[%s2895_s4 + $0x560] sm:$0xff]  ;;  %v331_v24 = vld [vmem:[%s2895_s4 + $0x568] sm:$0xff]  ;;  %1859 = vst [vmem:[%s2910_s18 + $0x528] sm:$0xff] %v1091_v13  ;;  %v1097_v25 = vadd.f32 1.0, %v329_v22 }
  0x90   : > { %1860 = vst [vmem:[%s2910_s18 + $0x530] sm:$0xff] %v1092_v14  ;;  %1861 = vst [vmem:[%s2910_s18 + $0x538] sm:$0xff] %v1093_v15  ;;  %v1098_v26 = vadd.f32 1.0, %v330_v23  ;;  %v1099_v27 = vadd.f32 1.0, %v331_v24  ;;  %v332_v28 = vld [vmem:[%s2895_s4 + $0x570] sm:$0xff]  ;;  %v333_v29 = vld [vmem:[%s2895_s4 + $0x578] sm:$0xff] }
  0x91   : > { %v334_v30 = vld [vmem:[%s2895_s4 + $0x580] sm:$0xff]  ;;  %1862 = vst [vmem:[%s2910_s18 + $0x540] sm:$0xff] %v1094_v19  ;;  %1863 = vst [vmem:[%s2910_s18 + $0x548] sm:$0xff] %v1095_v20  ;;  %v1100_v31 = vadd.f32 1.0, %v332_v28  ;;  %v1101_v32 = vadd.f32 1.0, %v333_v29  ;;  %v335_v34 = vld [vmem:[%s2895_s4 + $0x588] sm:$0xff] }
  0x92   : > { %1864 = vst [vmem:[%s2910_s18 + $0x550] sm:$0xff] %v1096_v21  ;;  %v1102_v33 = vadd.f32 1.0, %v334_v30  ;;  %v336_v35 = vld [vmem:[%s2895_s4 + $0x590] sm:$0xff]  ;;  %v337_v36 = vld [vmem:[%s2895_s4 + $0x598] sm:$0xff]  ;;  %1865 = vst [vmem:[%s2910_s18 + $0x558] sm:$0xff] %v1097_v25  ;;  %v1103_v37 = vadd.f32 1.0, %v335_v34 }
  0x93   : > { %1866 = vst [vmem:[%s2910_s18 + $0x560] sm:$0xff] %v1098_v26  ;;  %1867 = vst [vmem:[%s2910_s18 + $0x568] sm:$0xff] %v1099_v27  ;;  %v1104_v38 = vadd.f32 1.0, %v336_v35  ;;  %v1105_v39 = vadd.f32 1.0, %v337_v36  ;;  %v338_v40 = vld [vmem:[%s2895_s4 + $0x5a0] sm:$0xff]  ;;  %v339_v41 = vld [vmem:[%s2895_s4 + $0x5a8] sm:$0xff] }
  0x94   : > { %v340_v42 = vld [vmem:[%s2895_s4 + $0x5b0] sm:$0xff]  ;;  %1868 = vst [vmem:[%s2910_s18 + $0x570] sm:$0xff] %v1100_v31  ;;  %1869 = vst [vmem:[%s2910_s18 + $0x578] sm:$0xff] %v1101_v32  ;;  %v1106_v43 = vadd.f32 1.0, %v338_v40  ;;  %v1107_v44 = vadd.f32 1.0, %v339_v41  ;;  %v341_v46 = vld [vmem:[%s2895_s4 + $0x5b8] sm:$0xff] }
  0x95   : > { %1870 = vst [vmem:[%s2910_s18 + $0x580] sm:$0xff] %v1102_v33  ;;  %v1108_v45 = vadd.f32 1.0, %v340_v42  ;;  %v342_v47 = vld [vmem:[%s2895_s4 + $0x5c0] sm:$0xff]  ;;  %v343_v48 = vld [vmem:[%s2895_s4 + $0x5c8] sm:$0xff]  ;;  %1871 = vst [vmem:[%s2910_s18 + $0x588] sm:$0xff] %v1103_v37  ;;  %v1109_v49 = vadd.f32 1.0, %v341_v46 }
  0x96   : > { %1872 = vst [vmem:[%s2910_s18 + $0x590] sm:$0xff] %v1104_v38  ;;  %1873 = vst [vmem:[%s2910_s18 + $0x598] sm:$0xff] %v1105_v39  ;;  %v1110_v50 = vadd.f32 1.0, %v342_v47  ;;  %v1111_v51 = vadd.f32 1.0, %v343_v48  ;;  %v344_v52 = vld [vmem:[%s2895_s4 + $0x5d0] sm:$0xff]  ;;  %v345_v53 = vld [vmem:[%s2895_s4 + $0x5d8] sm:$0xff] }
  0x97   : > { %v346_v54 = vld [vmem:[%s2895_s4 + $0x5e0] sm:$0xff]  ;;  %1874 = vst [vmem:[%s2910_s18 + $0x5a0] sm:$0xff] %v1106_v43  ;;  %1875 = vst [vmem:[%s2910_s18 + $0x5a8] sm:$0xff] %v1107_v44  ;;  %v1112_v55 = vadd.f32 1.0, %v344_v52  ;;  %v1113_v56 = vadd.f32 1.0, %v345_v53  ;;  %v347_v58 = vld [vmem:[%s2895_s4 + $0x5e8] sm:$0xff] }
  0x98   : > { %1876 = vst [vmem:[%s2910_s18 + $0x5b0] sm:$0xff] %v1108_v45  ;;  %v1114_v57 = vadd.f32 1.0, %v346_v54  ;;  %v348_v59 = vld [vmem:[%s2895_s4 + $0x5f0] sm:$0xff]  ;;  %v349_v60 = vld [vmem:[%s2895_s4 + $0x5f8] sm:$0xff]  ;;  %1877 = vst [vmem:[%s2910_s18 + $0x5b8] sm:$0xff] %v1109_v49  ;;  %v1115_v61 = vadd.f32 1.0, %v347_v58 }
  0x99   : > { %1878 = vst [vmem:[%s2910_s18 + $0x5c0] sm:$0xff] %v1110_v50  ;;  %1879 = vst [vmem:[%s2910_s18 + $0x5c8] sm:$0xff] %v1111_v51  ;;  %v1116_v62 = vadd.f32 1.0, %v348_v59  ;;  %v1117_v63 = vadd.f32 1.0, %v349_v60  ;;  %v350_v0 = vld [vmem:[%s2895_s4 + $0x600] sm:$0xff]  ;;  %v351_v1 = vld [vmem:[%s2895_s4 + $0x608] sm:$0xff] }
  0x9a   : > { %v352_v2 = vld [vmem:[%s2895_s4 + $0x610] sm:$0xff]  ;;  %1880 = vst [vmem:[%s2910_s18 + $0x5d0] sm:$0xff] %v1112_v55  ;;  %1881 = vst [vmem:[%s2910_s18 + $0x5d8] sm:$0xff] %v1113_v56  ;;  %v1118_v3 = vadd.f32 1.0, %v350_v0  ;;  %v1119_v4 = vadd.f32 1.0, %v351_v1  ;;  %v353_v6 = vld [vmem:[%s2895_s4 + $0x618] sm:$0xff] }
  0x9b   : > { %1882 = vst [vmem:[%s2910_s18 + $0x5e0] sm:$0xff] %v1114_v57  ;;  %v1120_v5 = vadd.f32 1.0, %v352_v2  ;;  %v354_v7 = vld [vmem:[%s2895_s4 + $0x620] sm:$0xff]  ;;  %v355_v8 = vld [vmem:[%s2895_s4 + $0x628] sm:$0xff]  ;;  %1883 = vst [vmem:[%s2910_s18 + $0x5e8] sm:$0xff] %v1115_v61  ;;  %v1121_v9 = vadd.f32 1.0, %v353_v6 }
  0x9c   : > { %1884 = vst [vmem:[%s2910_s18 + $0x5f0] sm:$0xff] %v1116_v62  ;;  %1885 = vst [vmem:[%s2910_s18 + $0x5f8] sm:$0xff] %v1117_v63  ;;  %v1122_v10 = vadd.f32 1.0, %v354_v7  ;;  %v1123_v11 = vadd.f32 1.0, %v355_v8  ;;  %v356_v12 = vld [vmem:[%s2895_s4 + $0x630] sm:$0xff]  ;;  %v357_v13 = vld [vmem:[%s2895_s4 + $0x638] sm:$0xff] }
  0x9d   : > { %v358_v14 = vld [vmem:[%s2895_s4 + $0x640] sm:$0xff]  ;;  %1886 = vst [vmem:[%s2910_s18 + $0x600] sm:$0xff] %v1118_v3  ;;  %1887 = vst [vmem:[%s2910_s18 + $0x608] sm:$0xff] %v1119_v4  ;;  %v1124_v15 = vadd.f32 1.0, %v356_v12  ;;  %v1125_v16 = vadd.f32 1.0, %v357_v13  ;;  %v359_v18 = vld [vmem:[%s2895_s4 + $0x648] sm:$0xff] }
  0x9e   : > { %1888 = vst [vmem:[%s2910_s18 + $0x610] sm:$0xff] %v1120_v5  ;;  %v1126_v17 = vadd.f32 1.0, %v358_v14  ;;  %v360_v19 = vld [vmem:[%s2895_s4 + $0x650] sm:$0xff]  ;;  %v361_v20 = vld [vmem:[%s2895_s4 + $0x658] sm:$0xff]  ;;  %1889 = vst [vmem:[%s2910_s18 + $0x618] sm:$0xff] %v1121_v9  ;;  %v1127_v21 = vadd.f32 1.0, %v359_v18 }
  0x9f   : > { %1890 = vst [vmem:[%s2910_s18 + $0x620] sm:$0xff] %v1122_v10  ;;  %1891 = vst [vmem:[%s2910_s18 + $0x628] sm:$0xff] %v1123_v11  ;;  %v1128_v22 = vadd.f32 1.0, %v360_v19  ;;  %v1129_v23 = vadd.f32 1.0, %v361_v20  ;;  %v362_v24 = vld [vmem:[%s2895_s4 + $0x660] sm:$0xff]  ;;  %v363_v25 = vld [vmem:[%s2895_s4 + $0x668] sm:$0xff] }
  0xa0   : > { %v364_v26 = vld [vmem:[%s2895_s4 + $0x670] sm:$0xff]  ;;  %1892 = vst [vmem:[%s2910_s18 + $0x630] sm:$0xff] %v1124_v15  ;;  %1893 = vst [vmem:[%s2910_s18 + $0x638] sm:$0xff] %v1125_v16  ;;  %v1130_v27 = vadd.f32 1.0, %v362_v24  ;;  %v1131_v28 = vadd.f32 1.0, %v363_v25  ;;  %v365_v30 = vld [vmem:[%s2895_s4 + $0x678] sm:$0xff] }
  0xa1   : > { %1894 = vst [vmem:[%s2910_s18 + $0x640] sm:$0xff] %v1126_v17  ;;  %v1132_v29 = vadd.f32 1.0, %v364_v26  ;;  %v366_v31 = vld [vmem:[%s2895_s4 + $0x680] sm:$0xff]  ;;  %v367_v32 = vld [vmem:[%s2895_s4 + $0x688] sm:$0xff]  ;;  %1895 = vst [vmem:[%s2910_s18 + $0x648] sm:$0xff] %v1127_v21  ;;  %v1133_v33 = vadd.f32 1.0, %v365_v30 }
  0xa2   : > { %1896 = vst [vmem:[%s2910_s18 + $0x650] sm:$0xff] %v1128_v22  ;;  %1897 = vst [vmem:[%s2910_s18 + $0x658] sm:$0xff] %v1129_v23  ;;  %v1134_v34 = vadd.f32 1.0, %v366_v31  ;;  %v1135_v35 = vadd.f32 1.0, %v367_v32  ;;  %v368_v36 = vld [vmem:[%s2895_s4 + $0x690] sm:$0xff]  ;;  %v369_v37 = vld [vmem:[%s2895_s4 + $0x698] sm:$0xff] }
  0xa3   : > { %v370_v38 = vld [vmem:[%s2895_s4 + $0x6a0] sm:$0xff]  ;;  %1898 = vst [vmem:[%s2910_s18 + $0x660] sm:$0xff] %v1130_v27  ;;  %1899 = vst [vmem:[%s2910_s18 + $0x668] sm:$0xff] %v1131_v28  ;;  %v1136_v39 = vadd.f32 1.0, %v368_v36  ;;  %v1137_v40 = vadd.f32 1.0, %v369_v37  ;;  %v371_v42 = vld [vmem:[%s2895_s4 + $0x6a8] sm:$0xff] }
  0xa4   : > { %1900 = vst [vmem:[%s2910_s18 + $0x670] sm:$0xff] %v1132_v29  ;;  %v1138_v41 = vadd.f32 1.0, %v370_v38  ;;  %v372_v43 = vld [vmem:[%s2895_s4 + $0x6b0] sm:$0xff]  ;;  %v373_v44 = vld [vmem:[%s2895_s4 + $0x6b8] sm:$0xff]  ;;  %1901 = vst [vmem:[%s2910_s18 + $0x678] sm:$0xff] %v1133_v33  ;;  %v1139_v45 = vadd.f32 1.0, %v371_v42 }
  0xa5   : > { %1902 = vst [vmem:[%s2910_s18 + $0x680] sm:$0xff] %v1134_v34  ;;  %1903 = vst [vmem:[%s2910_s18 + $0x688] sm:$0xff] %v1135_v35  ;;  %v1140_v46 = vadd.f32 1.0, %v372_v43  ;;  %v1141_v47 = vadd.f32 1.0, %v373_v44  ;;  %v374_v48 = vld [vmem:[%s2895_s4 + $0x6c0] sm:$0xff]  ;;  %v375_v49 = vld [vmem:[%s2895_s4 + $0x6c8] sm:$0xff] }
  0xa6   : > { %v376_v50 = vld [vmem:[%s2895_s4 + $0x6d0] sm:$0xff]  ;;  %1904 = vst [vmem:[%s2910_s18 + $0x690] sm:$0xff] %v1136_v39  ;;  %1905 = vst [vmem:[%s2910_s18 + $0x698] sm:$0xff] %v1137_v40  ;;  %v1142_v51 = vadd.f32 1.0, %v374_v48  ;;  %v1143_v52 = vadd.f32 1.0, %v375_v49  ;;  %v377_v54 = vld [vmem:[%s2895_s4 + $0x6d8] sm:$0xff] }
  0xa7   : > { %1906 = vst [vmem:[%s2910_s18 + $0x6a0] sm:$0xff] %v1138_v41  ;;  %v1144_v53 = vadd.f32 1.0, %v376_v50  ;;  %v378_v55 = vld [vmem:[%s2895_s4 + $0x6e0] sm:$0xff]  ;;  %v379_v56 = vld [vmem:[%s2895_s4 + $0x6e8] sm:$0xff]  ;;  %1907 = vst [vmem:[%s2910_s18 + $0x6a8] sm:$0xff] %v1139_v45  ;;  %v1145_v57 = vadd.f32 1.0, %v377_v54 }
  0xa8   : > { %1908 = vst [vmem:[%s2910_s18 + $0x6b0] sm:$0xff] %v1140_v46  ;;  %1909 = vst [vmem:[%s2910_s18 + $0x6b8] sm:$0xff] %v1141_v47  ;;  %v1146_v58 = vadd.f32 1.0, %v378_v55  ;;  %v1147_v59 = vadd.f32 1.0, %v379_v56  ;;  %v380_v60 = vld [vmem:[%s2895_s4 + $0x6f0] sm:$0xff]  ;;  %v381_v61 = vld [vmem:[%s2895_s4 + $0x6f8] sm:$0xff] }
  0xa9   : > { %v382_v62 = vld [vmem:[%s2895_s4 + $0x700] sm:$0xff]  ;;  %1910 = vst [vmem:[%s2910_s18 + $0x6c0] sm:$0xff] %v1142_v51  ;;  %1911 = vst [vmem:[%s2910_s18 + $0x6c8] sm:$0xff] %v1143_v52  ;;  %v1148_v63 = vadd.f32 1.0, %v380_v60  ;;  %v1149_v0 = vadd.f32 1.0, %v381_v61  ;;  %v383_v2 = vld [vmem:[%s2895_s4 + $0x708] sm:$0xff] }
  0xaa   : > { %1912 = vst [vmem:[%s2910_s18 + $0x6d0] sm:$0xff] %v1144_v53  ;;  %v1150_v1 = vadd.f32 1.0, %v382_v62  ;;  %v384_v3 = vld [vmem:[%s2895_s4 + $0x710] sm:$0xff]  ;;  %v385_v4 = vld [vmem:[%s2895_s4 + $0x718] sm:$0xff]  ;;  %1913 = vst [vmem:[%s2910_s18 + $0x6d8] sm:$0xff] %v1145_v57  ;;  %v1151_v5 = vadd.f32 1.0, %v383_v2 }
  0xab   : > { %1914 = vst [vmem:[%s2910_s18 + $0x6e0] sm:$0xff] %v1146_v58  ;;  %1915 = vst [vmem:[%s2910_s18 + $0x6e8] sm:$0xff] %v1147_v59  ;;  %v1152_v6 = vadd.f32 1.0, %v384_v3  ;;  %v1153_v7 = vadd.f32 1.0, %v385_v4  ;;  %v386_v8 = vld [vmem:[%s2895_s4 + $0x720] sm:$0xff]  ;;  %v387_v9 = vld [vmem:[%s2895_s4 + $0x728] sm:$0xff] }
  0xac   : > { %v388_v10 = vld [vmem:[%s2895_s4 + $0x730] sm:$0xff]  ;;  %1916 = vst [vmem:[%s2910_s18 + $0x6f0] sm:$0xff] %v1148_v63  ;;  %1917 = vst [vmem:[%s2910_s18 + $0x6f8] sm:$0xff] %v1149_v0  ;;  %v1154_v11 = vadd.f32 1.0, %v386_v8  ;;  %v1155_v12 = vadd.f32 1.0, %v387_v9  ;;  %v389_v14 = vld [vmem:[%s2895_s4 + $0x738] sm:$0xff] }
  0xad   : > { %1918 = vst [vmem:[%s2910_s18 + $0x700] sm:$0xff] %v1150_v1  ;;  %v1156_v13 = vadd.f32 1.0, %v388_v10  ;;  %v390_v15 = vld [vmem:[%s2895_s4 + $0x740] sm:$0xff]  ;;  %v391_v16 = vld [vmem:[%s2895_s4 + $0x748] sm:$0xff]  ;;  %1919 = vst [vmem:[%s2910_s18 + $0x708] sm:$0xff] %v1151_v5  ;;  %v1157_v17 = vadd.f32 1.0, %v389_v14 }
  0xae   : > { %1920 = vst [vmem:[%s2910_s18 + $0x710] sm:$0xff] %v1152_v6  ;;  %1921 = vst [vmem:[%s2910_s18 + $0x718] sm:$0xff] %v1153_v7  ;;  %v1158_v18 = vadd.f32 1.0, %v390_v15  ;;  %v1159_v19 = vadd.f32 1.0, %v391_v16  ;;  %v392_v20 = vld [vmem:[%s2895_s4 + $0x750] sm:$0xff]  ;;  %v393_v21 = vld [vmem:[%s2895_s4 + $0x758] sm:$0xff] }
  0xaf   : > { %v394_v22 = vld [vmem:[%s2895_s4 + $0x760] sm:$0xff]  ;;  %1922 = vst [vmem:[%s2910_s18 + $0x720] sm:$0xff] %v1154_v11  ;;  %1923 = vst [vmem:[%s2910_s18 + $0x728] sm:$0xff] %v1155_v12  ;;  %v1160_v23 = vadd.f32 1.0, %v392_v20  ;;  %v1161_v24 = vadd.f32 1.0, %v393_v21  ;;  %v395_v26 = vld [vmem:[%s2895_s4 + $0x768] sm:$0xff] }
  0xb0   : > { %1924 = vst [vmem:[%s2910_s18 + $0x730] sm:$0xff] %v1156_v13  ;;  %v1162_v25 = vadd.f32 1.0, %v394_v22  ;;  %v396_v27 = vld [vmem:[%s2895_s4 + $0x770] sm:$0xff]  ;;  %v397_v28 = vld [vmem:[%s2895_s4 + $0x778] sm:$0xff]  ;;  %1925 = vst [vmem:[%s2910_s18 + $0x738] sm:$0xff] %v1157_v17  ;;  %v1163_v29 = vadd.f32 1.0, %v395_v26 }
  0xb1   : > { %1926 = vst [vmem:[%s2910_s18 + $0x740] sm:$0xff] %v1158_v18  ;;  %1927 = vst [vmem:[%s2910_s18 + $0x748] sm:$0xff] %v1159_v19  ;;  %v1164_v30 = vadd.f32 1.0, %v396_v27  ;;  %v1165_v31 = vadd.f32 1.0, %v397_v28  ;;  %v398_v32 = vld [vmem:[%s2895_s4 + $0x780] sm:$0xff]  ;;  %v399_v33 = vld [vmem:[%s2895_s4 + $0x788] sm:$0xff] }
  0xb2   : > { %v400_v34 = vld [vmem:[%s2895_s4 + $0x790] sm:$0xff]  ;;  %1928 = vst [vmem:[%s2910_s18 + $0x750] sm:$0xff] %v1160_v23  ;;  %1929 = vst [vmem:[%s2910_s18 + $0x758] sm:$0xff] %v1161_v24  ;;  %v1166_v35 = vadd.f32 1.0, %v398_v32  ;;  %v1167_v36 = vadd.f32 1.0, %v399_v33  ;;  %v401_v38 = vld [vmem:[%s2895_s4 + $0x798] sm:$0xff] }
  0xb3   : > { %1930 = vst [vmem:[%s2910_s18 + $0x760] sm:$0xff] %v1162_v25  ;;  %v1168_v37 = vadd.f32 1.0, %v400_v34  ;;  %v402_v39 = vld [vmem:[%s2895_s4 + $0x7a0] sm:$0xff]  ;;  %v403_v40 = vld [vmem:[%s2895_s4 + $0x7a8] sm:$0xff]  ;;  %1931 = vst [vmem:[%s2910_s18 + $0x768] sm:$0xff] %v1163_v29  ;;  %v1169_v41 = vadd.f32 1.0, %v401_v38 }
  0xb4   : > { %1932 = vst [vmem:[%s2910_s18 + $0x770] sm:$0xff] %v1164_v30  ;;  %1933 = vst [vmem:[%s2910_s18 + $0x778] sm:$0xff] %v1165_v31  ;;  %v1170_v42 = vadd.f32 1.0, %v402_v39  ;;  %v1171_v43 = vadd.f32 1.0, %v403_v40  ;;  %v404_v44 = vld [vmem:[%s2895_s4 + $0x7b0] sm:$0xff]  ;;  %v405_v45 = vld [vmem:[%s2895_s4 + $0x7b8] sm:$0xff] }
  0xb5   : > { %v406_v46 = vld [vmem:[%s2895_s4 + $0x7c0] sm:$0xff]  ;;  %1934 = vst [vmem:[%s2910_s18 + $0x780] sm:$0xff] %v1166_v35  ;;  %1935 = vst [vmem:[%s2910_s18 + $0x788] sm:$0xff] %v1167_v36  ;;  %v1172_v47 = vadd.f32 1.0, %v404_v44  ;;  %v1173_v48 = vadd.f32 1.0, %v405_v45  ;;  %v407_v50 = vld [vmem:[%s2895_s4 + $0x7c8] sm:$0xff] }
  0xb6   : > { %1936 = vst [vmem:[%s2910_s18 + $0x790] sm:$0xff] %v1168_v37  ;;  %v1174_v49 = vadd.f32 1.0, %v406_v46  ;;  %v408_v51 = vld [vmem:[%s2895_s4 + $0x7d0] sm:$0xff]  ;;  %v409_v52 = vld [vmem:[%s2895_s4 + $0x7d8] sm:$0xff]  ;;  %1937 = vst [vmem:[%s2910_s18 + $0x798] sm:$0xff] %v1169_v41  ;;  %v1175_v53 = vadd.f32 1.0, %v407_v50 }
  0xb7   : > { %1938 = vst [vmem:[%s2910_s18 + $0x7a0] sm:$0xff] %v1170_v42  ;;  %1939 = vst [vmem:[%s2910_s18 + $0x7a8] sm:$0xff] %v1171_v43  ;;  %v1176_v54 = vadd.f32 1.0, %v408_v51  ;;  %v1177_v55 = vadd.f32 1.0, %v409_v52  ;;  %v410_v56 = vld [vmem:[%s2895_s4 + $0x7e0] sm:$0xff]  ;;  %v411_v57 = vld [vmem:[%s2895_s4 + $0x7e8] sm:$0xff] }
  0xb8   : > { %v412_v58 = vld [vmem:[%s2895_s4 + $0x7f0] sm:$0xff]  ;;  %1940 = vst [vmem:[%s2910_s18 + $0x7b0] sm:$0xff] %v1172_v47  ;;  %1941 = vst [vmem:[%s2910_s18 + $0x7b8] sm:$0xff] %v1173_v48  ;;  %v1178_v59 = vadd.f32 1.0, %v410_v56  ;;  %v1179_v60 = vadd.f32 1.0, %v411_v57  ;;  %v413_v62 = vld [vmem:[%s2895_s4 + $0x7f8] sm:$0xff] }
  0xb9   : > { %1942 = vst [vmem:[%s2910_s18 + $0x7c0] sm:$0xff] %v1174_v49  ;;  %v1180_v61 = vadd.f32 1.0, %v412_v58  ;;  %v414_v63 = vld [vmem:[%s2895_s4 + $0x800] sm:$0xff]  ;;  %v415_v0 = vld [vmem:[%s2895_s4 + $0x808] sm:$0xff]  ;;  %1943 = vst [vmem:[%s2910_s18 + $0x7c8] sm:$0xff] %v1175_v53  ;;  %v1181_v1 = vadd.f32 1.0, %v413_v62 }
  0xba   : > { %1944 = vst [vmem:[%s2910_s18 + $0x7d0] sm:$0xff] %v1176_v54  ;;  %1945 = vst [vmem:[%s2910_s18 + $0x7d8] sm:$0xff] %v1177_v55  ;;  %v1182_v2 = vadd.f32 1.0, %v414_v63  ;;  %v1183_v3 = vadd.f32 1.0, %v415_v0  ;;  %v416_v4 = vld [vmem:[%s2895_s4 + $0x810] sm:$0xff]  ;;  %v417_v5 = vld [vmem:[%s2895_s4 + $0x818] sm:$0xff] }
  0xbb   : > { %v418_v6 = vld [vmem:[%s2895_s4 + $0x820] sm:$0xff]  ;;  %1946 = vst [vmem:[%s2910_s18 + $0x7e0] sm:$0xff] %v1178_v59  ;;  %1947 = vst [vmem:[%s2910_s18 + $0x7e8] sm:$0xff] %v1179_v60  ;;  %v1184_v7 = vadd.f32 1.0, %v416_v4  ;;  %v1185_v8 = vadd.f32 1.0, %v417_v5  ;;  %v419_v10 = vld [vmem:[%s2895_s4 + $0x828] sm:$0xff] }
  0xbc   : > { %1948 = vst [vmem:[%s2910_s18 + $0x7f0] sm:$0xff] %v1180_v61  ;;  %v1186_v9 = vadd.f32 1.0, %v418_v6  ;;  %v420_v11 = vld [vmem:[%s2895_s4 + $0x830] sm:$0xff]  ;;  %v421_v12 = vld [vmem:[%s2895_s4 + $0x838] sm:$0xff]  ;;  %1949 = vst [vmem:[%s2910_s18 + $0x7f8] sm:$0xff] %v1181_v1  ;;  %v1187_v13 = vadd.f32 1.0, %v419_v10 }
  0xbd   : > { %1950 = vst [vmem:[%s2910_s18 + $0x800] sm:$0xff] %v1182_v2  ;;  %1951 = vst [vmem:[%s2910_s18 + $0x808] sm:$0xff] %v1183_v3  ;;  %v1188_v14 = vadd.f32 1.0, %v420_v11  ;;  %v1189_v15 = vadd.f32 1.0, %v421_v12  ;;  %v422_v16 = vld [vmem:[%s2895_s4 + $0x840] sm:$0xff]  ;;  %v423_v17 = vld [vmem:[%s2895_s4 + $0x848] sm:$0xff] }
  0xbe   : > { %v424_v18 = vld [vmem:[%s2895_s4 + $0x850] sm:$0xff]  ;;  %1952 = vst [vmem:[%s2910_s18 + $0x810] sm:$0xff] %v1184_v7  ;;  %1953 = vst [vmem:[%s2910_s18 + $0x818] sm:$0xff] %v1185_v8  ;;  %v1190_v19 = vadd.f32 1.0, %v422_v16  ;;  %v1191_v20 = vadd.f32 1.0, %v423_v17  ;;  %v425_v22 = vld [vmem:[%s2895_s4 + $0x858] sm:$0xff] }
  0xbf   : > { %1954 = vst [vmem:[%s2910_s18 + $0x820] sm:$0xff] %v1186_v9  ;;  %v1192_v21 = vadd.f32 1.0, %v424_v18  ;;  %v426_v23 = vld [vmem:[%s2895_s4 + $0x860] sm:$0xff]  ;;  %v427_v24 = vld [vmem:[%s2895_s4 + $0x868] sm:$0xff]  ;;  %1955 = vst [vmem:[%s2910_s18 + $0x828] sm:$0xff] %v1187_v13  ;;  %v1193_v25 = vadd.f32 1.0, %v425_v22 }
  0xc0   : > { %1956 = vst [vmem:[%s2910_s18 + $0x830] sm:$0xff] %v1188_v14  ;;  %1957 = vst [vmem:[%s2910_s18 + $0x838] sm:$0xff] %v1189_v15  ;;  %v1194_v26 = vadd.f32 1.0, %v426_v23  ;;  %v1195_v27 = vadd.f32 1.0, %v427_v24  ;;  %v428_v28 = vld [vmem:[%s2895_s4 + $0x870] sm:$0xff]  ;;  %v429_v29 = vld [vmem:[%s2895_s4 + $0x878] sm:$0xff] }
  0xc1   : > { %v430_v30 = vld [vmem:[%s2895_s4 + $0x880] sm:$0xff]  ;;  %1958 = vst [vmem:[%s2910_s18 + $0x840] sm:$0xff] %v1190_v19  ;;  %1959 = vst [vmem:[%s2910_s18 + $0x848] sm:$0xff] %v1191_v20  ;;  %v1196_v31 = vadd.f32 1.0, %v428_v28  ;;  %v1197_v32 = vadd.f32 1.0, %v429_v29  ;;  %v431_v34 = vld [vmem:[%s2895_s4 + $0x888] sm:$0xff] }
  0xc2   : > { %1960 = vst [vmem:[%s2910_s18 + $0x850] sm:$0xff] %v1192_v21  ;;  %v1198_v33 = vadd.f32 1.0, %v430_v30  ;;  %v432_v35 = vld [vmem:[%s2895_s4 + $0x890] sm:$0xff]  ;;  %v433_v36 = vld [vmem:[%s2895_s4 + $0x898] sm:$0xff]  ;;  %1961 = vst [vmem:[%s2910_s18 + $0x858] sm:$0xff] %v1193_v25  ;;  %v1199_v37 = vadd.f32 1.0, %v431_v34 }
  0xc3   : > { %1962 = vst [vmem:[%s2910_s18 + $0x860] sm:$0xff] %v1194_v26  ;;  %1963 = vst [vmem:[%s2910_s18 + $0x868] sm:$0xff] %v1195_v27  ;;  %v1200_v38 = vadd.f32 1.0, %v432_v35  ;;  %v1201_v39 = vadd.f32 1.0, %v433_v36  ;;  %v434_v40 = vld [vmem:[%s2895_s4 + $0x8a0] sm:$0xff]  ;;  %v435_v41 = vld [vmem:[%s2895_s4 + $0x8a8] sm:$0xff] }
  0xc4   : > { %v436_v42 = vld [vmem:[%s2895_s4 + $0x8b0] sm:$0xff]  ;;  %1964 = vst [vmem:[%s2910_s18 + $0x870] sm:$0xff] %v1196_v31  ;;  %1965 = vst [vmem:[%s2910_s18 + $0x878] sm:$0xff] %v1197_v32  ;;  %v1202_v43 = vadd.f32 1.0, %v434_v40  ;;  %v1203_v44 = vadd.f32 1.0, %v435_v41  ;;  %v437_v46 = vld [vmem:[%s2895_s4 + $0x8b8] sm:$0xff] }
  0xc5   : > { %1966 = vst [vmem:[%s2910_s18 + $0x880] sm:$0xff] %v1198_v33  ;;  %v1204_v45 = vadd.f32 1.0, %v436_v42  ;;  %v438_v47 = vld [vmem:[%s2895_s4 + $0x8c0] sm:$0xff]  ;;  %v439_v48 = vld [vmem:[%s2895_s4 + $0x8c8] sm:$0xff]  ;;  %1967 = vst [vmem:[%s2910_s18 + $0x888] sm:$0xff] %v1199_v37  ;;  %v1205_v49 = vadd.f32 1.0, %v437_v46 }
  0xc6   : > { %1968 = vst [vmem:[%s2910_s18 + $0x890] sm:$0xff] %v1200_v38  ;;  %1969 = vst [vmem:[%s2910_s18 + $0x898] sm:$0xff] %v1201_v39  ;;  %v1206_v50 = vadd.f32 1.0, %v438_v47  ;;  %v1207_v51 = vadd.f32 1.0, %v439_v48  ;;  %v440_v52 = vld [vmem:[%s2895_s4 + $0x8d0] sm:$0xff]  ;;  %v441_v53 = vld [vmem:[%s2895_s4 + $0x8d8] sm:$0xff] }
  0xc7   : > { %v442_v54 = vld [vmem:[%s2895_s4 + $0x8e0] sm:$0xff]  ;;  %1970 = vst [vmem:[%s2910_s18 + $0x8a0] sm:$0xff] %v1202_v43  ;;  %1971 = vst [vmem:[%s2910_s18 + $0x8a8] sm:$0xff] %v1203_v44  ;;  %v1208_v55 = vadd.f32 1.0, %v440_v52  ;;  %v1209_v56 = vadd.f32 1.0, %v441_v53  ;;  %v443_v58 = vld [vmem:[%s2895_s4 + $0x8e8] sm:$0xff] }
  0xc8   : > { %1972 = vst [vmem:[%s2910_s18 + $0x8b0] sm:$0xff] %v1204_v45  ;;  %v1210_v57 = vadd.f32 1.0, %v442_v54  ;;  %v444_v59 = vld [vmem:[%s2895_s4 + $0x8f0] sm:$0xff]  ;;  %v445_v60 = vld [vmem:[%s2895_s4 + $0x8f8] sm:$0xff]  ;;  %1973 = vst [vmem:[%s2910_s18 + $0x8b8] sm:$0xff] %v1205_v49  ;;  %v1211_v61 = vadd.f32 1.0, %v443_v58 }
  0xc9   : > { %1974 = vst [vmem:[%s2910_s18 + $0x8c0] sm:$0xff] %v1206_v50  ;;  %1975 = vst [vmem:[%s2910_s18 + $0x8c8] sm:$0xff] %v1207_v51  ;;  %v1212_v62 = vadd.f32 1.0, %v444_v59  ;;  %v1213_v63 = vadd.f32 1.0, %v445_v60  ;;  %v446_v0 = vld [vmem:[%s2895_s4 + $0x900] sm:$0xff]  ;;  %v447_v1 = vld [vmem:[%s2895_s4 + $0x908] sm:$0xff] }
  0xca   : > { %v448_v2 = vld [vmem:[%s2895_s4 + $0x910] sm:$0xff]  ;;  %1976 = vst [vmem:[%s2910_s18 + $0x8d0] sm:$0xff] %v1208_v55  ;;  %1977 = vst [vmem:[%s2910_s18 + $0x8d8] sm:$0xff] %v1209_v56  ;;  %v1214_v3 = vadd.f32 1.0, %v446_v0  ;;  %v1215_v4 = vadd.f32 1.0, %v447_v1  ;;  %v449_v6 = vld [vmem:[%s2895_s4 + $0x918] sm:$0xff] }
  0xcb   : > { %1978 = vst [vmem:[%s2910_s18 + $0x8e0] sm:$0xff] %v1210_v57  ;;  %v1216_v5 = vadd.f32 1.0, %v448_v2  ;;  %v450_v7 = vld [vmem:[%s2895_s4 + $0x920] sm:$0xff]  ;;  %v451_v8 = vld [vmem:[%s2895_s4 + $0x928] sm:$0xff]  ;;  %1979 = vst [vmem:[%s2910_s18 + $0x8e8] sm:$0xff] %v1211_v61  ;;  %v1217_v9 = vadd.f32 1.0, %v449_v6 }
  0xcc   : > { %1980 = vst [vmem:[%s2910_s18 + $0x8f0] sm:$0xff] %v1212_v62  ;;  %1981 = vst [vmem:[%s2910_s18 + $0x8f8] sm:$0xff] %v1213_v63  ;;  %v1218_v10 = vadd.f32 1.0, %v450_v7  ;;  %v1219_v11 = vadd.f32 1.0, %v451_v8  ;;  %v452_v12 = vld [vmem:[%s2895_s4 + $0x930] sm:$0xff]  ;;  %v453_v13 = vld [vmem:[%s2895_s4 + $0x938] sm:$0xff] }
  0xcd   : > { %v454_v14 = vld [vmem:[%s2895_s4 + $0x940] sm:$0xff]  ;;  %1982 = vst [vmem:[%s2910_s18 + $0x900] sm:$0xff] %v1214_v3  ;;  %1983 = vst [vmem:[%s2910_s18 + $0x908] sm:$0xff] %v1215_v4  ;;  %v1220_v15 = vadd.f32 1.0, %v452_v12  ;;  %v1221_v16 = vadd.f32 1.0, %v453_v13  ;;  %v455_v18 = vld [vmem:[%s2895_s4 + $0x948] sm:$0xff] }
  0xce   : > { %1984 = vst [vmem:[%s2910_s18 + $0x910] sm:$0xff] %v1216_v5  ;;  %v1222_v17 = vadd.f32 1.0, %v454_v14  ;;  %v456_v19 = vld [vmem:[%s2895_s4 + $0x950] sm:$0xff]  ;;  %v457_v20 = vld [vmem:[%s2895_s4 + $0x958] sm:$0xff]  ;;  %1985 = vst [vmem:[%s2910_s18 + $0x918] sm:$0xff] %v1217_v9  ;;  %v1223_v21 = vadd.f32 1.0, %v455_v18 }
  0xcf   : > { %1986 = vst [vmem:[%s2910_s18 + $0x920] sm:$0xff] %v1218_v10  ;;  %1987 = vst [vmem:[%s2910_s18 + $0x928] sm:$0xff] %v1219_v11  ;;  %v1224_v22 = vadd.f32 1.0, %v456_v19  ;;  %v1225_v23 = vadd.f32 1.0, %v457_v20  ;;  %v458_v24 = vld [vmem:[%s2895_s4 + $0x960] sm:$0xff]  ;;  %v459_v25 = vld [vmem:[%s2895_s4 + $0x968] sm:$0xff] }
  0xd0   : > { %v460_v26 = vld [vmem:[%s2895_s4 + $0x970] sm:$0xff]  ;;  %1988 = vst [vmem:[%s2910_s18 + $0x930] sm:$0xff] %v1220_v15  ;;  %1989 = vst [vmem:[%s2910_s18 + $0x938] sm:$0xff] %v1221_v16  ;;  %v1226_v27 = vadd.f32 1.0, %v458_v24  ;;  %v1227_v28 = vadd.f32 1.0, %v459_v25  ;;  %v461_v30 = vld [vmem:[%s2895_s4 + $0x978] sm:$0xff] }
  0xd1   : > { %1990 = vst [vmem:[%s2910_s18 + $0x940] sm:$0xff] %v1222_v17  ;;  %v1228_v29 = vadd.f32 1.0, %v460_v26  ;;  %v462_v31 = vld [vmem:[%s2895_s4 + $0x980] sm:$0xff]  ;;  %v463_v32 = vld [vmem:[%s2895_s4 + $0x988] sm:$0xff]  ;;  %1991 = vst [vmem:[%s2910_s18 + $0x948] sm:$0xff] %v1223_v21  ;;  %v1229_v33 = vadd.f32 1.0, %v461_v30 }
  0xd2   : > { %1992 = vst [vmem:[%s2910_s18 + $0x950] sm:$0xff] %v1224_v22  ;;  %1993 = vst [vmem:[%s2910_s18 + $0x958] sm:$0xff] %v1225_v23  ;;  %v1230_v34 = vadd.f32 1.0, %v462_v31  ;;  %v1231_v35 = vadd.f32 1.0, %v463_v32  ;;  %v464_v36 = vld [vmem:[%s2895_s4 + $0x990] sm:$0xff]  ;;  %v465_v37 = vld [vmem:[%s2895_s4 + $0x998] sm:$0xff] }
  0xd3   : > { %v466_v38 = vld [vmem:[%s2895_s4 + $0x9a0] sm:$0xff]  ;;  %1994 = vst [vmem:[%s2910_s18 + $0x960] sm:$0xff] %v1226_v27  ;;  %1995 = vst [vmem:[%s2910_s18 + $0x968] sm:$0xff] %v1227_v28  ;;  %v1232_v39 = vadd.f32 1.0, %v464_v36  ;;  %v1233_v40 = vadd.f32 1.0, %v465_v37  ;;  %v467_v42 = vld [vmem:[%s2895_s4 + $0x9a8] sm:$0xff] }
  0xd4   : > { %1996 = vst [vmem:[%s2910_s18 + $0x970] sm:$0xff] %v1228_v29  ;;  %v1234_v41 = vadd.f32 1.0, %v466_v38  ;;  %v468_v43 = vld [vmem:[%s2895_s4 + $0x9b0] sm:$0xff]  ;;  %v469_v44 = vld [vmem:[%s2895_s4 + $0x9b8] sm:$0xff]  ;;  %1997 = vst [vmem:[%s2910_s18 + $0x978] sm:$0xff] %v1229_v33  ;;  %v1235_v45 = vadd.f32 1.0, %v467_v42 }
  0xd5   : > { %1998 = vst [vmem:[%s2910_s18 + $0x980] sm:$0xff] %v1230_v34  ;;  %1999 = vst [vmem:[%s2910_s18 + $0x988] sm:$0xff] %v1231_v35  ;;  %v1236_v46 = vadd.f32 1.0, %v468_v43  ;;  %v1237_v47 = vadd.f32 1.0, %v469_v44  ;;  %v470_v48 = vld [vmem:[%s2895_s4 + $0x9c0] sm:$0xff]  ;;  %v471_v49 = vld [vmem:[%s2895_s4 + $0x9c8] sm:$0xff] }
  0xd6   : > { %v472_v50 = vld [vmem:[%s2895_s4 + $0x9d0] sm:$0xff]  ;;  %2000 = vst [vmem:[%s2910_s18 + $0x990] sm:$0xff] %v1232_v39  ;;  %2001 = vst [vmem:[%s2910_s18 + $0x998] sm:$0xff] %v1233_v40  ;;  %v1238_v51 = vadd.f32 1.0, %v470_v48  ;;  %v1239_v52 = vadd.f32 1.0, %v471_v49  ;;  %v473_v54 = vld [vmem:[%s2895_s4 + $0x9d8] sm:$0xff] }
  0xd7   : > { %2002 = vst [vmem:[%s2910_s18 + $0x9a0] sm:$0xff] %v1234_v41  ;;  %v1240_v53 = vadd.f32 1.0, %v472_v50  ;;  %v474_v55 = vld [vmem:[%s2895_s4 + $0x9e0] sm:$0xff]  ;;  %v475_v56 = vld [vmem:[%s2895_s4 + $0x9e8] sm:$0xff]  ;;  %2003 = vst [vmem:[%s2910_s18 + $0x9a8] sm:$0xff] %v1235_v45  ;;  %v1241_v57 = vadd.f32 1.0, %v473_v54 }
  0xd8   : > { %2004 = vst [vmem:[%s2910_s18 + $0x9b0] sm:$0xff] %v1236_v46  ;;  %2005 = vst [vmem:[%s2910_s18 + $0x9b8] sm:$0xff] %v1237_v47  ;;  %v1242_v58 = vadd.f32 1.0, %v474_v55  ;;  %v1243_v59 = vadd.f32 1.0, %v475_v56  ;;  %v476_v60 = vld [vmem:[%s2895_s4 + $0x9f0] sm:$0xff]  ;;  %v477_v61 = vld [vmem:[%s2895_s4 + $0x9f8] sm:$0xff] }
  0xd9   : > { %v478_v62 = vld [vmem:[%s2895_s4 + $0xa00] sm:$0xff]  ;;  %2006 = vst [vmem:[%s2910_s18 + $0x9c0] sm:$0xff] %v1238_v51  ;;  %2007 = vst [vmem:[%s2910_s18 + $0x9c8] sm:$0xff] %v1239_v52  ;;  %v1244_v63 = vadd.f32 1.0, %v476_v60  ;;  %v1245_v0 = vadd.f32 1.0, %v477_v61  ;;  %v479_v2 = vld [vmem:[%s2895_s4 + $0xa08] sm:$0xff] }
  0xda   : > { %2008 = vst [vmem:[%s2910_s18 + $0x9d0] sm:$0xff] %v1240_v53  ;;  %v1246_v1 = vadd.f32 1.0, %v478_v62  ;;  %v480_v3 = vld [vmem:[%s2895_s4 + $0xa10] sm:$0xff]  ;;  %v481_v4 = vld [vmem:[%s2895_s4 + $0xa18] sm:$0xff]  ;;  %2009 = vst [vmem:[%s2910_s18 + $0x9d8] sm:$0xff] %v1241_v57  ;;  %v1247_v5 = vadd.f32 1.0, %v479_v2 }
  0xdb   : > { %2010 = vst [vmem:[%s2910_s18 + $0x9e0] sm:$0xff] %v1242_v58  ;;  %2011 = vst [vmem:[%s2910_s18 + $0x9e8] sm:$0xff] %v1243_v59  ;;  %v1248_v6 = vadd.f32 1.0, %v480_v3  ;;  %v1249_v7 = vadd.f32 1.0, %v481_v4  ;;  %v482_v8 = vld [vmem:[%s2895_s4 + $0xa20] sm:$0xff]  ;;  %v483_v9 = vld [vmem:[%s2895_s4 + $0xa28] sm:$0xff] }
  0xdc   : > { %v484_v10 = vld [vmem:[%s2895_s4 + $0xa30] sm:$0xff]  ;;  %2012 = vst [vmem:[%s2910_s18 + $0x9f0] sm:$0xff] %v1244_v63  ;;  %2013 = vst [vmem:[%s2910_s18 + $0x9f8] sm:$0xff] %v1245_v0  ;;  %v1250_v11 = vadd.f32 1.0, %v482_v8  ;;  %v1251_v12 = vadd.f32 1.0, %v483_v9  ;;  %v485_v14 = vld [vmem:[%s2895_s4 + $0xa38] sm:$0xff] }
  0xdd   : > { %2014 = vst [vmem:[%s2910_s18 + $0xa00] sm:$0xff] %v1246_v1  ;;  %v1252_v13 = vadd.f32 1.0, %v484_v10  ;;  %v486_v15 = vld [vmem:[%s2895_s4 + $0xa40] sm:$0xff]  ;;  %v487_v16 = vld [vmem:[%s2895_s4 + $0xa48] sm:$0xff]  ;;  %2015 = vst [vmem:[%s2910_s18 + $0xa08] sm:$0xff] %v1247_v5  ;;  %v1253_v17 = vadd.f32 1.0, %v485_v14 }
  0xde   : > { %2016 = vst [vmem:[%s2910_s18 + $0xa10] sm:$0xff] %v1248_v6  ;;  %2017 = vst [vmem:[%s2910_s18 + $0xa18] sm:$0xff] %v1249_v7  ;;  %v1254_v18 = vadd.f32 1.0, %v486_v15  ;;  %v1255_v19 = vadd.f32 1.0, %v487_v16  ;;  %v488_v20 = vld [vmem:[%s2895_s4 + $0xa50] sm:$0xff]  ;;  %v489_v21 = vld [vmem:[%s2895_s4 + $0xa58] sm:$0xff] }
  0xdf   : > { %v490_v22 = vld [vmem:[%s2895_s4 + $0xa60] sm:$0xff]  ;;  %2018 = vst [vmem:[%s2910_s18 + $0xa20] sm:$0xff] %v1250_v11  ;;  %2019 = vst [vmem:[%s2910_s18 + $0xa28] sm:$0xff] %v1251_v12  ;;  %v1256_v23 = vadd.f32 1.0, %v488_v20  ;;  %v1257_v24 = vadd.f32 1.0, %v489_v21  ;;  %v491_v26 = vld [vmem:[%s2895_s4 + $0xa68] sm:$0xff] }
  0xe0   : > { %2020 = vst [vmem:[%s2910_s18 + $0xa30] sm:$0xff] %v1252_v13  ;;  %v1258_v25 = vadd.f32 1.0, %v490_v22  ;;  %v492_v27 = vld [vmem:[%s2895_s4 + $0xa70] sm:$0xff]  ;;  %v493_v28 = vld [vmem:[%s2895_s4 + $0xa78] sm:$0xff]  ;;  %2021 = vst [vmem:[%s2910_s18 + $0xa38] sm:$0xff] %v1253_v17  ;;  %v1259_v29 = vadd.f32 1.0, %v491_v26 }
  0xe1   : > { %2022 = vst [vmem:[%s2910_s18 + $0xa40] sm:$0xff] %v1254_v18  ;;  %2023 = vst [vmem:[%s2910_s18 + $0xa48] sm:$0xff] %v1255_v19  ;;  %v1260_v30 = vadd.f32 1.0, %v492_v27  ;;  %v1261_v31 = vadd.f32 1.0, %v493_v28  ;;  %v494_v32 = vld [vmem:[%s2895_s4 + $0xa80] sm:$0xff]  ;;  %v495_v33 = vld [vmem:[%s2895_s4 + $0xa88] sm:$0xff] }
  0xe2   : > { %v496_v34 = vld [vmem:[%s2895_s4 + $0xa90] sm:$0xff]  ;;  %2024 = vst [vmem:[%s2910_s18 + $0xa50] sm:$0xff] %v1256_v23  ;;  %2025 = vst [vmem:[%s2910_s18 + $0xa58] sm:$0xff] %v1257_v24  ;;  %v1262_v35 = vadd.f32 1.0, %v494_v32  ;;  %v1263_v36 = vadd.f32 1.0, %v495_v33  ;;  %v497_v38 = vld [vmem:[%s2895_s4 + $0xa98] sm:$0xff] }
  0xe3   : > { %2026 = vst [vmem:[%s2910_s18 + $0xa60] sm:$0xff] %v1258_v25  ;;  %v1264_v37 = vadd.f32 1.0, %v496_v34  ;;  %v498_v39 = vld [vmem:[%s2895_s4 + $0xaa0] sm:$0xff]  ;;  %v499_v40 = vld [vmem:[%s2895_s4 + $0xaa8] sm:$0xff]  ;;  %2027 = vst [vmem:[%s2910_s18 + $0xa68] sm:$0xff] %v1259_v29  ;;  %v1265_v41 = vadd.f32 1.0, %v497_v38 }
  0xe4   : > { %2028 = vst [vmem:[%s2910_s18 + $0xa70] sm:$0xff] %v1260_v30  ;;  %2029 = vst [vmem:[%s2910_s18 + $0xa78] sm:$0xff] %v1261_v31  ;;  %v1266_v42 = vadd.f32 1.0, %v498_v39  ;;  %v1267_v43 = vadd.f32 1.0, %v499_v40  ;;  %v500_v44 = vld [vmem:[%s2895_s4 + $0xab0] sm:$0xff]  ;;  %v501_v45 = vld [vmem:[%s2895_s4 + $0xab8] sm:$0xff] }
  0xe5   : > { %v502_v46 = vld [vmem:[%s2895_s4 + $0xac0] sm:$0xff]  ;;  %2030 = vst [vmem:[%s2910_s18 + $0xa80] sm:$0xff] %v1262_v35  ;;  %2031 = vst [vmem:[%s2910_s18 + $0xa88] sm:$0xff] %v1263_v36  ;;  %v1268_v47 = vadd.f32 1.0, %v500_v44  ;;  %v1269_v48 = vadd.f32 1.0, %v501_v45  ;;  %v503_v50 = vld [vmem:[%s2895_s4 + $0xac8] sm:$0xff] }
  0xe6   : > { %2032 = vst [vmem:[%s2910_s18 + $0xa90] sm:$0xff] %v1264_v37  ;;  %v1270_v49 = vadd.f32 1.0, %v502_v46  ;;  %v504_v51 = vld [vmem:[%s2895_s4 + $0xad0] sm:$0xff]  ;;  %v505_v52 = vld [vmem:[%s2895_s4 + $0xad8] sm:$0xff]  ;;  %2033 = vst [vmem:[%s2910_s18 + $0xa98] sm:$0xff] %v1265_v41  ;;  %v1271_v53 = vadd.f32 1.0, %v503_v50 }
  0xe7   : > { %2034 = vst [vmem:[%s2910_s18 + $0xaa0] sm:$0xff] %v1266_v42  ;;  %2035 = vst [vmem:[%s2910_s18 + $0xaa8] sm:$0xff] %v1267_v43  ;;  %v1272_v54 = vadd.f32 1.0, %v504_v51  ;;  %v1273_v55 = vadd.f32 1.0, %v505_v52  ;;  %v506_v56 = vld [vmem:[%s2895_s4 + $0xae0] sm:$0xff]  ;;  %v507_v57 = vld [vmem:[%s2895_s4 + $0xae8] sm:$0xff] }
  0xe8   : > { %v508_v58 = vld [vmem:[%s2895_s4 + $0xaf0] sm:$0xff]  ;;  %2036 = vst [vmem:[%s2910_s18 + $0xab0] sm:$0xff] %v1268_v47  ;;  %2037 = vst [vmem:[%s2910_s18 + $0xab8] sm:$0xff] %v1269_v48  ;;  %v1274_v59 = vadd.f32 1.0, %v506_v56  ;;  %v1275_v60 = vadd.f32 1.0, %v507_v57  ;;  %v509_v62 = vld [vmem:[%s2895_s4 + $0xaf8] sm:$0xff] }
  0xe9   : > { %2038 = vst [vmem:[%s2910_s18 + $0xac0] sm:$0xff] %v1270_v49  ;;  %v1276_v61 = vadd.f32 1.0, %v508_v58  ;;  %v510_v63 = vld [vmem:[%s2895_s4 + $0xb00] sm:$0xff]  ;;  %v511_v0 = vld [vmem:[%s2895_s4 + $0xb08] sm:$0xff]  ;;  %2039 = vst [vmem:[%s2910_s18 + $0xac8] sm:$0xff] %v1271_v53  ;;  %v1277_v1 = vadd.f32 1.0, %v509_v62 }
  0xea   : > { %2040 = vst [vmem:[%s2910_s18 + $0xad0] sm:$0xff] %v1272_v54  ;;  %2041 = vst [vmem:[%s2910_s18 + $0xad8] sm:$0xff] %v1273_v55  ;;  %v1278_v2 = vadd.f32 1.0, %v510_v63  ;;  %v1279_v3 = vadd.f32 1.0, %v511_v0  ;;  %v512_v4 = vld [vmem:[%s2895_s4 + $0xb10] sm:$0xff]  ;;  %v513_v5 = vld [vmem:[%s2895_s4 + $0xb18] sm:$0xff] }
  0xeb   : > { %v514_v6 = vld [vmem:[%s2895_s4 + $0xb20] sm:$0xff]  ;;  %2042 = vst [vmem:[%s2910_s18 + $0xae0] sm:$0xff] %v1274_v59  ;;  %2043 = vst [vmem:[%s2910_s18 + $0xae8] sm:$0xff] %v1275_v60  ;;  %v1280_v7 = vadd.f32 1.0, %v512_v4  ;;  %v1281_v8 = vadd.f32 1.0, %v513_v5  ;;  %v515_v10 = vld [vmem:[%s2895_s4 + $0xb28] sm:$0xff] }
  0xec   : > { %2044 = vst [vmem:[%s2910_s18 + $0xaf0] sm:$0xff] %v1276_v61  ;;  %v1282_v9 = vadd.f32 1.0, %v514_v6  ;;  %v516_v11 = vld [vmem:[%s2895_s4 + $0xb30] sm:$0xff]  ;;  %v517_v12 = vld [vmem:[%s2895_s4 + $0xb38] sm:$0xff]  ;;  %2045 = vst [vmem:[%s2910_s18 + $0xaf8] sm:$0xff] %v1277_v1  ;;  %v1283_v13 = vadd.f32 1.0, %v515_v10 }
  0xed   : > { %2046 = vst [vmem:[%s2910_s18 + $0xb00] sm:$0xff] %v1278_v2  ;;  %2047 = vst [vmem:[%s2910_s18 + $0xb08] sm:$0xff] %v1279_v3  ;;  %v1284_v14 = vadd.f32 1.0, %v516_v11  ;;  %v1285_v15 = vadd.f32 1.0, %v517_v12  ;;  %v518_v16 = vld [vmem:[%s2895_s4 + $0xb40] sm:$0xff]  ;;  %v519_v17 = vld [vmem:[%s2895_s4 + $0xb48] sm:$0xff] }
  0xee   : > { %v520_v18 = vld [vmem:[%s2895_s4 + $0xb50] sm:$0xff]  ;;  %2048 = vst [vmem:[%s2910_s18 + $0xb10] sm:$0xff] %v1280_v7  ;;  %2049 = vst [vmem:[%s2910_s18 + $0xb18] sm:$0xff] %v1281_v8  ;;  %v1286_v19 = vadd.f32 1.0, %v518_v16  ;;  %v1287_v20 = vadd.f32 1.0, %v519_v17  ;;  %v521_v22 = vld [vmem:[%s2895_s4 + $0xb58] sm:$0xff] }
  0xef   : > { %2050 = vst [vmem:[%s2910_s18 + $0xb20] sm:$0xff] %v1282_v9  ;;  %v1288_v21 = vadd.f32 1.0, %v520_v18  ;;  %v522_v23 = vld [vmem:[%s2895_s4 + $0xb60] sm:$0xff]  ;;  %v523_v24 = vld [vmem:[%s2895_s4 + $0xb68] sm:$0xff]  ;;  %2051 = vst [vmem:[%s2910_s18 + $0xb28] sm:$0xff] %v1283_v13  ;;  %v1289_v25 = vadd.f32 1.0, %v521_v22 }
  0xf0   : > { %2052 = vst [vmem:[%s2910_s18 + $0xb30] sm:$0xff] %v1284_v14  ;;  %2053 = vst [vmem:[%s2910_s18 + $0xb38] sm:$0xff] %v1285_v15  ;;  %v1290_v26 = vadd.f32 1.0, %v522_v23  ;;  %v1291_v27 = vadd.f32 1.0, %v523_v24  ;;  %v524_v28 = vld [vmem:[%s2895_s4 + $0xb70] sm:$0xff]  ;;  %v525_v29 = vld [vmem:[%s2895_s4 + $0xb78] sm:$0xff] }
  0xf1   : > { %v526_v30 = vld [vmem:[%s2895_s4 + $0xb80] sm:$0xff]  ;;  %2054 = vst [vmem:[%s2910_s18 + $0xb40] sm:$0xff] %v1286_v19  ;;  %2055 = vst [vmem:[%s2910_s18 + $0xb48] sm:$0xff] %v1287_v20  ;;  %v1292_v31 = vadd.f32 1.0, %v524_v28  ;;  %v1293_v32 = vadd.f32 1.0, %v525_v29  ;;  %v527_v34 = vld [vmem:[%s2895_s4 + $0xb88] sm:$0xff] }
  0xf2   : > { %2056 = vst [vmem:[%s2910_s18 + $0xb50] sm:$0xff] %v1288_v21  ;;  %v1294_v33 = vadd.f32 1.0, %v526_v30  ;;  %v528_v35 = vld [vmem:[%s2895_s4 + $0xb90] sm:$0xff]  ;;  %v529_v36 = vld [vmem:[%s2895_s4 + $0xb98] sm:$0xff]  ;;  %2057 = vst [vmem:[%s2910_s18 + $0xb58] sm:$0xff] %v1289_v25  ;;  %v1295_v37 = vadd.f32 1.0, %v527_v34 }
  0xf3   : > { %2058 = vst [vmem:[%s2910_s18 + $0xb60] sm:$0xff] %v1290_v26  ;;  %2059 = vst [vmem:[%s2910_s18 + $0xb68] sm:$0xff] %v1291_v27  ;;  %v1296_v38 = vadd.f32 1.0, %v528_v35  ;;  %v1297_v39 = vadd.f32 1.0, %v529_v36  ;;  %v530_v40 = vld [vmem:[%s2895_s4 + $0xba0] sm:$0xff]  ;;  %v531_v41 = vld [vmem:[%s2895_s4 + $0xba8] sm:$0xff] }
  0xf4   : > { %v532_v42 = vld [vmem:[%s2895_s4 + $0xbb0] sm:$0xff]  ;;  %2060 = vst [vmem:[%s2910_s18 + $0xb70] sm:$0xff] %v1292_v31  ;;  %2061 = vst [vmem:[%s2910_s18 + $0xb78] sm:$0xff] %v1293_v32  ;;  %v1298_v43 = vadd.f32 1.0, %v530_v40  ;;  %v1299_v44 = vadd.f32 1.0, %v531_v41  ;;  %v533_v46 = vld [vmem:[%s2895_s4 + $0xbb8] sm:$0xff] }
  0xf5   : > { %2062 = vst [vmem:[%s2910_s18 + $0xb80] sm:$0xff] %v1294_v33  ;;  %v1300_v45 = vadd.f32 1.0, %v532_v42  ;;  %v534_v47 = vld [vmem:[%s2895_s4 + $0xbc0] sm:$0xff]  ;;  %v535_v48 = vld [vmem:[%s2895_s4 + $0xbc8] sm:$0xff]  ;;  %2063 = vst [vmem:[%s2910_s18 + $0xb88] sm:$0xff] %v1295_v37  ;;  %v1301_v49 = vadd.f32 1.0, %v533_v46 }
  0xf6   : > { %2064 = vst [vmem:[%s2910_s18 + $0xb90] sm:$0xff] %v1296_v38  ;;  %2065 = vst [vmem:[%s2910_s18 + $0xb98] sm:$0xff] %v1297_v39  ;;  %v1302_v50 = vadd.f32 1.0, %v534_v47  ;;  %v1303_v51 = vadd.f32 1.0, %v535_v48  ;;  %v536_v52 = vld [vmem:[%s2895_s4 + $0xbd0] sm:$0xff]  ;;  %v537_v53 = vld [vmem:[%s2895_s4 + $0xbd8] sm:$0xff] }
  0xf7   : > { %v538_v54 = vld [vmem:[%s2895_s4 + $0xbe0] sm:$0xff]  ;;  %2066 = vst [vmem:[%s2910_s18 + $0xba0] sm:$0xff] %v1298_v43  ;;  %2067 = vst [vmem:[%s2910_s18 + $0xba8] sm:$0xff] %v1299_v44  ;;  %v1304_v55 = vadd.f32 1.0, %v536_v52  ;;  %v1305_v56 = vadd.f32 1.0, %v537_v53  ;;  %v539_v58 = vld [vmem:[%s2895_s4 + $0xbe8] sm:$0xff] }
  0xf8   : > { %2068 = vst [vmem:[%s2910_s18 + $0xbb0] sm:$0xff] %v1300_v45  ;;  %v1306_v57 = vadd.f32 1.0, %v538_v54  ;;  %v540_v59 = vld [vmem:[%s2895_s4 + $0xbf0] sm:$0xff]  ;;  %v541_v60 = vld [vmem:[%s2895_s4 + $0xbf8] sm:$0xff]  ;;  %2069 = vst [vmem:[%s2910_s18 + $0xbb8] sm:$0xff] %v1301_v49  ;;  %v1307_v61 = vadd.f32 1.0, %v539_v58 }
  0xf9   : > { %2070 = vst [vmem:[%s2910_s18 + $0xbc0] sm:$0xff] %v1302_v50  ;;  %2071 = vst [vmem:[%s2910_s18 + $0xbc8] sm:$0xff] %v1303_v51  ;;  %v1308_v62 = vadd.f32 1.0, %v540_v59  ;;  %v1309_v63 = vadd.f32 1.0, %v541_v60  ;;  %v542_v0 = vld [vmem:[%s2895_s4 + $0xc00] sm:$0xff]  ;;  %v543_v1 = vld [vmem:[%s2895_s4 + $0xc08] sm:$0xff] }
  0xfa   : > { %v544_v2 = vld [vmem:[%s2895_s4 + $0xc10] sm:$0xff]  ;;  %2072 = vst [vmem:[%s2910_s18 + $0xbd0] sm:$0xff] %v1304_v55  ;;  %2073 = vst [vmem:[%s2910_s18 + $0xbd8] sm:$0xff] %v1305_v56  ;;  %v1310_v3 = vadd.f32 1.0, %v542_v0  ;;  %v1311_v4 = vadd.f32 1.0, %v543_v1  ;;  %v545_v6 = vld [vmem:[%s2895_s4 + $0xc18] sm:$0xff] }
  0xfb   : > { %2074 = vst [vmem:[%s2910_s18 + $0xbe0] sm:$0xff] %v1306_v57  ;;  %v1312_v5 = vadd.f32 1.0, %v544_v2  ;;  %v546_v7 = vld [vmem:[%s2895_s4 + $0xc20] sm:$0xff]  ;;  %v547_v8 = vld [vmem:[%s2895_s4 + $0xc28] sm:$0xff]  ;;  %2075 = vst [vmem:[%s2910_s18 + $0xbe8] sm:$0xff] %v1307_v61  ;;  %v1313_v9 = vadd.f32 1.0, %v545_v6 }
  0xfc   : > { %2076 = vst [vmem:[%s2910_s18 + $0xbf0] sm:$0xff] %v1308_v62  ;;  %2077 = vst [vmem:[%s2910_s18 + $0xbf8] sm:$0xff] %v1309_v63  ;;  %v1314_v10 = vadd.f32 1.0, %v546_v7  ;;  %v1315_v11 = vadd.f32 1.0, %v547_v8  ;;  %v548_v12 = vld [vmem:[%s2895_s4 + $0xc30] sm:$0xff]  ;;  %v549_v13 = vld [vmem:[%s2895_s4 + $0xc38] sm:$0xff] }
  0xfd   : > { %v550_v14 = vld [vmem:[%s2895_s4 + $0xc40] sm:$0xff]  ;;  %2078 = vst [vmem:[%s2910_s18 + $0xc00] sm:$0xff] %v1310_v3  ;;  %2079 = vst [vmem:[%s2910_s18 + $0xc08] sm:$0xff] %v1311_v4  ;;  %v1316_v15 = vadd.f32 1.0, %v548_v12  ;;  %v1317_v16 = vadd.f32 1.0, %v549_v13  ;;  %v551_v18 = vld [vmem:[%s2895_s4 + $0xc48] sm:$0xff] }
  0xfe   : > { %2080 = vst [vmem:[%s2910_s18 + $0xc10] sm:$0xff] %v1312_v5  ;;  %v1318_v17 = vadd.f32 1.0, %v550_v14  ;;  %v552_v19 = vld [vmem:[%s2895_s4 + $0xc50] sm:$0xff]  ;;  %v553_v20 = vld [vmem:[%s2895_s4 + $0xc58] sm:$0xff]  ;;  %2081 = vst [vmem:[%s2910_s18 + $0xc18] sm:$0xff] %v1313_v9  ;;  %v1319_v21 = vadd.f32 1.0, %v551_v18 }
  0xff   : > { %2082 = vst [vmem:[%s2910_s18 + $0xc20] sm:$0xff] %v1314_v10  ;;  %2083 = vst [vmem:[%s2910_s18 + $0xc28] sm:$0xff] %v1315_v11  ;;  %v1320_v22 = vadd.f32 1.0, %v552_v19  ;;  %v1321_v23 = vadd.f32 1.0, %v553_v20  ;;  %v554_v24 = vld [vmem:[%s2895_s4 + $0xc60] sm:$0xff]  ;;  %v555_v25 = vld [vmem:[%s2895_s4 + $0xc68] sm:$0xff] }
 0x100   : > { %v556_v26 = vld [vmem:[%s2895_s4 + $0xc70] sm:$0xff]  ;;  %2084 = vst [vmem:[%s2910_s18 + $0xc30] sm:$0xff] %v1316_v15  ;;  %2085 = vst [vmem:[%s2910_s18 + $0xc38] sm:$0xff] %v1317_v16  ;;  %v1322_v27 = vadd.f32 1.0, %v554_v24  ;;  %v1323_v28 = vadd.f32 1.0, %v555_v25  ;;  %v557_v30 = vld [vmem:[%s2895_s4 + $0xc78] sm:$0xff] }
 0x101   : > { %2086 = vst [vmem:[%s2910_s18 + $0xc40] sm:$0xff] %v1318_v17  ;;  %v1324_v29 = vadd.f32 1.0, %v556_v26  ;;  %v558_v31 = vld [vmem:[%s2895_s4 + $0xc80] sm:$0xff]  ;;  %v559_v32 = vld [vmem:[%s2895_s4 + $0xc88] sm:$0xff]  ;;  %2087 = vst [vmem:[%s2910_s18 + $0xc48] sm:$0xff] %v1319_v21  ;;  %v1325_v33 = vadd.f32 1.0, %v557_v30 }
 0x102   : > { %2088 = vst [vmem:[%s2910_s18 + $0xc50] sm:$0xff] %v1320_v22  ;;  %2089 = vst [vmem:[%s2910_s18 + $0xc58] sm:$0xff] %v1321_v23  ;;  %v1326_v34 = vadd.f32 1.0, %v558_v31  ;;  %v1327_v35 = vadd.f32 1.0, %v559_v32  ;;  %v560_v36 = vld [vmem:[%s2895_s4 + $0xc90] sm:$0xff]  ;;  %v561_v37 = vld [vmem:[%s2895_s4 + $0xc98] sm:$0xff] }
 0x103   : > { %v562_v38 = vld [vmem:[%s2895_s4 + $0xca0] sm:$0xff]  ;;  %2090 = vst [vmem:[%s2910_s18 + $0xc60] sm:$0xff] %v1322_v27  ;;  %2091 = vst [vmem:[%s2910_s18 + $0xc68] sm:$0xff] %v1323_v28  ;;  %v1328_v39 = vadd.f32 1.0, %v560_v36  ;;  %v1329_v40 = vadd.f32 1.0, %v561_v37  ;;  %v563_v42 = vld [vmem:[%s2895_s4 + $0xca8] sm:$0xff] }
 0x104   : > { %2092 = vst [vmem:[%s2910_s18 + $0xc70] sm:$0xff] %v1324_v29  ;;  %v1330_v41 = vadd.f32 1.0, %v562_v38  ;;  %v564_v43 = vld [vmem:[%s2895_s4 + $0xcb0] sm:$0xff]  ;;  %v565_v44 = vld [vmem:[%s2895_s4 + $0xcb8] sm:$0xff]  ;;  %2093 = vst [vmem:[%s2910_s18 + $0xc78] sm:$0xff] %v1325_v33  ;;  %v1331_v45 = vadd.f32 1.0, %v563_v42 }
 0x105   : > { %2094 = vst [vmem:[%s2910_s18 + $0xc80] sm:$0xff] %v1326_v34  ;;  %2095 = vst [vmem:[%s2910_s18 + $0xc88] sm:$0xff] %v1327_v35  ;;  %v1332_v46 = vadd.f32 1.0, %v564_v43  ;;  %v1333_v47 = vadd.f32 1.0, %v565_v44  ;;  %v566_v48 = vld [vmem:[%s2895_s4 + $0xcc0] sm:$0xff]  ;;  %v567_v49 = vld [vmem:[%s2895_s4 + $0xcc8] sm:$0xff] }
 0x106   : > { %v568_v50 = vld [vmem:[%s2895_s4 + $0xcd0] sm:$0xff]  ;;  %2096 = vst [vmem:[%s2910_s18 + $0xc90] sm:$0xff] %v1328_v39  ;;  %2097 = vst [vmem:[%s2910_s18 + $0xc98] sm:$0xff] %v1329_v40  ;;  %v1334_v51 = vadd.f32 1.0, %v566_v48  ;;  %v1335_v52 = vadd.f32 1.0, %v567_v49  ;;  %v569_v54 = vld [vmem:[%s2895_s4 + $0xcd8] sm:$0xff] }
 0x107   : > { %2098 = vst [vmem:[%s2910_s18 + $0xca0] sm:$0xff] %v1330_v41  ;;  %v1336_v53 = vadd.f32 1.0, %v568_v50  ;;  %v570_v55 = vld [vmem:[%s2895_s4 + $0xce0] sm:$0xff]  ;;  %v571_v56 = vld [vmem:[%s2895_s4 + $0xce8] sm:$0xff]  ;;  %2099 = vst [vmem:[%s2910_s18 + $0xca8] sm:$0xff] %v1331_v45  ;;  %v1337_v57 = vadd.f32 1.0, %v569_v54 }
 0x108   : > { %2100 = vst [vmem:[%s2910_s18 + $0xcb0] sm:$0xff] %v1332_v46  ;;  %2101 = vst [vmem:[%s2910_s18 + $0xcb8] sm:$0xff] %v1333_v47  ;;  %v1338_v58 = vadd.f32 1.0, %v570_v55  ;;  %v1339_v59 = vadd.f32 1.0, %v571_v56  ;;  %v572_v60 = vld [vmem:[%s2895_s4 + $0xcf0] sm:$0xff]  ;;  %v573_v61 = vld [vmem:[%s2895_s4 + $0xcf8] sm:$0xff] }
 0x109   : > { %v574_v62 = vld [vmem:[%s2895_s4 + $0xd00] sm:$0xff]  ;;  %2102 = vst [vmem:[%s2910_s18 + $0xcc0] sm:$0xff] %v1334_v51  ;;  %2103 = vst [vmem:[%s2910_s18 + $0xcc8] sm:$0xff] %v1335_v52  ;;  %v1340_v63 = vadd.f32 1.0, %v572_v60  ;;  %v1341_v0 = vadd.f32 1.0, %v573_v61  ;;  %v575_v2 = vld [vmem:[%s2895_s4 + $0xd08] sm:$0xff] }
 0x10a   : > { %2104 = vst [vmem:[%s2910_s18 + $0xcd0] sm:$0xff] %v1336_v53  ;;  %v1342_v1 = vadd.f32 1.0, %v574_v62  ;;  %v576_v3 = vld [vmem:[%s2895_s4 + $0xd10] sm:$0xff]  ;;  %v577_v4 = vld [vmem:[%s2895_s4 + $0xd18] sm:$0xff]  ;;  %2105 = vst [vmem:[%s2910_s18 + $0xcd8] sm:$0xff] %v1337_v57  ;;  %v1343_v5 = vadd.f32 1.0, %v575_v2 }
 0x10b   : > { %2106 = vst [vmem:[%s2910_s18 + $0xce0] sm:$0xff] %v1338_v58  ;;  %2107 = vst [vmem:[%s2910_s18 + $0xce8] sm:$0xff] %v1339_v59  ;;  %v1344_v6 = vadd.f32 1.0, %v576_v3  ;;  %v1345_v7 = vadd.f32 1.0, %v577_v4  ;;  %v578_v8 = vld [vmem:[%s2895_s4 + $0xd20] sm:$0xff]  ;;  %v579_v9 = vld [vmem:[%s2895_s4 + $0xd28] sm:$0xff] }
 0x10c   : > { %v580_v10 = vld [vmem:[%s2895_s4 + $0xd30] sm:$0xff]  ;;  %2108 = vst [vmem:[%s2910_s18 + $0xcf0] sm:$0xff] %v1340_v63  ;;  %2109 = vst [vmem:[%s2910_s18 + $0xcf8] sm:$0xff] %v1341_v0  ;;  %v1346_v11 = vadd.f32 1.0, %v578_v8  ;;  %v1347_v12 = vadd.f32 1.0, %v579_v9  ;;  %v581_v14 = vld [vmem:[%s2895_s4 + $0xd38] sm:$0xff] }
 0x10d   : > { %2110 = vst [vmem:[%s2910_s18 + $0xd00] sm:$0xff] %v1342_v1  ;;  %v1348_v13 = vadd.f32 1.0, %v580_v10  ;;  %v582_v15 = vld [vmem:[%s2895_s4 + $0xd40] sm:$0xff]  ;;  %v583_v16 = vld [vmem:[%s2895_s4 + $0xd48] sm:$0xff]  ;;  %2111 = vst [vmem:[%s2910_s18 + $0xd08] sm:$0xff] %v1343_v5  ;;  %v1349_v17 = vadd.f32 1.0, %v581_v14 }
 0x10e   : > { %2112 = vst [vmem:[%s2910_s18 + $0xd10] sm:$0xff] %v1344_v6  ;;  %2113 = vst [vmem:[%s2910_s18 + $0xd18] sm:$0xff] %v1345_v7  ;;  %v1350_v18 = vadd.f32 1.0, %v582_v15  ;;  %v1351_v19 = vadd.f32 1.0, %v583_v16  ;;  %v584_v20 = vld [vmem:[%s2895_s4 + $0xd50] sm:$0xff]  ;;  %v585_v21 = vld [vmem:[%s2895_s4 + $0xd58] sm:$0xff] }
 0x10f   : > { %v586_v22 = vld [vmem:[%s2895_s4 + $0xd60] sm:$0xff]  ;;  %2114 = vst [vmem:[%s2910_s18 + $0xd20] sm:$0xff] %v1346_v11  ;;  %2115 = vst [vmem:[%s2910_s18 + $0xd28] sm:$0xff] %v1347_v12  ;;  %v1352_v23 = vadd.f32 1.0, %v584_v20  ;;  %v1353_v24 = vadd.f32 1.0, %v585_v21  ;;  %v587_v26 = vld [vmem:[%s2895_s4 + $0xd68] sm:$0xff] }
 0x110   : > { %2116 = vst [vmem:[%s2910_s18 + $0xd30] sm:$0xff] %v1348_v13  ;;  %v1354_v25 = vadd.f32 1.0, %v586_v22  ;;  %v588_v27 = vld [vmem:[%s2895_s4 + $0xd70] sm:$0xff]  ;;  %v589_v28 = vld [vmem:[%s2895_s4 + $0xd78] sm:$0xff]  ;;  %2117 = vst [vmem:[%s2910_s18 + $0xd38] sm:$0xff] %v1349_v17  ;;  %v1355_v29 = vadd.f32 1.0, %v587_v26 }
 0x111   : > { %2118 = vst [vmem:[%s2910_s18 + $0xd40] sm:$0xff] %v1350_v18  ;;  %2119 = vst [vmem:[%s2910_s18 + $0xd48] sm:$0xff] %v1351_v19  ;;  %v1356_v30 = vadd.f32 1.0, %v588_v27  ;;  %v1357_v31 = vadd.f32 1.0, %v589_v28  ;;  %v590_v32 = vld [vmem:[%s2895_s4 + $0xd80] sm:$0xff]  ;;  %v591_v33 = vld [vmem:[%s2895_s4 + $0xd88] sm:$0xff] }
 0x112   : > { %v592_v34 = vld [vmem:[%s2895_s4 + $0xd90] sm:$0xff]  ;;  %2120 = vst [vmem:[%s2910_s18 + $0xd50] sm:$0xff] %v1352_v23  ;;  %2121 = vst [vmem:[%s2910_s18 + $0xd58] sm:$0xff] %v1353_v24  ;;  %v1358_v35 = vadd.f32 1.0, %v590_v32  ;;  %v1359_v36 = vadd.f32 1.0, %v591_v33  ;;  %v593_v38 = vld [vmem:[%s2895_s4 + $0xd98] sm:$0xff] }
 0x113   : > { %2122 = vst [vmem:[%s2910_s18 + $0xd60] sm:$0xff] %v1354_v25  ;;  %v1360_v37 = vadd.f32 1.0, %v592_v34  ;;  %v594_v39 = vld [vmem:[%s2895_s4 + $0xda0] sm:$0xff]  ;;  %v595_v40 = vld [vmem:[%s2895_s4 + $0xda8] sm:$0xff]  ;;  %2123 = vst [vmem:[%s2910_s18 + $0xd68] sm:$0xff] %v1355_v29  ;;  %v1361_v41 = vadd.f32 1.0, %v593_v38 }
 0x114   : > { %2124 = vst [vmem:[%s2910_s18 + $0xd70] sm:$0xff] %v1356_v30  ;;  %2125 = vst [vmem:[%s2910_s18 + $0xd78] sm:$0xff] %v1357_v31  ;;  %v1362_v42 = vadd.f32 1.0, %v594_v39  ;;  %v1363_v43 = vadd.f32 1.0, %v595_v40  ;;  %v596_v44 = vld [vmem:[%s2895_s4 + $0xdb0] sm:$0xff]  ;;  %v597_v45 = vld [vmem:[%s2895_s4 + $0xdb8] sm:$0xff] }
 0x115   : > { %v598_v46 = vld [vmem:[%s2895_s4 + $0xdc0] sm:$0xff]  ;;  %2126 = vst [vmem:[%s2910_s18 + $0xd80] sm:$0xff] %v1358_v35  ;;  %2127 = vst [vmem:[%s2910_s18 + $0xd88] sm:$0xff] %v1359_v36  ;;  %v1364_v47 = vadd.f32 1.0, %v596_v44  ;;  %v1365_v48 = vadd.f32 1.0, %v597_v45  ;;  %v599_v50 = vld [vmem:[%s2895_s4 + $0xdc8] sm:$0xff] }
 0x116   : > { %2128 = vst [vmem:[%s2910_s18 + $0xd90] sm:$0xff] %v1360_v37  ;;  %v1366_v49 = vadd.f32 1.0, %v598_v46  ;;  %v600_v51 = vld [vmem:[%s2895_s4 + $0xdd0] sm:$0xff]  ;;  %v601_v52 = vld [vmem:[%s2895_s4 + $0xdd8] sm:$0xff]  ;;  %2129 = vst [vmem:[%s2910_s18 + $0xd98] sm:$0xff] %v1361_v41  ;;  %v1367_v53 = vadd.f32 1.0, %v599_v50 }
 0x117   : > { %2130 = vst [vmem:[%s2910_s18 + $0xda0] sm:$0xff] %v1362_v42  ;;  %2131 = vst [vmem:[%s2910_s18 + $0xda8] sm:$0xff] %v1363_v43  ;;  %v1368_v54 = vadd.f32 1.0, %v600_v51  ;;  %v1369_v55 = vadd.f32 1.0, %v601_v52  ;;  %v602_v56 = vld [vmem:[%s2895_s4 + $0xde0] sm:$0xff]  ;;  %v603_v57 = vld [vmem:[%s2895_s4 + $0xde8] sm:$0xff] }
 0x118   : > { %v604_v58 = vld [vmem:[%s2895_s4 + $0xdf0] sm:$0xff]  ;;  %2132 = vst [vmem:[%s2910_s18 + $0xdb0] sm:$0xff] %v1364_v47  ;;  %2133 = vst [vmem:[%s2910_s18 + $0xdb8] sm:$0xff] %v1365_v48  ;;  %v1370_v59 = vadd.f32 1.0, %v602_v56  ;;  %v1371_v60 = vadd.f32 1.0, %v603_v57  ;;  %v605_v62 = vld [vmem:[%s2895_s4 + $0xdf8] sm:$0xff] }
 0x119   : > { %2134 = vst [vmem:[%s2910_s18 + $0xdc0] sm:$0xff] %v1366_v49  ;;  %v1372_v61 = vadd.f32 1.0, %v604_v58  ;;  %v606_v63 = vld [vmem:[%s2895_s4 + $0xe00] sm:$0xff]  ;;  %v607_v0 = vld [vmem:[%s2895_s4 + $0xe08] sm:$0xff]  ;;  %2135 = vst [vmem:[%s2910_s18 + $0xdc8] sm:$0xff] %v1367_v53  ;;  %v1373_v1 = vadd.f32 1.0, %v605_v62 }
 0x11a   : > { %2136 = vst [vmem:[%s2910_s18 + $0xdd0] sm:$0xff] %v1368_v54  ;;  %2137 = vst [vmem:[%s2910_s18 + $0xdd8] sm:$0xff] %v1369_v55  ;;  %v1374_v2 = vadd.f32 1.0, %v606_v63  ;;  %v1375_v3 = vadd.f32 1.0, %v607_v0  ;;  %v608_v4 = vld [vmem:[%s2895_s4 + $0xe10] sm:$0xff]  ;;  %v609_v5 = vld [vmem:[%s2895_s4 + $0xe18] sm:$0xff] }
 0x11b   : > { %v610_v6 = vld [vmem:[%s2895_s4 + $0xe20] sm:$0xff]  ;;  %2138 = vst [vmem:[%s2910_s18 + $0xde0] sm:$0xff] %v1370_v59  ;;  %2139 = vst [vmem:[%s2910_s18 + $0xde8] sm:$0xff] %v1371_v60  ;;  %v1376_v7 = vadd.f32 1.0, %v608_v4  ;;  %v1377_v8 = vadd.f32 1.0, %v609_v5  ;;  %v611_v10 = vld [vmem:[%s2895_s4 + $0xe28] sm:$0xff] }
 0x11c   : > { %2140 = vst [vmem:[%s2910_s18 + $0xdf0] sm:$0xff] %v1372_v61  ;;  %v1378_v9 = vadd.f32 1.0, %v610_v6  ;;  %v612_v11 = vld [vmem:[%s2895_s4 + $0xe30] sm:$0xff]  ;;  %v613_v12 = vld [vmem:[%s2895_s4 + $0xe38] sm:$0xff]  ;;  %2141 = vst [vmem:[%s2910_s18 + $0xdf8] sm:$0xff] %v1373_v1  ;;  %v1379_v13 = vadd.f32 1.0, %v611_v10 }
 0x11d   : > { %2142 = vst [vmem:[%s2910_s18 + $0xe00] sm:$0xff] %v1374_v2  ;;  %2143 = vst [vmem:[%s2910_s18 + $0xe08] sm:$0xff] %v1375_v3  ;;  %v1380_v14 = vadd.f32 1.0, %v612_v11  ;;  %v1381_v15 = vadd.f32 1.0, %v613_v12  ;;  %v614_v16 = vld [vmem:[%s2895_s4 + $0xe40] sm:$0xff]  ;;  %v615_v17 = vld [vmem:[%s2895_s4 + $0xe48] sm:$0xff] }
 0x11e   : > { %v616_v18 = vld [vmem:[%s2895_s4 + $0xe50] sm:$0xff]  ;;  %2144 = vst [vmem:[%s2910_s18 + $0xe10] sm:$0xff] %v1376_v7  ;;  %2145 = vst [vmem:[%s2910_s18 + $0xe18] sm:$0xff] %v1377_v8  ;;  %v1382_v19 = vadd.f32 1.0, %v614_v16  ;;  %v1383_v20 = vadd.f32 1.0, %v615_v17  ;;  %v617_v22 = vld [vmem:[%s2895_s4 + $0xe58] sm:$0xff] }
 0x11f   : > { %2146 = vst [vmem:[%s2910_s18 + $0xe20] sm:$0xff] %v1378_v9  ;;  %v1384_v21 = vadd.f32 1.0, %v616_v18  ;;  %v618_v23 = vld [vmem:[%s2895_s4 + $0xe60] sm:$0xff]  ;;  %v619_v24 = vld [vmem:[%s2895_s4 + $0xe68] sm:$0xff]  ;;  %2147 = vst [vmem:[%s2910_s18 + $0xe28] sm:$0xff] %v1379_v13  ;;  %v1385_v25 = vadd.f32 1.0, %v617_v22 }
 0x120   : > { %2148 = vst [vmem:[%s2910_s18 + $0xe30] sm:$0xff] %v1380_v14  ;;  %2149 = vst [vmem:[%s2910_s18 + $0xe38] sm:$0xff] %v1381_v15  ;;  %v1386_v26 = vadd.f32 1.0, %v618_v23  ;;  %v1387_v27 = vadd.f32 1.0, %v619_v24  ;;  %v620_v28 = vld [vmem:[%s2895_s4 + $0xe70] sm:$0xff]  ;;  %v621_v29 = vld [vmem:[%s2895_s4 + $0xe78] sm:$0xff] }
 0x121   : > { %v622_v30 = vld [vmem:[%s2895_s4 + $0xe80] sm:$0xff]  ;;  %2150 = vst [vmem:[%s2910_s18 + $0xe40] sm:$0xff] %v1382_v19  ;;  %2151 = vst [vmem:[%s2910_s18 + $0xe48] sm:$0xff] %v1383_v20  ;;  %v1388_v31 = vadd.f32 1.0, %v620_v28  ;;  %v1389_v32 = vadd.f32 1.0, %v621_v29  ;;  %v623_v34 = vld [vmem:[%s2895_s4 + $0xe88] sm:$0xff] }
 0x122   : > { %2152 = vst [vmem:[%s2910_s18 + $0xe50] sm:$0xff] %v1384_v21  ;;  %v1390_v33 = vadd.f32 1.0, %v622_v30  ;;  %v624_v35 = vld [vmem:[%s2895_s4 + $0xe90] sm:$0xff]  ;;  %v625_v36 = vld [vmem:[%s2895_s4 + $0xe98] sm:$0xff]  ;;  %2153 = vst [vmem:[%s2910_s18 + $0xe58] sm:$0xff] %v1385_v25  ;;  %v1391_v37 = vadd.f32 1.0, %v623_v34 }
 0x123   : > { %2154 = vst [vmem:[%s2910_s18 + $0xe60] sm:$0xff] %v1386_v26  ;;  %2155 = vst [vmem:[%s2910_s18 + $0xe68] sm:$0xff] %v1387_v27  ;;  %v1392_v38 = vadd.f32 1.0, %v624_v35  ;;  %v1393_v39 = vadd.f32 1.0, %v625_v36  ;;  %v626_v40 = vld [vmem:[%s2895_s4 + $0xea0] sm:$0xff]  ;;  %v627_v41 = vld [vmem:[%s2895_s4 + $0xea8] sm:$0xff] }
 0x124   : > { %v628_v42 = vld [vmem:[%s2895_s4 + $0xeb0] sm:$0xff]  ;;  %2156 = vst [vmem:[%s2910_s18 + $0xe70] sm:$0xff] %v1388_v31  ;;  %2157 = vst [vmem:[%s2910_s18 + $0xe78] sm:$0xff] %v1389_v32  ;;  %v1394_v43 = vadd.f32 1.0, %v626_v40  ;;  %v1395_v44 = vadd.f32 1.0, %v627_v41  ;;  %v629_v46 = vld [vmem:[%s2895_s4 + $0xeb8] sm:$0xff] }
 0x125   : > { %2158 = vst [vmem:[%s2910_s18 + $0xe80] sm:$0xff] %v1390_v33  ;;  %v1396_v45 = vadd.f32 1.0, %v628_v42  ;;  %v630_v47 = vld [vmem:[%s2895_s4 + $0xec0] sm:$0xff]  ;;  %v631_v48 = vld [vmem:[%s2895_s4 + $0xec8] sm:$0xff]  ;;  %2159 = vst [vmem:[%s2910_s18 + $0xe88] sm:$0xff] %v1391_v37  ;;  %v1397_v49 = vadd.f32 1.0, %v629_v46 }
 0x126   : > { %2160 = vst [vmem:[%s2910_s18 + $0xe90] sm:$0xff] %v1392_v38  ;;  %2161 = vst [vmem:[%s2910_s18 + $0xe98] sm:$0xff] %v1393_v39  ;;  %v1398_v50 = vadd.f32 1.0, %v630_v47  ;;  %v1399_v51 = vadd.f32 1.0, %v631_v48  ;;  %v632_v52 = vld [vmem:[%s2895_s4 + $0xed0] sm:$0xff]  ;;  %v633_v53 = vld [vmem:[%s2895_s4 + $0xed8] sm:$0xff] }
 0x127   : > { %v634_v54 = vld [vmem:[%s2895_s4 + $0xee0] sm:$0xff]  ;;  %2162 = vst [vmem:[%s2910_s18 + $0xea0] sm:$0xff] %v1394_v43  ;;  %2163 = vst [vmem:[%s2910_s18 + $0xea8] sm:$0xff] %v1395_v44  ;;  %v1400_v55 = vadd.f32 1.0, %v632_v52  ;;  %v1401_v56 = vadd.f32 1.0, %v633_v53  ;;  %v635_v58 = vld [vmem:[%s2895_s4 + $0xee8] sm:$0xff] }
 0x128   : > { %2164 = vst [vmem:[%s2910_s18 + $0xeb0] sm:$0xff] %v1396_v45  ;;  %v1402_v57 = vadd.f32 1.0, %v634_v54  ;;  %v636_v59 = vld [vmem:[%s2895_s4 + $0xef0] sm:$0xff]  ;;  %v637_v60 = vld [vmem:[%s2895_s4 + $0xef8] sm:$0xff]  ;;  %2165 = vst [vmem:[%s2910_s18 + $0xeb8] sm:$0xff] %v1397_v49  ;;  %v1403_v61 = vadd.f32 1.0, %v635_v58 }
 0x129   : > { %2166 = vst [vmem:[%s2910_s18 + $0xec0] sm:$0xff] %v1398_v50  ;;  %2167 = vst [vmem:[%s2910_s18 + $0xec8] sm:$0xff] %v1399_v51  ;;  %v1404_v62 = vadd.f32 1.0, %v636_v59  ;;  %v1405_v63 = vadd.f32 1.0, %v637_v60  ;;  %v638_v0 = vld [vmem:[%s2895_s4 + $0xf00] sm:$0xff]  ;;  %v639_v1 = vld [vmem:[%s2895_s4 + $0xf08] sm:$0xff] }
 0x12a   : > { %v640_v2 = vld [vmem:[%s2895_s4 + $0xf10] sm:$0xff]  ;;  %2168 = vst [vmem:[%s2910_s18 + $0xed0] sm:$0xff] %v1400_v55  ;;  %2169 = vst [vmem:[%s2910_s18 + $0xed8] sm:$0xff] %v1401_v56  ;;  %v1406_v3 = vadd.f32 1.0, %v638_v0  ;;  %v1407_v4 = vadd.f32 1.0, %v639_v1  ;;  %v641_v6 = vld [vmem:[%s2895_s4 + $0xf18] sm:$0xff] }
 0x12b   : > { %2170 = vst [vmem:[%s2910_s18 + $0xee0] sm:$0xff] %v1402_v57  ;;  %v1408_v5 = vadd.f32 1.0, %v640_v2  ;;  %v642_v7 = vld [vmem:[%s2895_s4 + $0xf20] sm:$0xff]  ;;  %v643_v8 = vld [vmem:[%s2895_s4 + $0xf28] sm:$0xff]  ;;  %2171 = vst [vmem:[%s2910_s18 + $0xee8] sm:$0xff] %v1403_v61  ;;  %v1409_v9 = vadd.f32 1.0, %v641_v6 }
 0x12c   : > { %2172 = vst [vmem:[%s2910_s18 + $0xef0] sm:$0xff] %v1404_v62  ;;  %2173 = vst [vmem:[%s2910_s18 + $0xef8] sm:$0xff] %v1405_v63  ;;  %v1410_v10 = vadd.f32 1.0, %v642_v7  ;;  %v1411_v11 = vadd.f32 1.0, %v643_v8  ;;  %v644_v12 = vld [vmem:[%s2895_s4 + $0xf30] sm:$0xff]  ;;  %v645_v13 = vld [vmem:[%s2895_s4 + $0xf38] sm:$0xff] }
 0x12d   : > { %v646_v14 = vld [vmem:[%s2895_s4 + $0xf40] sm:$0xff]  ;;  %2174 = vst [vmem:[%s2910_s18 + $0xf00] sm:$0xff] %v1406_v3  ;;  %2175 = vst [vmem:[%s2910_s18 + $0xf08] sm:$0xff] %v1407_v4  ;;  %v1412_v15 = vadd.f32 1.0, %v644_v12  ;;  %v1413_v16 = vadd.f32 1.0, %v645_v13  ;;  %v647_v18 = vld [vmem:[%s2895_s4 + $0xf48] sm:$0xff] }
 0x12e   : > { %2176 = vst [vmem:[%s2910_s18 + $0xf10] sm:$0xff] %v1408_v5  ;;  %v1414_v17 = vadd.f32 1.0, %v646_v14  ;;  %v648_v19 = vld [vmem:[%s2895_s4 + $0xf50] sm:$0xff]  ;;  %v649_v20 = vld [vmem:[%s2895_s4 + $0xf58] sm:$0xff]  ;;  %2177 = vst [vmem:[%s2910_s18 + $0xf18] sm:$0xff] %v1409_v9  ;;  %v1415_v21 = vadd.f32 1.0, %v647_v18 }
 0x12f   : > { %2178 = vst [vmem:[%s2910_s18 + $0xf20] sm:$0xff] %v1410_v10  ;;  %2179 = vst [vmem:[%s2910_s18 + $0xf28] sm:$0xff] %v1411_v11  ;;  %v1416_v22 = vadd.f32 1.0, %v648_v19  ;;  %v1417_v23 = vadd.f32 1.0, %v649_v20  ;;  %v650_v24 = vld [vmem:[%s2895_s4 + $0xf60] sm:$0xff]  ;;  %v651_v25 = vld [vmem:[%s2895_s4 + $0xf68] sm:$0xff] }
 0x130   : > { %v652_v26 = vld [vmem:[%s2895_s4 + $0xf70] sm:$0xff]  ;;  %2180 = vst [vmem:[%s2910_s18 + $0xf30] sm:$0xff] %v1412_v15  ;;  %2181 = vst [vmem:[%s2910_s18 + $0xf38] sm:$0xff] %v1413_v16  ;;  %v1418_v27 = vadd.f32 1.0, %v650_v24  ;;  %v1419_v28 = vadd.f32 1.0, %v651_v25  ;;  %v653_v30 = vld [vmem:[%s2895_s4 + $0xf78] sm:$0xff] }
 0x131   : > { %2182 = vst [vmem:[%s2910_s18 + $0xf40] sm:$0xff] %v1414_v17  ;;  %v1420_v29 = vadd.f32 1.0, %v652_v26  ;;  %v654_v31 = vld [vmem:[%s2895_s4 + $0xf80] sm:$0xff]  ;;  %v655_v32 = vld [vmem:[%s2895_s4 + $0xf88] sm:$0xff]  ;;  %2183 = vst [vmem:[%s2910_s18 + $0xf48] sm:$0xff] %v1415_v21  ;;  %v1421_v33 = vadd.f32 1.0, %v653_v30 }
 0x132   : > { %2184 = vst [vmem:[%s2910_s18 + $0xf50] sm:$0xff] %v1416_v22  ;;  %2185 = vst [vmem:[%s2910_s18 + $0xf58] sm:$0xff] %v1417_v23  ;;  %v1422_v34 = vadd.f32 1.0, %v654_v31  ;;  %v1423_v35 = vadd.f32 1.0, %v655_v32  ;;  %v656_v36 = vld [vmem:[%s2895_s4 + $0xf90] sm:$0xff]  ;;  %v657_v37 = vld [vmem:[%s2895_s4 + $0xf98] sm:$0xff] }
 0x133   : > { %v658_v38 = vld [vmem:[%s2895_s4 + $0xfa0] sm:$0xff]  ;;  %2186 = vst [vmem:[%s2910_s18 + $0xf60] sm:$0xff] %v1418_v27  ;;  %2187 = vst [vmem:[%s2910_s18 + $0xf68] sm:$0xff] %v1419_v28  ;;  %v1424_v39 = vadd.f32 1.0, %v656_v36  ;;  %v1425_v40 = vadd.f32 1.0, %v657_v37  ;;  %v659_v42 = vld [vmem:[%s2895_s4 + $0xfa8] sm:$0xff] }
 0x134   : > { %2188 = vst [vmem:[%s2910_s18 + $0xf70] sm:$0xff] %v1420_v29  ;;  %v1426_v41 = vadd.f32 1.0, %v658_v38  ;;  %v660_v43 = vld [vmem:[%s2895_s4 + $0xfb0] sm:$0xff]  ;;  %v661_v44 = vld [vmem:[%s2895_s4 + $0xfb8] sm:$0xff]  ;;  %2189 = vst [vmem:[%s2910_s18 + $0xf78] sm:$0xff] %v1421_v33  ;;  %v1427_v45 = vadd.f32 1.0, %v659_v42 }
 0x135   : > { %2190 = vst [vmem:[%s2910_s18 + $0xf80] sm:$0xff] %v1422_v34  ;;  %2191 = vst [vmem:[%s2910_s18 + $0xf88] sm:$0xff] %v1423_v35  ;;  %v1428_v46 = vadd.f32 1.0, %v660_v43  ;;  %v1429_v47 = vadd.f32 1.0, %v661_v44  ;;  %v662_v48 = vld [vmem:[%s2895_s4 + $0xfc0] sm:$0xff]  ;;  %v663_v49 = vld [vmem:[%s2895_s4 + $0xfc8] sm:$0xff] }
 0x136   : > { %v664_v50 = vld [vmem:[%s2895_s4 + $0xfd0] sm:$0xff]  ;;  %2192 = vst [vmem:[%s2910_s18 + $0xf90] sm:$0xff] %v1424_v39  ;;  %2193 = vst [vmem:[%s2910_s18 + $0xf98] sm:$0xff] %v1425_v40  ;;  %v1430_v51 = vadd.f32 1.0, %v662_v48  ;;  %v1431_v52 = vadd.f32 1.0, %v663_v49  ;;  %v665_v54 = vld [vmem:[%s2895_s4 + $0xfd8] sm:$0xff] }
 0x137   : > { %2194 = vst [vmem:[%s2910_s18 + $0xfa0] sm:$0xff] %v1426_v41  ;;  %v1432_v53 = vadd.f32 1.0, %v664_v50  ;;  %v666_v55 = vld [vmem:[%s2895_s4 + $0xfe0] sm:$0xff]  ;;  %v667_v56 = vld [vmem:[%s2895_s4 + $0xfe8] sm:$0xff]  ;;  %2195 = vst [vmem:[%s2910_s18 + $0xfa8] sm:$0xff] %v1427_v45  ;;  %v1433_v57 = vadd.f32 1.0, %v665_v54 }
 0x138   : > { %2196 = vst [vmem:[%s2910_s18 + $0xfb0] sm:$0xff] %v1428_v46  ;;  %2197 = vst [vmem:[%s2910_s18 + $0xfb8] sm:$0xff] %v1429_v47  ;;  %v1434_v58 = vadd.f32 1.0, %v666_v55  ;;  %v1435_v59 = vadd.f32 1.0, %v667_v56  ;;  %v668_v60 = vld [vmem:[%s2895_s4 + $0xff0] sm:$0xff]  ;;  %v669_v61 = vld [vmem:[%s2895_s4 + $0xff8] sm:$0xff] }
 0x139   : > { %v670_v62 = vld [vmem:[%s2895_s4 + $0x1000] sm:$0xff]  ;;  %2198 = vst [vmem:[%s2910_s18 + $0xfc0] sm:$0xff] %v1430_v51  ;;  %2199 = vst [vmem:[%s2910_s18 + $0xfc8] sm:$0xff] %v1431_v52  ;;  %v1436_v63 = vadd.f32 1.0, %v668_v60  ;;  %v1437_v0 = vadd.f32 1.0, %v669_v61  ;;  %v671_v2 = vld [vmem:[%s2895_s4 + $0x1008] sm:$0xff] }
 0x13a   : > { %2200 = vst [vmem:[%s2910_s18 + $0xfd0] sm:$0xff] %v1432_v53  ;;  %v1438_v1 = vadd.f32 1.0, %v670_v62  ;;  %v672_v3 = vld [vmem:[%s2895_s4 + $0x1010] sm:$0xff]  ;;  %v673_v4 = vld [vmem:[%s2895_s4 + $0x1018] sm:$0xff]  ;;  %2201 = vst [vmem:[%s2910_s18 + $0xfd8] sm:$0xff] %v1433_v57  ;;  %v1439_v5 = vadd.f32 1.0, %v671_v2 }
 0x13b   : > { %2202 = vst [vmem:[%s2910_s18 + $0xfe0] sm:$0xff] %v1434_v58  ;;  %2203 = vst [vmem:[%s2910_s18 + $0xfe8] sm:$0xff] %v1435_v59  ;;  %v1440_v6 = vadd.f32 1.0, %v672_v3  ;;  %v1441_v7 = vadd.f32 1.0, %v673_v4  ;;  %v674_v8 = vld [vmem:[%s2895_s4 + $0x1020] sm:$0xff]  ;;  %v675_v9 = vld [vmem:[%s2895_s4 + $0x1028] sm:$0xff] }
 0x13c   : > { %v676_v10 = vld [vmem:[%s2895_s4 + $0x1030] sm:$0xff]  ;;  %2204 = vst [vmem:[%s2910_s18 + $0xff0] sm:$0xff] %v1436_v63  ;;  %2205 = vst [vmem:[%s2910_s18 + $0xff8] sm:$0xff] %v1437_v0  ;;  %v1442_v11 = vadd.f32 1.0, %v674_v8  ;;  %v1443_v12 = vadd.f32 1.0, %v675_v9  ;;  %v677_v14 = vld [vmem:[%s2895_s4 + $0x1038] sm:$0xff] }
 0x13d   : > { %2206 = vst [vmem:[%s2910_s18 + $0x1000] sm:$0xff] %v1438_v1  ;;  %v1444_v13 = vadd.f32 1.0, %v676_v10  ;;  %v678_v15 = vld [vmem:[%s2895_s4 + $0x1040] sm:$0xff]  ;;  %v679_v16 = vld [vmem:[%s2895_s4 + $0x1048] sm:$0xff]  ;;  %2207 = vst [vmem:[%s2910_s18 + $0x1008] sm:$0xff] %v1439_v5  ;;  %v1445_v17 = vadd.f32 1.0, %v677_v14 }
 0x13e   : > { %2208 = vst [vmem:[%s2910_s18 + $0x1010] sm:$0xff] %v1440_v6  ;;  %2209 = vst [vmem:[%s2910_s18 + $0x1018] sm:$0xff] %v1441_v7  ;;  %v1446_v18 = vadd.f32 1.0, %v678_v15  ;;  %v1447_v19 = vadd.f32 1.0, %v679_v16  ;;  %v680_v20 = vld [vmem:[%s2895_s4 + $0x1050] sm:$0xff]  ;;  %v681_v21 = vld [vmem:[%s2895_s4 + $0x1058] sm:$0xff] }
 0x13f   : > { %v682_v22 = vld [vmem:[%s2895_s4 + $0x1060] sm:$0xff]  ;;  %2210 = vst [vmem:[%s2910_s18 + $0x1020] sm:$0xff] %v1442_v11  ;;  %2211 = vst [vmem:[%s2910_s18 + $0x1028] sm:$0xff] %v1443_v12  ;;  %v1448_v23 = vadd.f32 1.0, %v680_v20  ;;  %v1449_v24 = vadd.f32 1.0, %v681_v21  ;;  %v683_v26 = vld [vmem:[%s2895_s4 + $0x1068] sm:$0xff] }
 0x140   : > { %2212 = vst [vmem:[%s2910_s18 + $0x1030] sm:$0xff] %v1444_v13  ;;  %v1450_v25 = vadd.f32 1.0, %v682_v22  ;;  %v684_v27 = vld [vmem:[%s2895_s4 + $0x1070] sm:$0xff]  ;;  %v685_v28 = vld [vmem:[%s2895_s4 + $0x1078] sm:$0xff]  ;;  %2213 = vst [vmem:[%s2910_s18 + $0x1038] sm:$0xff] %v1445_v17  ;;  %v1451_v29 = vadd.f32 1.0, %v683_v26 }
 0x141   : > { %2214 = vst [vmem:[%s2910_s18 + $0x1040] sm:$0xff] %v1446_v18  ;;  %2215 = vst [vmem:[%s2910_s18 + $0x1048] sm:$0xff] %v1447_v19  ;;  %v1452_v30 = vadd.f32 1.0, %v684_v27  ;;  %v1453_v31 = vadd.f32 1.0, %v685_v28  ;;  %v686_v32 = vld [vmem:[%s2895_s4 + $0x1080] sm:$0xff]  ;;  %v687_v33 = vld [vmem:[%s2895_s4 + $0x1088] sm:$0xff] }
 0x142   : > { %v688_v34 = vld [vmem:[%s2895_s4 + $0x1090] sm:$0xff]  ;;  %2216 = vst [vmem:[%s2910_s18 + $0x1050] sm:$0xff] %v1448_v23  ;;  %2217 = vst [vmem:[%s2910_s18 + $0x1058] sm:$0xff] %v1449_v24  ;;  %v1454_v35 = vadd.f32 1.0, %v686_v32  ;;  %v1455_v36 = vadd.f32 1.0, %v687_v33  ;;  %v689_v38 = vld [vmem:[%s2895_s4 + $0x1098] sm:$0xff] }
 0x143   : > { %2218 = vst [vmem:[%s2910_s18 + $0x1060] sm:$0xff] %v1450_v25  ;;  %v1456_v37 = vadd.f32 1.0, %v688_v34  ;;  %v690_v39 = vld [vmem:[%s2895_s4 + $0x10a0] sm:$0xff]  ;;  %v691_v40 = vld [vmem:[%s2895_s4 + $0x10a8] sm:$0xff]  ;;  %2219 = vst [vmem:[%s2910_s18 + $0x1068] sm:$0xff] %v1451_v29  ;;  %v1457_v41 = vadd.f32 1.0, %v689_v38 }
 0x144   : > { %2220 = vst [vmem:[%s2910_s18 + $0x1070] sm:$0xff] %v1452_v30  ;;  %2221 = vst [vmem:[%s2910_s18 + $0x1078] sm:$0xff] %v1453_v31  ;;  %v1458_v42 = vadd.f32 1.0, %v690_v39  ;;  %v1459_v43 = vadd.f32 1.0, %v691_v40  ;;  %v692_v44 = vld [vmem:[%s2895_s4 + $0x10b0] sm:$0xff]  ;;  %v693_v45 = vld [vmem:[%s2895_s4 + $0x10b8] sm:$0xff] }
 0x145   : > { %v694_v46 = vld [vmem:[%s2895_s4 + $0x10c0] sm:$0xff]  ;;  %2222 = vst [vmem:[%s2910_s18 + $0x1080] sm:$0xff] %v1454_v35  ;;  %2223 = vst [vmem:[%s2910_s18 + $0x1088] sm:$0xff] %v1455_v36  ;;  %v1460_v47 = vadd.f32 1.0, %v692_v44  ;;  %v1461_v48 = vadd.f32 1.0, %v693_v45  ;;  %v695_v50 = vld [vmem:[%s2895_s4 + $0x10c8] sm:$0xff] }
 0x146   : > { %2224 = vst [vmem:[%s2910_s18 + $0x1090] sm:$0xff] %v1456_v37  ;;  %v1462_v49 = vadd.f32 1.0, %v694_v46  ;;  %v696_v51 = vld [vmem:[%s2895_s4 + $0x10d0] sm:$0xff]  ;;  %v697_v52 = vld [vmem:[%s2895_s4 + $0x10d8] sm:$0xff]  ;;  %2225 = vst [vmem:[%s2910_s18 + $0x1098] sm:$0xff] %v1457_v41  ;;  %v1463_v53 = vadd.f32 1.0, %v695_v50 }
 0x147   : > { %2226 = vst [vmem:[%s2910_s18 + $0x10a0] sm:$0xff] %v1458_v42  ;;  %2227 = vst [vmem:[%s2910_s18 + $0x10a8] sm:$0xff] %v1459_v43  ;;  %v1464_v54 = vadd.f32 1.0, %v696_v51  ;;  %v1465_v55 = vadd.f32 1.0, %v697_v52  ;;  %v698_v56 = vld [vmem:[%s2895_s4 + $0x10e0] sm:$0xff]  ;;  %v699_v57 = vld [vmem:[%s2895_s4 + $0x10e8] sm:$0xff] }
 0x148   : > { %v700_v58 = vld [vmem:[%s2895_s4 + $0x10f0] sm:$0xff]  ;;  %2228 = vst [vmem:[%s2910_s18 + $0x10b0] sm:$0xff] %v1460_v47  ;;  %2229 = vst [vmem:[%s2910_s18 + $0x10b8] sm:$0xff] %v1461_v48  ;;  %v1466_v59 = vadd.f32 1.0, %v698_v56  ;;  %v1467_v60 = vadd.f32 1.0, %v699_v57  ;;  %v701_v62 = vld [vmem:[%s2895_s4 + $0x10f8] sm:$0xff] }
 0x149   : > { %2230 = vst [vmem:[%s2910_s18 + $0x10c0] sm:$0xff] %v1462_v49  ;;  %v1468_v61 = vadd.f32 1.0, %v700_v58  ;;  %v702_v63 = vld [vmem:[%s2895_s4 + $0x1100] sm:$0xff]  ;;  %v703_v0 = vld [vmem:[%s2895_s4 + $0x1108] sm:$0xff]  ;;  %2231 = vst [vmem:[%s2910_s18 + $0x10c8] sm:$0xff] %v1463_v53  ;;  %v1469_v1 = vadd.f32 1.0, %v701_v62 }
 0x14a   : > { %2232 = vst [vmem:[%s2910_s18 + $0x10d0] sm:$0xff] %v1464_v54  ;;  %2233 = vst [vmem:[%s2910_s18 + $0x10d8] sm:$0xff] %v1465_v55  ;;  %v1470_v2 = vadd.f32 1.0, %v702_v63  ;;  %v1471_v3 = vadd.f32 1.0, %v703_v0  ;;  %v704_v4 = vld [vmem:[%s2895_s4 + $0x1110] sm:$0xff]  ;;  %v705_v5 = vld [vmem:[%s2895_s4 + $0x1118] sm:$0xff] }
 0x14b   : > { %v706_v6 = vld [vmem:[%s2895_s4 + $0x1120] sm:$0xff]  ;;  %2234 = vst [vmem:[%s2910_s18 + $0x10e0] sm:$0xff] %v1466_v59  ;;  %2235 = vst [vmem:[%s2910_s18 + $0x10e8] sm:$0xff] %v1467_v60  ;;  %v1472_v7 = vadd.f32 1.0, %v704_v4  ;;  %v1473_v8 = vadd.f32 1.0, %v705_v5  ;;  %v707_v10 = vld [vmem:[%s2895_s4 + $0x1128] sm:$0xff] }
 0x14c   : > { %2236 = vst [vmem:[%s2910_s18 + $0x10f0] sm:$0xff] %v1468_v61  ;;  %v1474_v9 = vadd.f32 1.0, %v706_v6  ;;  %v708_v11 = vld [vmem:[%s2895_s4 + $0x1130] sm:$0xff]  ;;  %v709_v12 = vld [vmem:[%s2895_s4 + $0x1138] sm:$0xff]  ;;  %2237 = vst [vmem:[%s2910_s18 + $0x10f8] sm:$0xff] %v1469_v1  ;;  %v1475_v13 = vadd.f32 1.0, %v707_v10 }
 0x14d   : > { %2238 = vst [vmem:[%s2910_s18 + $0x1100] sm:$0xff] %v1470_v2  ;;  %2239 = vst [vmem:[%s2910_s18 + $0x1108] sm:$0xff] %v1471_v3  ;;  %v1476_v14 = vadd.f32 1.0, %v708_v11  ;;  %v1477_v15 = vadd.f32 1.0, %v709_v12  ;;  %v710_v16 = vld [vmem:[%s2895_s4 + $0x1140] sm:$0xff]  ;;  %v711_v17 = vld [vmem:[%s2895_s4 + $0x1148] sm:$0xff] }
 0x14e   : > { %v712_v18 = vld [vmem:[%s2895_s4 + $0x1150] sm:$0xff]  ;;  %2240 = vst [vmem:[%s2910_s18 + $0x1110] sm:$0xff] %v1472_v7  ;;  %2241 = vst [vmem:[%s2910_s18 + $0x1118] sm:$0xff] %v1473_v8  ;;  %v1478_v19 = vadd.f32 1.0, %v710_v16  ;;  %v1479_v20 = vadd.f32 1.0, %v711_v17  ;;  %v713_v22 = vld [vmem:[%s2895_s4 + $0x1158] sm:$0xff] }
 0x14f   : > { %2242 = vst [vmem:[%s2910_s18 + $0x1120] sm:$0xff] %v1474_v9  ;;  %v1480_v21 = vadd.f32 1.0, %v712_v18  ;;  %v714_v23 = vld [vmem:[%s2895_s4 + $0x1160] sm:$0xff]  ;;  %v715_v24 = vld [vmem:[%s2895_s4 + $0x1168] sm:$0xff]  ;;  %2243 = vst [vmem:[%s2910_s18 + $0x1128] sm:$0xff] %v1475_v13  ;;  %v1481_v25 = vadd.f32 1.0, %v713_v22 }
 0x150   : > { %2244 = vst [vmem:[%s2910_s18 + $0x1130] sm:$0xff] %v1476_v14  ;;  %2245 = vst [vmem:[%s2910_s18 + $0x1138] sm:$0xff] %v1477_v15  ;;  %v1482_v26 = vadd.f32 1.0, %v714_v23  ;;  %v1483_v27 = vadd.f32 1.0, %v715_v24  ;;  %v716_v28 = vld [vmem:[%s2895_s4 + $0x1170] sm:$0xff]  ;;  %v717_v29 = vld [vmem:[%s2895_s4 + $0x1178] sm:$0xff] }
 0x151   : > { %v718_v30 = vld [vmem:[%s2895_s4 + $0x1180] sm:$0xff]  ;;  %2246 = vst [vmem:[%s2910_s18 + $0x1140] sm:$0xff] %v1478_v19  ;;  %2247 = vst [vmem:[%s2910_s18 + $0x1148] sm:$0xff] %v1479_v20  ;;  %v1484_v31 = vadd.f32 1.0, %v716_v28  ;;  %v1485_v32 = vadd.f32 1.0, %v717_v29  ;;  %v719_v34 = vld [vmem:[%s2895_s4 + $0x1188] sm:$0xff] }
 0x152   : > { %2248 = vst [vmem:[%s2910_s18 + $0x1150] sm:$0xff] %v1480_v21  ;;  %v1486_v33 = vadd.f32 1.0, %v718_v30  ;;  %v720_v35 = vld [vmem:[%s2895_s4 + $0x1190] sm:$0xff]  ;;  %v721_v36 = vld [vmem:[%s2895_s4 + $0x1198] sm:$0xff]  ;;  %2249 = vst [vmem:[%s2910_s18 + $0x1158] sm:$0xff] %v1481_v25  ;;  %v1487_v37 = vadd.f32 1.0, %v719_v34 }
 0x153   : > { %2250 = vst [vmem:[%s2910_s18 + $0x1160] sm:$0xff] %v1482_v26  ;;  %2251 = vst [vmem:[%s2910_s18 + $0x1168] sm:$0xff] %v1483_v27  ;;  %v1488_v38 = vadd.f32 1.0, %v720_v35  ;;  %v1489_v39 = vadd.f32 1.0, %v721_v36  ;;  %v722_v40 = vld [vmem:[%s2895_s4 + $0x11a0] sm:$0xff]  ;;  %v723_v41 = vld [vmem:[%s2895_s4 + $0x11a8] sm:$0xff] }
 0x154   : > { %v724_v42 = vld [vmem:[%s2895_s4 + $0x11b0] sm:$0xff]  ;;  %2252 = vst [vmem:[%s2910_s18 + $0x1170] sm:$0xff] %v1484_v31  ;;  %2253 = vst [vmem:[%s2910_s18 + $0x1178] sm:$0xff] %v1485_v32  ;;  %v1490_v43 = vadd.f32 1.0, %v722_v40  ;;  %v1491_v44 = vadd.f32 1.0, %v723_v41  ;;  %v725_v46 = vld [vmem:[%s2895_s4 + $0x11b8] sm:$0xff] }
 0x155   : > { %2254 = vst [vmem:[%s2910_s18 + $0x1180] sm:$0xff] %v1486_v33  ;;  %v1492_v45 = vadd.f32 1.0, %v724_v42  ;;  %v726_v47 = vld [vmem:[%s2895_s4 + $0x11c0] sm:$0xff]  ;;  %v727_v48 = vld [vmem:[%s2895_s4 + $0x11c8] sm:$0xff]  ;;  %2255 = vst [vmem:[%s2910_s18 + $0x1188] sm:$0xff] %v1487_v37  ;;  %v1493_v49 = vadd.f32 1.0, %v725_v46 }
 0x156   : > { %2256 = vst [vmem:[%s2910_s18 + $0x1190] sm:$0xff] %v1488_v38  ;;  %2257 = vst [vmem:[%s2910_s18 + $0x1198] sm:$0xff] %v1489_v39  ;;  %v1494_v50 = vadd.f32 1.0, %v726_v47  ;;  %v1495_v51 = vadd.f32 1.0, %v727_v48  ;;  %v728_v52 = vld [vmem:[%s2895_s4 + $0x11d0] sm:$0xff]  ;;  %v729_v53 = vld [vmem:[%s2895_s4 + $0x11d8] sm:$0xff] }
 0x157   : > { %v730_v54 = vld [vmem:[%s2895_s4 + $0x11e0] sm:$0xff]  ;;  %2258 = vst [vmem:[%s2910_s18 + $0x11a0] sm:$0xff] %v1490_v43  ;;  %2259 = vst [vmem:[%s2910_s18 + $0x11a8] sm:$0xff] %v1491_v44  ;;  %v1496_v55 = vadd.f32 1.0, %v728_v52  ;;  %v1497_v56 = vadd.f32 1.0, %v729_v53  ;;  %v731_v58 = vld [vmem:[%s2895_s4 + $0x11e8] sm:$0xff] }
 0x158   : > { %2260 = vst [vmem:[%s2910_s18 + $0x11b0] sm:$0xff] %v1492_v45  ;;  %v1498_v57 = vadd.f32 1.0, %v730_v54  ;;  %v732_v59 = vld [vmem:[%s2895_s4 + $0x11f0] sm:$0xff]  ;;  %v733_v60 = vld [vmem:[%s2895_s4 + $0x11f8] sm:$0xff]  ;;  %2261 = vst [vmem:[%s2910_s18 + $0x11b8] sm:$0xff] %v1493_v49  ;;  %v1499_v61 = vadd.f32 1.0, %v731_v58 }
 0x159   : > { %2262 = vst [vmem:[%s2910_s18 + $0x11c0] sm:$0xff] %v1494_v50  ;;  %2263 = vst [vmem:[%s2910_s18 + $0x11c8] sm:$0xff] %v1495_v51  ;;  %v1500_v62 = vadd.f32 1.0, %v732_v59  ;;  %v1501_v63 = vadd.f32 1.0, %v733_v60  ;;  %v734_v0 = vld [vmem:[%s2895_s4 + $0x1200] sm:$0xff]  ;;  %v735_v1 = vld [vmem:[%s2895_s4 + $0x1208] sm:$0xff] }
 0x15a   : > { %v736_v2 = vld [vmem:[%s2895_s4 + $0x1210] sm:$0xff]  ;;  %2264 = vst [vmem:[%s2910_s18 + $0x11d0] sm:$0xff] %v1496_v55  ;;  %2265 = vst [vmem:[%s2910_s18 + $0x11d8] sm:$0xff] %v1497_v56  ;;  %v1502_v3 = vadd.f32 1.0, %v734_v0  ;;  %v1503_v4 = vadd.f32 1.0, %v735_v1  ;;  %v737_v6 = vld [vmem:[%s2895_s4 + $0x1218] sm:$0xff] }
 0x15b   : > { %2266 = vst [vmem:[%s2910_s18 + $0x11e0] sm:$0xff] %v1498_v57  ;;  %v1504_v5 = vadd.f32 1.0, %v736_v2  ;;  %v738_v7 = vld [vmem:[%s2895_s4 + $0x1220] sm:$0xff]  ;;  %v739_v8 = vld [vmem:[%s2895_s4 + $0x1228] sm:$0xff]  ;;  %2267 = vst [vmem:[%s2910_s18 + $0x11e8] sm:$0xff] %v1499_v61  ;;  %v1505_v9 = vadd.f32 1.0, %v737_v6 }
 0x15c   : > { %2268 = vst [vmem:[%s2910_s18 + $0x11f0] sm:$0xff] %v1500_v62  ;;  %2269 = vst [vmem:[%s2910_s18 + $0x11f8] sm:$0xff] %v1501_v63  ;;  %v1506_v10 = vadd.f32 1.0, %v738_v7  ;;  %v1507_v11 = vadd.f32 1.0, %v739_v8  ;;  %v740_v12 = vld [vmem:[%s2895_s4 + $0x1230] sm:$0xff]  ;;  %v741_v13 = vld [vmem:[%s2895_s4 + $0x1238] sm:$0xff] }
 0x15d   : > { %v742_v14 = vld [vmem:[%s2895_s4 + $0x1240] sm:$0xff]  ;;  %2270 = vst [vmem:[%s2910_s18 + $0x1200] sm:$0xff] %v1502_v3  ;;  %2271 = vst [vmem:[%s2910_s18 + $0x1208] sm:$0xff] %v1503_v4  ;;  %v1508_v15 = vadd.f32 1.0, %v740_v12  ;;  %v1509_v16 = vadd.f32 1.0, %v741_v13  ;;  %v743_v18 = vld [vmem:[%s2895_s4 + $0x1248] sm:$0xff] }
 0x15e   : > { %2272 = vst [vmem:[%s2910_s18 + $0x1210] sm:$0xff] %v1504_v5  ;;  %v1510_v17 = vadd.f32 1.0, %v742_v14  ;;  %v744_v19 = vld [vmem:[%s2895_s4 + $0x1250] sm:$0xff]  ;;  %v745_v20 = vld [vmem:[%s2895_s4 + $0x1258] sm:$0xff]  ;;  %2273 = vst [vmem:[%s2910_s18 + $0x1218] sm:$0xff] %v1505_v9  ;;  %v1511_v21 = vadd.f32 1.0, %v743_v18 }
 0x15f   : > { %2274 = vst [vmem:[%s2910_s18 + $0x1220] sm:$0xff] %v1506_v10  ;;  %2275 = vst [vmem:[%s2910_s18 + $0x1228] sm:$0xff] %v1507_v11  ;;  %v1512_v22 = vadd.f32 1.0, %v744_v19  ;;  %v1513_v23 = vadd.f32 1.0, %v745_v20  ;;  %v746_v24 = vld [vmem:[%s2895_s4 + $0x1260] sm:$0xff]  ;;  %v747_v25 = vld [vmem:[%s2895_s4 + $0x1268] sm:$0xff] }
 0x160   : > { %v748_v26 = vld [vmem:[%s2895_s4 + $0x1270] sm:$0xff]  ;;  %2276 = vst [vmem:[%s2910_s18 + $0x1230] sm:$0xff] %v1508_v15  ;;  %2277 = vst [vmem:[%s2910_s18 + $0x1238] sm:$0xff] %v1509_v16  ;;  %v1514_v27 = vadd.f32 1.0, %v746_v24  ;;  %v1515_v28 = vadd.f32 1.0, %v747_v25  ;;  %v749_v30 = vld [vmem:[%s2895_s4 + $0x1278] sm:$0xff] }
 0x161   : > { %2278 = vst [vmem:[%s2910_s18 + $0x1240] sm:$0xff] %v1510_v17  ;;  %v1516_v29 = vadd.f32 1.0, %v748_v26  ;;  %v750_v31 = vld [vmem:[%s2895_s4 + $0x1280] sm:$0xff]  ;;  %v751_v32 = vld [vmem:[%s2895_s4 + $0x1288] sm:$0xff]  ;;  %2279 = vst [vmem:[%s2910_s18 + $0x1248] sm:$0xff] %v1511_v21  ;;  %v1517_v33 = vadd.f32 1.0, %v749_v30 }
 0x162   : > { %2280 = vst [vmem:[%s2910_s18 + $0x1250] sm:$0xff] %v1512_v22  ;;  %2281 = vst [vmem:[%s2910_s18 + $0x1258] sm:$0xff] %v1513_v23  ;;  %v1518_v34 = vadd.f32 1.0, %v750_v31  ;;  %v1519_v35 = vadd.f32 1.0, %v751_v32  ;;  %v752_v36 = vld [vmem:[%s2895_s4 + $0x1290] sm:$0xff]  ;;  %v753_v37 = vld [vmem:[%s2895_s4 + $0x1298] sm:$0xff] }
 0x163   : > { %v754_v38 = vld [vmem:[%s2895_s4 + $0x12a0] sm:$0xff]  ;;  %2282 = vst [vmem:[%s2910_s18 + $0x1260] sm:$0xff] %v1514_v27  ;;  %2283 = vst [vmem:[%s2910_s18 + $0x1268] sm:$0xff] %v1515_v28  ;;  %v1520_v39 = vadd.f32 1.0, %v752_v36  ;;  %v1521_v40 = vadd.f32 1.0, %v753_v37  ;;  %v755_v42 = vld [vmem:[%s2895_s4 + $0x12a8] sm:$0xff] }
 0x164   : > { %2284 = vst [vmem:[%s2910_s18 + $0x1270] sm:$0xff] %v1516_v29  ;;  %v1522_v41 = vadd.f32 1.0, %v754_v38  ;;  %v756_v43 = vld [vmem:[%s2895_s4 + $0x12b0] sm:$0xff]  ;;  %v757_v44 = vld [vmem:[%s2895_s4 + $0x12b8] sm:$0xff]  ;;  %2285 = vst [vmem:[%s2910_s18 + $0x1278] sm:$0xff] %v1517_v33  ;;  %v1523_v45 = vadd.f32 1.0, %v755_v42 }
 0x165   : > { %2286 = vst [vmem:[%s2910_s18 + $0x1280] sm:$0xff] %v1518_v34  ;;  %2287 = vst [vmem:[%s2910_s18 + $0x1288] sm:$0xff] %v1519_v35  ;;  %v1524_v46 = vadd.f32 1.0, %v756_v43  ;;  %v1525_v47 = vadd.f32 1.0, %v757_v44  ;;  %v758_v48 = vld [vmem:[%s2895_s4 + $0x12c0] sm:$0xff]  ;;  %v759_v49 = vld [vmem:[%s2895_s4 + $0x12c8] sm:$0xff] }
 0x166   : > { %v760_v50 = vld [vmem:[%s2895_s4 + $0x12d0] sm:$0xff]  ;;  %2288 = vst [vmem:[%s2910_s18 + $0x1290] sm:$0xff] %v1520_v39  ;;  %2289 = vst [vmem:[%s2910_s18 + $0x1298] sm:$0xff] %v1521_v40  ;;  %v1526_v51 = vadd.f32 1.0, %v758_v48  ;;  %v1527_v52 = vadd.f32 1.0, %v759_v49  ;;  %v761_v54 = vld [vmem:[%s2895_s4 + $0x12d8] sm:$0xff] }
 0x167   : > { %2290 = vst [vmem:[%s2910_s18 + $0x12a0] sm:$0xff] %v1522_v41  ;;  %v1528_v53 = vadd.f32 1.0, %v760_v50  ;;  %v762_v55 = vld [vmem:[%s2895_s4 + $0x12e0] sm:$0xff]  ;;  %v763_v56 = vld [vmem:[%s2895_s4 + $0x12e8] sm:$0xff]  ;;  %2291 = vst [vmem:[%s2910_s18 + $0x12a8] sm:$0xff] %v1523_v45  ;;  %v1529_v57 = vadd.f32 1.0, %v761_v54 }
 0x168   : > { %2292 = vst [vmem:[%s2910_s18 + $0x12b0] sm:$0xff] %v1524_v46  ;;  %2293 = vst [vmem:[%s2910_s18 + $0x12b8] sm:$0xff] %v1525_v47  ;;  %v1530_v58 = vadd.f32 1.0, %v762_v55  ;;  %v1531_v59 = vadd.f32 1.0, %v763_v56  ;;  %v764_v60 = vld [vmem:[%s2895_s4 + $0x12f0] sm:$0xff]  ;;  %v765_v61 = vld [vmem:[%s2895_s4 + $0x12f8] sm:$0xff] }
 0x169   : > { %v766_v62 = vld [vmem:[%s2895_s4 + $0x1300] sm:$0xff]  ;;  %2294 = vst [vmem:[%s2910_s18 + $0x12c0] sm:$0xff] %v1526_v51  ;;  %2295 = vst [vmem:[%s2910_s18 + $0x12c8] sm:$0xff] %v1527_v52  ;;  %v1532_v63 = vadd.f32 1.0, %v764_v60  ;;  %v1533_v0 = vadd.f32 1.0, %v765_v61  ;;  %v767_v2 = vld [vmem:[%s2895_s4 + $0x1308] sm:$0xff] }
 0x16a   : > { %2296 = vst [vmem:[%s2910_s18 + $0x12d0] sm:$0xff] %v1528_v53  ;;  %v1534_v1 = vadd.f32 1.0, %v766_v62  ;;  %v768_v3 = vld [vmem:[%s2895_s4 + $0x1310] sm:$0xff]  ;;  %v769_v4 = vld [vmem:[%s2895_s4 + $0x1318] sm:$0xff]  ;;  %2297 = vst [vmem:[%s2910_s18 + $0x12d8] sm:$0xff] %v1529_v57  ;;  %v1535_v5 = vadd.f32 1.0, %v767_v2 }
 0x16b   : > { %2298 = vst [vmem:[%s2910_s18 + $0x12e0] sm:$0xff] %v1530_v58  ;;  %2299 = vst [vmem:[%s2910_s18 + $0x12e8] sm:$0xff] %v1531_v59  ;;  %v1536_v6 = vadd.f32 1.0, %v768_v3  ;;  %v1537_v7 = vadd.f32 1.0, %v769_v4  ;;  %v770_v8 = vld [vmem:[%s2895_s4 + $0x1320] sm:$0xff]  ;;  %v771_v9 = vld [vmem:[%s2895_s4 + $0x1328] sm:$0xff] }
 0x16c   : > { %v772_v10 = vld [vmem:[%s2895_s4 + $0x1330] sm:$0xff]  ;;  %2300 = vst [vmem:[%s2910_s18 + $0x12f0] sm:$0xff] %v1532_v63  ;;  %2301 = vst [vmem:[%s2910_s18 + $0x12f8] sm:$0xff] %v1533_v0  ;;  %v1538_v11 = vadd.f32 1.0, %v770_v8  ;;  %v1539_v12 = vadd.f32 1.0, %v771_v9  ;;  %v773_v14 = vld [vmem:[%s2895_s4 + $0x1338] sm:$0xff] }
 0x16d   : > { %2302 = vst [vmem:[%s2910_s18 + $0x1300] sm:$0xff] %v1534_v1  ;;  %v1540_v13 = vadd.f32 1.0, %v772_v10  ;;  %v774_v15 = vld [vmem:[%s2895_s4 + $0x1340] sm:$0xff]  ;;  %v775_v16 = vld [vmem:[%s2895_s4 + $0x1348] sm:$0xff]  ;;  %2303 = vst [vmem:[%s2910_s18 + $0x1308] sm:$0xff] %v1535_v5  ;;  %v1541_v17 = vadd.f32 1.0, %v773_v14 }
 0x16e   : > { %2304 = vst [vmem:[%s2910_s18 + $0x1310] sm:$0xff] %v1536_v6  ;;  %2305 = vst [vmem:[%s2910_s18 + $0x1318] sm:$0xff] %v1537_v7  ;;  %v1542_v18 = vadd.f32 1.0, %v774_v15  ;;  %v1543_v19 = vadd.f32 1.0, %v775_v16  ;;  %v776_v20 = vld [vmem:[%s2895_s4 + $0x1350] sm:$0xff]  ;;  %v777_v21 = vld [vmem:[%s2895_s4 + $0x1358] sm:$0xff] }
 0x16f   : > { %v778_v22 = vld [vmem:[%s2895_s4 + $0x1360] sm:$0xff]  ;;  %2306 = vst [vmem:[%s2910_s18 + $0x1320] sm:$0xff] %v1538_v11  ;;  %2307 = vst [vmem:[%s2910_s18 + $0x1328] sm:$0xff] %v1539_v12  ;;  %v1544_v23 = vadd.f32 1.0, %v776_v20  ;;  %v1545_v24 = vadd.f32 1.0, %v777_v21  ;;  %v779_v26 = vld [vmem:[%s2895_s4 + $0x1368] sm:$0xff] }
 0x170   : > { %2308 = vst [vmem:[%s2910_s18 + $0x1330] sm:$0xff] %v1540_v13  ;;  %v1546_v25 = vadd.f32 1.0, %v778_v22  ;;  %v780_v27 = vld [vmem:[%s2895_s4 + $0x1370] sm:$0xff]  ;;  %v781_v28 = vld [vmem:[%s2895_s4 + $0x1378] sm:$0xff]  ;;  %2309 = vst [vmem:[%s2910_s18 + $0x1338] sm:$0xff] %v1541_v17  ;;  %v1547_v29 = vadd.f32 1.0, %v779_v26 }
 0x171   : > { %2310 = vst [vmem:[%s2910_s18 + $0x1340] sm:$0xff] %v1542_v18  ;;  %2311 = vst [vmem:[%s2910_s18 + $0x1348] sm:$0xff] %v1543_v19  ;;  %v1548_v30 = vadd.f32 1.0, %v780_v27  ;;  %v1549_v31 = vadd.f32 1.0, %v781_v28  ;;  %v782_v32 = vld [vmem:[%s2895_s4 + $0x1380] sm:$0xff]  ;;  %v783_v33 = vld [vmem:[%s2895_s4 + $0x1388] sm:$0xff] }
 0x172   : > { %v784_v34 = vld [vmem:[%s2895_s4 + $0x1390] sm:$0xff]  ;;  %2312 = vst [vmem:[%s2910_s18 + $0x1350] sm:$0xff] %v1544_v23  ;;  %2313 = vst [vmem:[%s2910_s18 + $0x1358] sm:$0xff] %v1545_v24  ;;  %v1550_v35 = vadd.f32 1.0, %v782_v32  ;;  %v1551_v36 = vadd.f32 1.0, %v783_v33  ;;  %v785_v38 = vld [vmem:[%s2895_s4 + $0x1398] sm:$0xff] }
 0x173   : > { %2314 = vst [vmem:[%s2910_s18 + $0x1360] sm:$0xff] %v1546_v25  ;;  %v1552_v37 = vadd.f32 1.0, %v784_v34  ;;  %v786_v39 = vld [vmem:[%s2895_s4 + $0x13a0] sm:$0xff]  ;;  %v787_v40 = vld [vmem:[%s2895_s4 + $0x13a8] sm:$0xff]  ;;  %2315 = vst [vmem:[%s2910_s18 + $0x1368] sm:$0xff] %v1547_v29  ;;  %v1553_v41 = vadd.f32 1.0, %v785_v38 }
 0x174   : > { %2316 = vst [vmem:[%s2910_s18 + $0x1370] sm:$0xff] %v1548_v30  ;;  %2317 = vst [vmem:[%s2910_s18 + $0x1378] sm:$0xff] %v1549_v31  ;;  %v1554_v42 = vadd.f32 1.0, %v786_v39  ;;  %v1555_v43 = vadd.f32 1.0, %v787_v40  ;;  %v788_v44 = vld [vmem:[%s2895_s4 + $0x13b0] sm:$0xff]  ;;  %v789_v45 = vld [vmem:[%s2895_s4 + $0x13b8] sm:$0xff] }
 0x175   : > { %v790_v46 = vld [vmem:[%s2895_s4 + $0x13c0] sm:$0xff]  ;;  %2318 = vst [vmem:[%s2910_s18 + $0x1380] sm:$0xff] %v1550_v35  ;;  %2319 = vst [vmem:[%s2910_s18 + $0x1388] sm:$0xff] %v1551_v36  ;;  %v1556_v47 = vadd.f32 1.0, %v788_v44  ;;  %v1557_v48 = vadd.f32 1.0, %v789_v45  ;;  %v791_v50 = vld [vmem:[%s2895_s4 + $0x13c8] sm:$0xff] }
 0x176   : > { %2320 = vst [vmem:[%s2910_s18 + $0x1390] sm:$0xff] %v1552_v37  ;;  %v1558_v49 = vadd.f32 1.0, %v790_v46  ;;  %v792_v51 = vld [vmem:[%s2895_s4 + $0x13d0] sm:$0xff]  ;;  %v793_v52 = vld [vmem:[%s2895_s4 + $0x13d8] sm:$0xff]  ;;  %2321 = vst [vmem:[%s2910_s18 + $0x1398] sm:$0xff] %v1553_v41  ;;  %v1559_v53 = vadd.f32 1.0, %v791_v50 }
 0x177   : > { %2322 = vst [vmem:[%s2910_s18 + $0x13a0] sm:$0xff] %v1554_v42  ;;  %2323 = vst [vmem:[%s2910_s18 + $0x13a8] sm:$0xff] %v1555_v43  ;;  %v1560_v54 = vadd.f32 1.0, %v792_v51  ;;  %v1561_v55 = vadd.f32 1.0, %v793_v52  ;;  %v794_v56 = vld [vmem:[%s2895_s4 + $0x13e0] sm:$0xff]  ;;  %v795_v57 = vld [vmem:[%s2895_s4 + $0x13e8] sm:$0xff] }
 0x178   : > { %v796_v58 = vld [vmem:[%s2895_s4 + $0x13f0] sm:$0xff]  ;;  %2324 = vst [vmem:[%s2910_s18 + $0x13b0] sm:$0xff] %v1556_v47  ;;  %2325 = vst [vmem:[%s2910_s18 + $0x13b8] sm:$0xff] %v1557_v48  ;;  %v1562_v59 = vadd.f32 1.0, %v794_v56  ;;  %v1563_v60 = vadd.f32 1.0, %v795_v57  ;;  %v797_v62 = vld [vmem:[%s2895_s4 + $0x13f8] sm:$0xff] }
 0x179   : > { %2326 = vst [vmem:[%s2910_s18 + $0x13c0] sm:$0xff] %v1558_v49  ;;  %v1564_v61 = vadd.f32 1.0, %v796_v58  ;;  %v798_v63 = vld [vmem:[%s2895_s4 + $0x1400] sm:$0xff]  ;;  %v799_v0 = vld [vmem:[%s2895_s4 + $0x1408] sm:$0xff]  ;;  %2327 = vst [vmem:[%s2910_s18 + $0x13c8] sm:$0xff] %v1559_v53  ;;  %v1565_v1 = vadd.f32 1.0, %v797_v62 }
 0x17a   : > { %2328 = vst [vmem:[%s2910_s18 + $0x13d0] sm:$0xff] %v1560_v54  ;;  %2329 = vst [vmem:[%s2910_s18 + $0x13d8] sm:$0xff] %v1561_v55  ;;  %v1566_v2 = vadd.f32 1.0, %v798_v63  ;;  %v1567_v3 = vadd.f32 1.0, %v799_v0  ;;  %v800_v4 = vld [vmem:[%s2895_s4 + $0x1410] sm:$0xff]  ;;  %v801_v5 = vld [vmem:[%s2895_s4 + $0x1418] sm:$0xff] }
 0x17b   : > { %v802_v6 = vld [vmem:[%s2895_s4 + $0x1420] sm:$0xff]  ;;  %2330 = vst [vmem:[%s2910_s18 + $0x13e0] sm:$0xff] %v1562_v59  ;;  %2331 = vst [vmem:[%s2910_s18 + $0x13e8] sm:$0xff] %v1563_v60  ;;  %v1568_v7 = vadd.f32 1.0, %v800_v4  ;;  %v1569_v8 = vadd.f32 1.0, %v801_v5  ;;  %v803_v10 = vld [vmem:[%s2895_s4 + $0x1428] sm:$0xff] }
 0x17c   : > { %2332 = vst [vmem:[%s2910_s18 + $0x13f0] sm:$0xff] %v1564_v61  ;;  %v1570_v9 = vadd.f32 1.0, %v802_v6  ;;  %v804_v11 = vld [vmem:[%s2895_s4 + $0x1430] sm:$0xff]  ;;  %v805_v12 = vld [vmem:[%s2895_s4 + $0x1438] sm:$0xff]  ;;  %2333 = vst [vmem:[%s2910_s18 + $0x13f8] sm:$0xff] %v1565_v1  ;;  %v1571_v13 = vadd.f32 1.0, %v803_v10 }
 0x17d   : > { %2334 = vst [vmem:[%s2910_s18 + $0x1400] sm:$0xff] %v1566_v2  ;;  %2335 = vst [vmem:[%s2910_s18 + $0x1408] sm:$0xff] %v1567_v3  ;;  %v1572_v14 = vadd.f32 1.0, %v804_v11  ;;  %v1573_v15 = vadd.f32 1.0, %v805_v12  ;;  %v806_v16 = vld [vmem:[%s2895_s4 + $0x1440] sm:$0xff]  ;;  %v807_v17 = vld [vmem:[%s2895_s4 + $0x1448] sm:$0xff] }
 0x17e   : > { %v808_v18 = vld [vmem:[%s2895_s4 + $0x1450] sm:$0xff]  ;;  %2336 = vst [vmem:[%s2910_s18 + $0x1410] sm:$0xff] %v1568_v7  ;;  %2337 = vst [vmem:[%s2910_s18 + $0x1418] sm:$0xff] %v1569_v8  ;;  %v1574_v19 = vadd.f32 1.0, %v806_v16  ;;  %v1575_v20 = vadd.f32 1.0, %v807_v17  ;;  %v809_v22 = vld [vmem:[%s2895_s4 + $0x1458] sm:$0xff] }
 0x17f   : > { %2338 = vst [vmem:[%s2910_s18 + $0x1420] sm:$0xff] %v1570_v9  ;;  %v1576_v21 = vadd.f32 1.0, %v808_v18  ;;  %v810_v23 = vld [vmem:[%s2895_s4 + $0x1460] sm:$0xff]  ;;  %v811_v24 = vld [vmem:[%s2895_s4 + $0x1468] sm:$0xff]  ;;  %2339 = vst [vmem:[%s2910_s18 + $0x1428] sm:$0xff] %v1571_v13  ;;  %v1577_v25 = vadd.f32 1.0, %v809_v22 }
 0x180   : > { %2340 = vst [vmem:[%s2910_s18 + $0x1430] sm:$0xff] %v1572_v14  ;;  %2341 = vst [vmem:[%s2910_s18 + $0x1438] sm:$0xff] %v1573_v15  ;;  %v1578_v26 = vadd.f32 1.0, %v810_v23  ;;  %v1579_v27 = vadd.f32 1.0, %v811_v24  ;;  %v812_v28 = vld [vmem:[%s2895_s4 + $0x1470] sm:$0xff]  ;;  %v813_v29 = vld [vmem:[%s2895_s4 + $0x1478] sm:$0xff] }
 0x181   : > { %v814_v30 = vld [vmem:[%s2895_s4 + $0x1480] sm:$0xff]  ;;  %2342 = vst [vmem:[%s2910_s18 + $0x1440] sm:$0xff] %v1574_v19  ;;  %2343 = vst [vmem:[%s2910_s18 + $0x1448] sm:$0xff] %v1575_v20  ;;  %v1580_v31 = vadd.f32 1.0, %v812_v28  ;;  %v1581_v32 = vadd.f32 1.0, %v813_v29  ;;  %v815_v34 = vld [vmem:[%s2895_s4 + $0x1488] sm:$0xff] }
 0x182   : > { %2344 = vst [vmem:[%s2910_s18 + $0x1450] sm:$0xff] %v1576_v21  ;;  %v1582_v33 = vadd.f32 1.0, %v814_v30  ;;  %v816_v35 = vld [vmem:[%s2895_s4 + $0x1490] sm:$0xff]  ;;  %v817_v36 = vld [vmem:[%s2895_s4 + $0x1498] sm:$0xff]  ;;  %2345 = vst [vmem:[%s2910_s18 + $0x1458] sm:$0xff] %v1577_v25  ;;  %v1583_v37 = vadd.f32 1.0, %v815_v34 }
 0x183   : > { %2346 = vst [vmem:[%s2910_s18 + $0x1460] sm:$0xff] %v1578_v26  ;;  %2347 = vst [vmem:[%s2910_s18 + $0x1468] sm:$0xff] %v1579_v27  ;;  %v1584_v38 = vadd.f32 1.0, %v816_v35  ;;  %v1585_v39 = vadd.f32 1.0, %v817_v36  ;;  %v818_v40 = vld [vmem:[%s2895_s4 + $0x14a0] sm:$0xff]  ;;  %v819_v41 = vld [vmem:[%s2895_s4 + $0x14a8] sm:$0xff] }
 0x184   : > { %v820_v42 = vld [vmem:[%s2895_s4 + $0x14b0] sm:$0xff]  ;;  %2348 = vst [vmem:[%s2910_s18 + $0x1470] sm:$0xff] %v1580_v31  ;;  %2349 = vst [vmem:[%s2910_s18 + $0x1478] sm:$0xff] %v1581_v32  ;;  %v1586_v43 = vadd.f32 1.0, %v818_v40  ;;  %v1587_v44 = vadd.f32 1.0, %v819_v41  ;;  %v821_v46 = vld [vmem:[%s2895_s4 + $0x14b8] sm:$0xff] }
 0x185   : > { %2350 = vst [vmem:[%s2910_s18 + $0x1480] sm:$0xff] %v1582_v33  ;;  %v1588_v45 = vadd.f32 1.0, %v820_v42  ;;  %v822_v47 = vld [vmem:[%s2895_s4 + $0x14c0] sm:$0xff]  ;;  %v823_v48 = vld [vmem:[%s2895_s4 + $0x14c8] sm:$0xff]  ;;  %2351 = vst [vmem:[%s2910_s18 + $0x1488] sm:$0xff] %v1583_v37  ;;  %v1589_v49 = vadd.f32 1.0, %v821_v46 }
 0x186   : > { %2352 = vst [vmem:[%s2910_s18 + $0x1490] sm:$0xff] %v1584_v38  ;;  %2353 = vst [vmem:[%s2910_s18 + $0x1498] sm:$0xff] %v1585_v39  ;;  %v1590_v50 = vadd.f32 1.0, %v822_v47  ;;  %v1591_v51 = vadd.f32 1.0, %v823_v48  ;;  %v824_v52 = vld [vmem:[%s2895_s4 + $0x14d0] sm:$0xff]  ;;  %v825_v53 = vld [vmem:[%s2895_s4 + $0x14d8] sm:$0xff] }
 0x187   : > { %v826_v54 = vld [vmem:[%s2895_s4 + $0x14e0] sm:$0xff]  ;;  %2354 = vst [vmem:[%s2910_s18 + $0x14a0] sm:$0xff] %v1586_v43  ;;  %2355 = vst [vmem:[%s2910_s18 + $0x14a8] sm:$0xff] %v1587_v44  ;;  %v1592_v55 = vadd.f32 1.0, %v824_v52  ;;  %v1593_v56 = vadd.f32 1.0, %v825_v53  ;;  %v827_v58 = vld [vmem:[%s2895_s4 + $0x14e8] sm:$0xff] }
 0x188   : > { %2356 = vst [vmem:[%s2910_s18 + $0x14b0] sm:$0xff] %v1588_v45  ;;  %v1594_v57 = vadd.f32 1.0, %v826_v54  ;;  %v828_v59 = vld [vmem:[%s2895_s4 + $0x14f0] sm:$0xff]  ;;  %v829_v60 = vld [vmem:[%s2895_s4 + $0x14f8] sm:$0xff]  ;;  %2357 = vst [vmem:[%s2910_s18 + $0x14b8] sm:$0xff] %v1589_v49  ;;  %v1595_v61 = vadd.f32 1.0, %v827_v58 }
 0x189   : > { %2358 = vst [vmem:[%s2910_s18 + $0x14c0] sm:$0xff] %v1590_v50  ;;  %2359 = vst [vmem:[%s2910_s18 + $0x14c8] sm:$0xff] %v1591_v51  ;;  %v1596_v62 = vadd.f32 1.0, %v828_v59  ;;  %v1597_v63 = vadd.f32 1.0, %v829_v60  ;;  %v830_v0 = vld [vmem:[%s2895_s4 + $0x1500] sm:$0xff]  ;;  %v831_v1 = vld [vmem:[%s2895_s4 + $0x1508] sm:$0xff] }
 0x18a   : > { %v832_v2 = vld [vmem:[%s2895_s4 + $0x1510] sm:$0xff]  ;;  %2360 = vst [vmem:[%s2910_s18 + $0x14d0] sm:$0xff] %v1592_v55  ;;  %2361 = vst [vmem:[%s2910_s18 + $0x14d8] sm:$0xff] %v1593_v56  ;;  %v1598_v3 = vadd.f32 1.0, %v830_v0  ;;  %v1599_v4 = vadd.f32 1.0, %v831_v1  ;;  %v833_v6 = vld [vmem:[%s2895_s4 + $0x1518] sm:$0xff] }
 0x18b   : > { %2362 = vst [vmem:[%s2910_s18 + $0x14e0] sm:$0xff] %v1594_v57  ;;  %v1600_v5 = vadd.f32 1.0, %v832_v2  ;;  %v834_v7 = vld [vmem:[%s2895_s4 + $0x1520] sm:$0xff]  ;;  %v835_v8 = vld [vmem:[%s2895_s4 + $0x1528] sm:$0xff]  ;;  %2363 = vst [vmem:[%s2910_s18 + $0x14e8] sm:$0xff] %v1595_v61  ;;  %v1601_v9 = vadd.f32 1.0, %v833_v6 }
 0x18c   : > { %2364 = vst [vmem:[%s2910_s18 + $0x14f0] sm:$0xff] %v1596_v62  ;;  %2365 = vst [vmem:[%s2910_s18 + $0x14f8] sm:$0xff] %v1597_v63  ;;  %v1602_v10 = vadd.f32 1.0, %v834_v7  ;;  %v1603_v11 = vadd.f32 1.0, %v835_v8  ;;  %v836_v12 = vld [vmem:[%s2895_s4 + $0x1530] sm:$0xff]  ;;  %v837_v13 = vld [vmem:[%s2895_s4 + $0x1538] sm:$0xff] }
 0x18d   : > { %v838_v14 = vld [vmem:[%s2895_s4 + $0x1540] sm:$0xff]  ;;  %2366 = vst [vmem:[%s2910_s18 + $0x1500] sm:$0xff] %v1598_v3  ;;  %2367 = vst [vmem:[%s2910_s18 + $0x1508] sm:$0xff] %v1599_v4  ;;  %v1604_v15 = vadd.f32 1.0, %v836_v12  ;;  %v1605_v16 = vadd.f32 1.0, %v837_v13  ;;  %v839_v18 = vld [vmem:[%s2895_s4 + $0x1548] sm:$0xff] }
 0x18e   : > { %2368 = vst [vmem:[%s2910_s18 + $0x1510] sm:$0xff] %v1600_v5  ;;  %v1606_v17 = vadd.f32 1.0, %v838_v14  ;;  %v840_v19 = vld [vmem:[%s2895_s4 + $0x1550] sm:$0xff]  ;;  %v841_v20 = vld [vmem:[%s2895_s4 + $0x1558] sm:$0xff]  ;;  %2369 = vst [vmem:[%s2910_s18 + $0x1518] sm:$0xff] %v1601_v9  ;;  %v1607_v21 = vadd.f32 1.0, %v839_v18 }
 0x18f   : > { %2370 = vst [vmem:[%s2910_s18 + $0x1520] sm:$0xff] %v1602_v10  ;;  %2371 = vst [vmem:[%s2910_s18 + $0x1528] sm:$0xff] %v1603_v11  ;;  %v1608_v22 = vadd.f32 1.0, %v840_v19  ;;  %v1609_v23 = vadd.f32 1.0, %v841_v20  ;;  %v842_v24 = vld [vmem:[%s2895_s4 + $0x1560] sm:$0xff]  ;;  %v843_v25 = vld [vmem:[%s2895_s4 + $0x1568] sm:$0xff] }
 0x190   : > { %v844_v26 = vld [vmem:[%s2895_s4 + $0x1570] sm:$0xff]  ;;  %2372 = vst [vmem:[%s2910_s18 + $0x1530] sm:$0xff] %v1604_v15  ;;  %2373 = vst [vmem:[%s2910_s18 + $0x1538] sm:$0xff] %v1605_v16  ;;  %v1610_v27 = vadd.f32 1.0, %v842_v24  ;;  %v1611_v28 = vadd.f32 1.0, %v843_v25  ;;  %v845_v30 = vld [vmem:[%s2895_s4 + $0x1578] sm:$0xff] }
 0x191   : > { %2374 = vst [vmem:[%s2910_s18 + $0x1540] sm:$0xff] %v1606_v17  ;;  %v1612_v29 = vadd.f32 1.0, %v844_v26  ;;  %v846_v31 = vld [vmem:[%s2895_s4 + $0x1580] sm:$0xff]  ;;  %v847_v32 = vld [vmem:[%s2895_s4 + $0x1588] sm:$0xff]  ;;  %2375 = vst [vmem:[%s2910_s18 + $0x1548] sm:$0xff] %v1607_v21  ;;  %v1613_v33 = vadd.f32 1.0, %v845_v30 }
 0x192   : > { %2376 = vst [vmem:[%s2910_s18 + $0x1550] sm:$0xff] %v1608_v22  ;;  %2377 = vst [vmem:[%s2910_s18 + $0x1558] sm:$0xff] %v1609_v23  ;;  %v1614_v34 = vadd.f32 1.0, %v846_v31  ;;  %v1615_v35 = vadd.f32 1.0, %v847_v32  ;;  %v848_v36 = vld [vmem:[%s2895_s4 + $0x1590] sm:$0xff]  ;;  %v849_v37 = vld [vmem:[%s2895_s4 + $0x1598] sm:$0xff] }
 0x193   : > { %v850_v38 = vld [vmem:[%s2895_s4 + $0x15a0] sm:$0xff]  ;;  %2378 = vst [vmem:[%s2910_s18 + $0x1560] sm:$0xff] %v1610_v27  ;;  %2379 = vst [vmem:[%s2910_s18 + $0x1568] sm:$0xff] %v1611_v28  ;;  %v1616_v39 = vadd.f32 1.0, %v848_v36  ;;  %v1617_v40 = vadd.f32 1.0, %v849_v37  ;;  %v851_v42 = vld [vmem:[%s2895_s4 + $0x15a8] sm:$0xff] }
 0x194   : > { %2380 = vst [vmem:[%s2910_s18 + $0x1570] sm:$0xff] %v1612_v29  ;;  %v1618_v41 = vadd.f32 1.0, %v850_v38  ;;  %v852_v43 = vld [vmem:[%s2895_s4 + $0x15b0] sm:$0xff]  ;;  %v853_v44 = vld [vmem:[%s2895_s4 + $0x15b8] sm:$0xff]  ;;  %2381 = vst [vmem:[%s2910_s18 + $0x1578] sm:$0xff] %v1613_v33  ;;  %v1619_v45 = vadd.f32 1.0, %v851_v42 }
 0x195   : > { %2382 = vst [vmem:[%s2910_s18 + $0x1580] sm:$0xff] %v1614_v34  ;;  %2383 = vst [vmem:[%s2910_s18 + $0x1588] sm:$0xff] %v1615_v35  ;;  %v1620_v46 = vadd.f32 1.0, %v852_v43  ;;  %v1621_v47 = vadd.f32 1.0, %v853_v44  ;;  %v854_v48 = vld [vmem:[%s2895_s4 + $0x15c0] sm:$0xff]  ;;  %v855_v49 = vld [vmem:[%s2895_s4 + $0x15c8] sm:$0xff] }
 0x196   : > { %v856_v50 = vld [vmem:[%s2895_s4 + $0x15d0] sm:$0xff]  ;;  %2384 = vst [vmem:[%s2910_s18 + $0x1590] sm:$0xff] %v1616_v39  ;;  %2385 = vst [vmem:[%s2910_s18 + $0x1598] sm:$0xff] %v1617_v40  ;;  %v1622_v51 = vadd.f32 1.0, %v854_v48  ;;  %v1623_v52 = vadd.f32 1.0, %v855_v49  ;;  %v857_v54 = vld [vmem:[%s2895_s4 + $0x15d8] sm:$0xff] }
 0x197   : > { %2386 = vst [vmem:[%s2910_s18 + $0x15a0] sm:$0xff] %v1618_v41  ;;  %v1624_v53 = vadd.f32 1.0, %v856_v50  ;;  %v858_v55 = vld [vmem:[%s2895_s4 + $0x15e0] sm:$0xff]  ;;  %v859_v56 = vld [vmem:[%s2895_s4 + $0x15e8] sm:$0xff]  ;;  %2387 = vst [vmem:[%s2910_s18 + $0x15a8] sm:$0xff] %v1619_v45  ;;  %v1625_v57 = vadd.f32 1.0, %v857_v54 }
 0x198   : > { %2388 = vst [vmem:[%s2910_s18 + $0x15b0] sm:$0xff] %v1620_v46  ;;  %2389 = vst [vmem:[%s2910_s18 + $0x15b8] sm:$0xff] %v1621_v47  ;;  %v1626_v58 = vadd.f32 1.0, %v858_v55  ;;  %v1627_v59 = vadd.f32 1.0, %v859_v56  ;;  %v860_v60 = vld [vmem:[%s2895_s4 + $0x15f0] sm:$0xff]  ;;  %v861_v61 = vld [vmem:[%s2895_s4 + $0x15f8] sm:$0xff] }
 0x199   : > { %v862_v62 = vld [vmem:[%s2895_s4 + $0x1600] sm:$0xff]  ;;  %2390 = vst [vmem:[%s2910_s18 + $0x15c0] sm:$0xff] %v1622_v51  ;;  %2391 = vst [vmem:[%s2910_s18 + $0x15c8] sm:$0xff] %v1623_v52  ;;  %v1628_v63 = vadd.f32 1.0, %v860_v60  ;;  %v1629_v0 = vadd.f32 1.0, %v861_v61  ;;  %v863_v2 = vld [vmem:[%s2895_s4 + $0x1608] sm:$0xff] }
 0x19a   : > { %2392 = vst [vmem:[%s2910_s18 + $0x15d0] sm:$0xff] %v1624_v53  ;;  %v1630_v1 = vadd.f32 1.0, %v862_v62  ;;  %v864_v3 = vld [vmem:[%s2895_s4 + $0x1610] sm:$0xff]  ;;  %v865_v4 = vld [vmem:[%s2895_s4 + $0x1618] sm:$0xff]  ;;  %2393 = vst [vmem:[%s2910_s18 + $0x15d8] sm:$0xff] %v1625_v57  ;;  %v1631_v5 = vadd.f32 1.0, %v863_v2 }
 0x19b   : > { %2394 = vst [vmem:[%s2910_s18 + $0x15e0] sm:$0xff] %v1626_v58  ;;  %2395 = vst [vmem:[%s2910_s18 + $0x15e8] sm:$0xff] %v1627_v59  ;;  %v1632_v6 = vadd.f32 1.0, %v864_v3  ;;  %v1633_v7 = vadd.f32 1.0, %v865_v4  ;;  %v866_v8 = vld [vmem:[%s2895_s4 + $0x1620] sm:$0xff]  ;;  %v867_v9 = vld [vmem:[%s2895_s4 + $0x1628] sm:$0xff] }
 0x19c   : > { %v868_v10 = vld [vmem:[%s2895_s4 + $0x1630] sm:$0xff]  ;;  %2396 = vst [vmem:[%s2910_s18 + $0x15f0] sm:$0xff] %v1628_v63  ;;  %2397 = vst [vmem:[%s2910_s18 + $0x15f8] sm:$0xff] %v1629_v0  ;;  %v1634_v11 = vadd.f32 1.0, %v866_v8  ;;  %v1635_v12 = vadd.f32 1.0, %v867_v9  ;;  %v869_v14 = vld [vmem:[%s2895_s4 + $0x1638] sm:$0xff] }
 0x19d   : > { %2398 = vst [vmem:[%s2910_s18 + $0x1600] sm:$0xff] %v1630_v1  ;;  %v1636_v13 = vadd.f32 1.0, %v868_v10  ;;  %v870_v15 = vld [vmem:[%s2895_s4 + $0x1640] sm:$0xff]  ;;  %v871_v16 = vld [vmem:[%s2895_s4 + $0x1648] sm:$0xff]  ;;  %2399 = vst [vmem:[%s2910_s18 + $0x1608] sm:$0xff] %v1631_v5  ;;  %v1637_v17 = vadd.f32 1.0, %v869_v14 }
 0x19e   : > { %2400 = vst [vmem:[%s2910_s18 + $0x1610] sm:$0xff] %v1632_v6  ;;  %2401 = vst [vmem:[%s2910_s18 + $0x1618] sm:$0xff] %v1633_v7  ;;  %v1638_v18 = vadd.f32 1.0, %v870_v15  ;;  %v1639_v19 = vadd.f32 1.0, %v871_v16  ;;  %v872_v20 = vld [vmem:[%s2895_s4 + $0x1650] sm:$0xff]  ;;  %v873_v21 = vld [vmem:[%s2895_s4 + $0x1658] sm:$0xff] }
 0x19f   : > { %v874_v22 = vld [vmem:[%s2895_s4 + $0x1660] sm:$0xff]  ;;  %2402 = vst [vmem:[%s2910_s18 + $0x1620] sm:$0xff] %v1634_v11  ;;  %2403 = vst [vmem:[%s2910_s18 + $0x1628] sm:$0xff] %v1635_v12  ;;  %v1640_v23 = vadd.f32 1.0, %v872_v20  ;;  %v1641_v24 = vadd.f32 1.0, %v873_v21  ;;  %v875_v26 = vld [vmem:[%s2895_s4 + $0x1668] sm:$0xff] }
 0x1a0   : > { %2404 = vst [vmem:[%s2910_s18 + $0x1630] sm:$0xff] %v1636_v13  ;;  %v1642_v25 = vadd.f32 1.0, %v874_v22  ;;  %v876_v27 = vld [vmem:[%s2895_s4 + $0x1670] sm:$0xff]  ;;  %v877_v28 = vld [vmem:[%s2895_s4 + $0x1678] sm:$0xff]  ;;  %2405 = vst [vmem:[%s2910_s18 + $0x1638] sm:$0xff] %v1637_v17  ;;  %v1643_v29 = vadd.f32 1.0, %v875_v26 }
 0x1a1   : > { %2406 = vst [vmem:[%s2910_s18 + $0x1640] sm:$0xff] %v1638_v18  ;;  %2407 = vst [vmem:[%s2910_s18 + $0x1648] sm:$0xff] %v1639_v19  ;;  %v1644_v30 = vadd.f32 1.0, %v876_v27  ;;  %v1645_v31 = vadd.f32 1.0, %v877_v28  ;;  %v878_v32 = vld [vmem:[%s2895_s4 + $0x1680] sm:$0xff]  ;;  %v879_v33 = vld [vmem:[%s2895_s4 + $0x1688] sm:$0xff] }
 0x1a2   : > { %v880_v34 = vld [vmem:[%s2895_s4 + $0x1690] sm:$0xff]  ;;  %2408 = vst [vmem:[%s2910_s18 + $0x1650] sm:$0xff] %v1640_v23  ;;  %2409 = vst [vmem:[%s2910_s18 + $0x1658] sm:$0xff] %v1641_v24  ;;  %v1646_v35 = vadd.f32 1.0, %v878_v32  ;;  %v1647_v36 = vadd.f32 1.0, %v879_v33  ;;  %v881_v38 = vld [vmem:[%s2895_s4 + $0x1698] sm:$0xff] }
 0x1a3   : > { %2410 = vst [vmem:[%s2910_s18 + $0x1660] sm:$0xff] %v1642_v25  ;;  %v1648_v37 = vadd.f32 1.0, %v880_v34  ;;  %v882_v39 = vld [vmem:[%s2895_s4 + $0x16a0] sm:$0xff]  ;;  %v883_v40 = vld [vmem:[%s2895_s4 + $0x16a8] sm:$0xff]  ;;  %2411 = vst [vmem:[%s2910_s18 + $0x1668] sm:$0xff] %v1643_v29  ;;  %v1649_v41 = vadd.f32 1.0, %v881_v38 }
 0x1a4   : > { %2412 = vst [vmem:[%s2910_s18 + $0x1670] sm:$0xff] %v1644_v30  ;;  %2413 = vst [vmem:[%s2910_s18 + $0x1678] sm:$0xff] %v1645_v31  ;;  %v1650_v42 = vadd.f32 1.0, %v882_v39  ;;  %v1651_v43 = vadd.f32 1.0, %v883_v40  ;;  %v884_v44 = vld [vmem:[%s2895_s4 + $0x16b0] sm:$0xff]  ;;  %v885_v45 = vld [vmem:[%s2895_s4 + $0x16b8] sm:$0xff] }
 0x1a5   : > { %v886_v46 = vld [vmem:[%s2895_s4 + $0x16c0] sm:$0xff]  ;;  %2414 = vst [vmem:[%s2910_s18 + $0x1680] sm:$0xff] %v1646_v35  ;;  %2415 = vst [vmem:[%s2910_s18 + $0x1688] sm:$0xff] %v1647_v36  ;;  %v1652_v47 = vadd.f32 1.0, %v884_v44  ;;  %v1653_v48 = vadd.f32 1.0, %v885_v45  ;;  %v887_v50 = vld [vmem:[%s2895_s4 + $0x16c8] sm:$0xff] }
 0x1a6   : > { %2416 = vst [vmem:[%s2910_s18 + $0x1690] sm:$0xff] %v1648_v37  ;;  %v1654_v49 = vadd.f32 1.0, %v886_v46  ;;  %v888_v51 = vld [vmem:[%s2895_s4 + $0x16d0] sm:$0xff]  ;;  %v889_v52 = vld [vmem:[%s2895_s4 + $0x16d8] sm:$0xff]  ;;  %2417 = vst [vmem:[%s2910_s18 + $0x1698] sm:$0xff] %v1649_v41  ;;  %v1655_v53 = vadd.f32 1.0, %v887_v50 }
 0x1a7   : > { %2418 = vst [vmem:[%s2910_s18 + $0x16a0] sm:$0xff] %v1650_v42  ;;  %2419 = vst [vmem:[%s2910_s18 + $0x16a8] sm:$0xff] %v1651_v43  ;;  %v1656_v54 = vadd.f32 1.0, %v888_v51  ;;  %v1657_v55 = vadd.f32 1.0, %v889_v52  ;;  %v890_v56 = vld [vmem:[%s2895_s4 + $0x16e0] sm:$0xff]  ;;  %v891_v57 = vld [vmem:[%s2895_s4 + $0x16e8] sm:$0xff] }
 0x1a8   : > { %v892_v58 = vld [vmem:[%s2895_s4 + $0x16f0] sm:$0xff]  ;;  %2420 = vst [vmem:[%s2910_s18 + $0x16b0] sm:$0xff] %v1652_v47  ;;  %2421 = vst [vmem:[%s2910_s18 + $0x16b8] sm:$0xff] %v1653_v48  ;;  %v1658_v59 = vadd.f32 1.0, %v890_v56  ;;  %v1659_v60 = vadd.f32 1.0, %v891_v57  ;;  %v893_v62 = vld [vmem:[%s2895_s4 + $0x16f8] sm:$0xff] }
 0x1a9   : > { %2422 = vst [vmem:[%s2910_s18 + $0x16c0] sm:$0xff] %v1654_v49  ;;  %v1660_v61 = vadd.f32 1.0, %v892_v58  ;;  %v894_v63 = vld [vmem:[%s2895_s4 + $0x1700] sm:$0xff]  ;;  %v895_v0 = vld [vmem:[%s2895_s4 + $0x1708] sm:$0xff]  ;;  %2423 = vst [vmem:[%s2910_s18 + $0x16c8] sm:$0xff] %v1655_v53  ;;  %v1661_v1 = vadd.f32 1.0, %v893_v62 }
 0x1aa   : > { %2424 = vst [vmem:[%s2910_s18 + $0x16d0] sm:$0xff] %v1656_v54  ;;  %2425 = vst [vmem:[%s2910_s18 + $0x16d8] sm:$0xff] %v1657_v55  ;;  %v1662_v2 = vadd.f32 1.0, %v894_v63  ;;  %v1663_v3 = vadd.f32 1.0, %v895_v0  ;;  %v896_v4 = vld [vmem:[%s2895_s4 + $0x1710] sm:$0xff]  ;;  %v897_v5 = vld [vmem:[%s2895_s4 + $0x1718] sm:$0xff] }
 0x1ab   : > { %v898_v6 = vld [vmem:[%s2895_s4 + $0x1720] sm:$0xff]  ;;  %2426 = vst [vmem:[%s2910_s18 + $0x16e0] sm:$0xff] %v1658_v59  ;;  %2427 = vst [vmem:[%s2910_s18 + $0x16e8] sm:$0xff] %v1659_v60  ;;  %v1664_v7 = vadd.f32 1.0, %v896_v4  ;;  %v1665_v8 = vadd.f32 1.0, %v897_v5  ;;  %v899_v10 = vld [vmem:[%s2895_s4 + $0x1728] sm:$0xff] }
 0x1ac   : > { %2428 = vst [vmem:[%s2910_s18 + $0x16f0] sm:$0xff] %v1660_v61  ;;  %v1666_v9 = vadd.f32 1.0, %v898_v6  ;;  %v900_v11 = vld [vmem:[%s2895_s4 + $0x1730] sm:$0xff]  ;;  %v901_v12 = vld [vmem:[%s2895_s4 + $0x1738] sm:$0xff]  ;;  %2429 = vst [vmem:[%s2910_s18 + $0x16f8] sm:$0xff] %v1661_v1  ;;  %v1667_v13 = vadd.f32 1.0, %v899_v10 }
 0x1ad   : > { %2430 = vst [vmem:[%s2910_s18 + $0x1700] sm:$0xff] %v1662_v2  ;;  %2431 = vst [vmem:[%s2910_s18 + $0x1708] sm:$0xff] %v1663_v3  ;;  %v1668_v14 = vadd.f32 1.0, %v900_v11  ;;  %v1669_v15 = vadd.f32 1.0, %v901_v12  ;;  %v902_v16 = vld [vmem:[%s2895_s4 + $0x1740] sm:$0xff]  ;;  %v903_v17 = vld [vmem:[%s2895_s4 + $0x1748] sm:$0xff] }
 0x1ae   : > { %v904_v18 = vld [vmem:[%s2895_s4 + $0x1750] sm:$0xff]  ;;  %2432 = vst [vmem:[%s2910_s18 + $0x1710] sm:$0xff] %v1664_v7  ;;  %2433 = vst [vmem:[%s2910_s18 + $0x1718] sm:$0xff] %v1665_v8  ;;  %v1670_v19 = vadd.f32 1.0, %v902_v16  ;;  %v1671_v20 = vadd.f32 1.0, %v903_v17  ;;  %v905_v22 = vld [vmem:[%s2895_s4 + $0x1758] sm:$0xff] }
 0x1af   : > { %2434 = vst [vmem:[%s2910_s18 + $0x1720] sm:$0xff] %v1666_v9  ;;  %v1672_v21 = vadd.f32 1.0, %v904_v18  ;;  %v906_v23 = vld [vmem:[%s2895_s4 + $0x1760] sm:$0xff]  ;;  %v907_v24 = vld [vmem:[%s2895_s4 + $0x1768] sm:$0xff]  ;;  %2435 = vst [vmem:[%s2910_s18 + $0x1728] sm:$0xff] %v1667_v13  ;;  %v1673_v25 = vadd.f32 1.0, %v905_v22 }
 0x1b0   : > { %2436 = vst [vmem:[%s2910_s18 + $0x1730] sm:$0xff] %v1668_v14  ;;  %2437 = vst [vmem:[%s2910_s18 + $0x1738] sm:$0xff] %v1669_v15  ;;  %v1674_v26 = vadd.f32 1.0, %v906_v23  ;;  %v1675_v27 = vadd.f32 1.0, %v907_v24  ;;  %v908_v28 = vld [vmem:[%s2895_s4 + $0x1770] sm:$0xff]  ;;  %v909_v29 = vld [vmem:[%s2895_s4 + $0x1778] sm:$0xff] }
 0x1b1   : > { %v910_v30 = vld [vmem:[%s2895_s4 + $0x1780] sm:$0xff]  ;;  %2438 = vst [vmem:[%s2910_s18 + $0x1740] sm:$0xff] %v1670_v19  ;;  %2439 = vst [vmem:[%s2910_s18 + $0x1748] sm:$0xff] %v1671_v20  ;;  %v1676_v31 = vadd.f32 1.0, %v908_v28  ;;  %v1677_v32 = vadd.f32 1.0, %v909_v29  ;;  %v911_v34 = vld [vmem:[%s2895_s4 + $0x1788] sm:$0xff] }
 0x1b2   : > { %2440 = vst [vmem:[%s2910_s18 + $0x1750] sm:$0xff] %v1672_v21  ;;  %v1678_v33 = vadd.f32 1.0, %v910_v30  ;;  %v912_v35 = vld [vmem:[%s2895_s4 + $0x1790] sm:$0xff]  ;;  %v913_v36 = vld [vmem:[%s2895_s4 + $0x1798] sm:$0xff]  ;;  %2441 = vst [vmem:[%s2910_s18 + $0x1758] sm:$0xff] %v1673_v25  ;;  %v1679_v37 = vadd.f32 1.0, %v911_v34 }
 0x1b3   : > { %2442 = vst [vmem:[%s2910_s18 + $0x1760] sm:$0xff] %v1674_v26  ;;  %2443 = vst [vmem:[%s2910_s18 + $0x1768] sm:$0xff] %v1675_v27  ;;  %v1680_v38 = vadd.f32 1.0, %v912_v35  ;;  %v1681_v39 = vadd.f32 1.0, %v913_v36  ;;  %v914_v40 = vld [vmem:[%s2895_s4 + $0x17a0] sm:$0xff]  ;;  %v915_v41 = vld [vmem:[%s2895_s4 + $0x17a8] sm:$0xff] }
 0x1b4   : > { %v916_v42 = vld [vmem:[%s2895_s4 + $0x17b0] sm:$0xff]  ;;  %2444 = vst [vmem:[%s2910_s18 + $0x1770] sm:$0xff] %v1676_v31  ;;  %2445 = vst [vmem:[%s2910_s18 + $0x1778] sm:$0xff] %v1677_v32  ;;  %v1682_v43 = vadd.f32 1.0, %v914_v40  ;;  %v1683_v44 = vadd.f32 1.0, %v915_v41  ;;  %v917_v46 = vld [vmem:[%s2895_s4 + $0x17b8] sm:$0xff] }
 0x1b5   : > { %2446 = vst [vmem:[%s2910_s18 + $0x1780] sm:$0xff] %v1678_v33  ;;  %v1684_v45 = vadd.f32 1.0, %v916_v42  ;;  %v918_v47 = vld [vmem:[%s2895_s4 + $0x17c0] sm:$0xff]  ;;  %v919_v48 = vld [vmem:[%s2895_s4 + $0x17c8] sm:$0xff]  ;;  %2447 = vst [vmem:[%s2910_s18 + $0x1788] sm:$0xff] %v1679_v37  ;;  %v1685_v49 = vadd.f32 1.0, %v917_v46 }
 0x1b6   : > { %2448 = vst [vmem:[%s2910_s18 + $0x1790] sm:$0xff] %v1680_v38  ;;  %2449 = vst [vmem:[%s2910_s18 + $0x1798] sm:$0xff] %v1681_v39  ;;  %v1686_v50 = vadd.f32 1.0, %v918_v47  ;;  %v1687_v51 = vadd.f32 1.0, %v919_v48  ;;  %v920_v52 = vld [vmem:[%s2895_s4 + $0x17d0] sm:$0xff]  ;;  %v921_v53 = vld [vmem:[%s2895_s4 + $0x17d8] sm:$0xff] }
 0x1b7   : > { %v922_v54 = vld [vmem:[%s2895_s4 + $0x17e0] sm:$0xff]  ;;  %2450 = vst [vmem:[%s2910_s18 + $0x17a0] sm:$0xff] %v1682_v43  ;;  %2451 = vst [vmem:[%s2910_s18 + $0x17a8] sm:$0xff] %v1683_v44  ;;  %v1688_v55 = vadd.f32 1.0, %v920_v52  ;;  %v1689_v56 = vadd.f32 1.0, %v921_v53  ;;  %v923_v58 = vld [vmem:[%s2895_s4 + $0x17e8] sm:$0xff] }
 0x1b8   : > { %2452 = vst [vmem:[%s2910_s18 + $0x17b0] sm:$0xff] %v1684_v45  ;;  %v1690_v57 = vadd.f32 1.0, %v922_v54  ;;  %v924_v59 = vld [vmem:[%s2895_s4 + $0x17f0] sm:$0xff]  ;;  %v925_v60 = vld [vmem:[%s2895_s4 + $0x17f8] sm:$0xff]  ;;  %2453 = vst [vmem:[%s2910_s18 + $0x17b8] sm:$0xff] %v1685_v49  ;;  %v1691_v61 = vadd.f32 1.0, %v923_v58 }
 0x1b9   : > { %2454 = vst [vmem:[%s2910_s18 + $0x17c0] sm:$0xff] %v1686_v50  ;;  %2455 = vst [vmem:[%s2910_s18 + $0x17c8] sm:$0xff] %v1687_v51  ;;  %v1692_v62 = vadd.f32 1.0, %v924_v59  ;;  %v1693_v63 = vadd.f32 1.0, %v925_v60  ;;  %s2463_s12 = scalar_lea.sflag [#allocation4], %s2891_s27  ;;  %s2679_s13 = scalar_lea.vmem %s4446_s28, 98304 }
 0x1ba   : > { %2456 = vst [vmem:[%s2910_s18 + $0x17d0] sm:$0xff] %v1688_v55  ;;  %2457 = vst [vmem:[%s2910_s18 + $0x17d8] sm:$0xff] %v1689_v56  ;;  %p2680_p8 = scmp.ne.s32.totalorder %s4446_s28, %s2679_s13  ;;  %p4504_p9 = scmp.ne.s32.totalorder %s4500_s19, 0 }
 0x1bb   : > { %2458 = vst [vmem:[%s2910_s18 + $0x17e0] sm:$0xff] %v1690_v57  ;;  %2459 = vst [vmem:[%s2910_s18 + $0x17e8] sm:$0xff] %v1691_v61  ;;  %s2766_s9 = smov [#allocation5]  }
 0x1bc   : > { %2460 = vst [vmem:[%s2910_s18 + $0x17f0] sm:$0xff] %v1692_v62  ;;  %2461 = vst [vmem:[%s2910_s18 + $0x17f8] sm:$0xff] %v1693_v63  ;;  %p2681_p11 = pnand %p2680_p8, %p4504_p9  ;;  %s2683_s15 = sshll.u32 %s2766_s9, 4  ;;  %s2684_s15 = int_to_ptr.vmem [resolvable:$false] %s2683_s15 }
 0x1bd   : > { %s2685_s16 = scalar_lea.vmem %s2684_s15, 196608  ;;  %p2686_p5 = scmp.lt.s32.totalorder %s4446_s28, %s2684_s15 }
 0x1be   : > { %p2682_p0 = pneg %p2681_p11  ;;  %p2687_p13 = scmp.lt.s32.totalorder %s2685_s16, %s2679_s13 }
 0x1c0   : > { %p2688_p2 = por %p2687_p13, %p2686_p5 }
 0x1c2   : > { %p2689_p4 = pnand %p2688_p2, %p2682_p0 }
 0x1c4   : > { %2692 = shalt.err (!%p2689_p4)
}
 0x1c5   : > { %s2693_s17 = scalar_lea.hbm %s4444_s5, 98304  ;;  %s2697_s24 = scalar_lea.hbm %s4496_s1, 196608 }
 0x1c6   : > { %p2694_p6 = scmp.ne.s32.totalorder %s4444_s5, %s2693_s17  ;;  %p2698_p12 = scmp.lt.u32.totalorder %s4444_s5, %s4496_s1 }
 0x1c7   : > { %p2699_p1 = scmp.lt.u32.totalorder %s2697_s24, %s2693_s17  ;;  %p2701_p8 = scmp.lt.u32.totalorder %s2693_s17, %s4444_s5 }
 0x1c8   : > { %p2695_p7 = pnand %p2694_p6, %p4504_p9 }
 0x1c9   : > { %p2700_p3 = por %p2699_p1, %p2698_p12 }
 0x1ca   : > { %p2696_p10 = pneg %p2695_p7 }
 0x1cb   : > { %p2702_p11 = por %p2701_p8, %p2700_p3 }
 0x1cd   : > { %p2703_p0 = pnand %p2702_p11, %p2696_p10 }
 0x1cf   : > { %2706 = shalt.err (!%p2703_p0)
}
 0x1d0   : > { %s2767_s3 = smov 1536   ;;  %s2768_s4 = smov 96  }
 0x1d1   : > { %2585 = dma.vmem_to_hbm [thread:$0]  (%p4504_p9), %s4446_s28, 98304, %s4444_s5, %s2463_s12, %s2767_s3, %s2767_s3, %s2768_s4  }
 0x1d2 PF: > { %s2494_s18 = sand.u32 1, %s2741_s6   ;;  %p4505_p5 = scmp.ne.s32.totalorder %s4501_s21, 0 }
 0x1d3   : > { %p4506_p13 = scmp.ge.s32.totalorder %s2761_s11, 2  ;;  %s2495_s25 = scalar_lea.sflag [#allocation4], %s2494_s18 }
 0x1d5   : > { %p2592_p2 = pnand %p4506_p13, %p4505_p5 }
 0x1d7   : > { %2736 = dma.done.wait (!%p2592_p2), %s2495_s25, 98304  }
 0x1d8   : > { %2738 = vsyncadd (!%p2592_p2), %s2495_s25, 4294868992  ;;  %s17_s11 = sadd.s32 1, %s2761_s11   ;;  %s4507_s6 = smov %s2745_s7 }
 0x1d9   : > { %p14_p4 = scmp.ge.s32.totalorder %s17_s11, 4   ;;  %s4508_s7 = smov %s2749_s8 }
 0x1da   : > { %s4509_s8 = smov %s2835_s20  ;;  %s4510_s9 = smov %s2757_s10 }
 0x1db   : > { %s4511_s10 = smov %s4513_s14  ;;  %16 = sbr.rel (!%p14_p4) target bundleno = 6 (0x6), region = 69 }
 0x1e2   :  { %2500 = vsyncpa [#allocation3], 1 }
 0x1e3   :  { %2502 = vsyncpa [#allocation3 + $0x1], 1 }
 0x1e4   :  { %2503 = vsyncpa [#allocation4], 1 }
 0x1e5   :  { %2505 = vsyncpa [#allocation4 + $0x1], 1 }

</bundles_post_ra>
